<compile_context>
chip_gen: v7x
topology: tpu7x:2x2x1
jax: 0.10.0
libtpu: 0.0.40
codegen_flags: <defaults>
</compile_context>

<pallas_src>
import functools

import jax
import jax.numpy as jnp
from jax.experimental import pallas as pl
from jax.experimental.pallas import tpu as pltpu


def _round_up(x, m):
    return (x + m - 1) // m * m


# ----------------------------------------------------------------------------
# Pallas kernel 1: tiled matmul + per-output-channel scale/shift (+ ReLU)
#     out = act( (x @ w) * scale + shift )
# bf16 operands on the MXU, f32 accumulation in VMEM scratch, f32 epilogue.
# ----------------------------------------------------------------------------
def _fused_matmul_kernel(x_ref, w_ref, scale_ref, shift_ref, o_ref, acc_ref, *, relu):
    k = pl.program_id(2)

    @pl.when(k == 0)
    def _init():
        acc_ref[...] = jnp.zeros_like(acc_ref)

    acc_ref[...] += jnp.dot(
        x_ref[...], w_ref[...], preferred_element_type=jnp.float32
    )

    @pl.when(k == pl.num_programs(2) - 1)
    def _epilogue():
        y = acc_ref[...] * scale_ref[...] + shift_ref[...]  # keep epilogue in f32
        if relu:
            y = jnp.maximum(y, 0.0)
        o_ref[...] = y.astype(o_ref.dtype)


def fused_matmul(x, w, scale, shift, *, relu=True, out_dtype=jnp.bfloat16,
                 tm=512, tn=256):
    """relu((x @ w) * scale + shift); scale/shift broadcast over rows.

    Pads M to a multiple of 16 (bf16 sublane packing), N/K to multiples of 128
    (lane-dense, unmasked stores), and slices the padding off in the wrapper.
    """
    M, K = x.shape
    K2, N = w.shape
    assert K == K2

    # ---- tile sizes (bounded VMEM regardless of batch; 256-wide MXU feeds) ----
    tm = min(tm, _round_up(M, 16))
    tn = min(tn, _round_up(N, 128))
    k_pad = _round_up(K, 128)
    tk = k_pad if k_pad <= 640 else 256  # small K: whole reduction in one step

    Mp = _round_up(M, tm)
    Np = _round_up(N, tn)
    Kp = _round_up(K, tk)

    # ---- pad + cast (bf16 MXU operands; scale/shift stay f32) ----
    xp = jnp.pad(x.astype(jnp.bfloat16), ((0, Mp - M), (0, Kp - K)))
    wp = jnp.pad(w.astype(jnp.bfloat16), ((0, Kp - K), (0, Np - N)))
    scale_p = jnp.pad(scale.reshape(1, N).astype(jnp.float32), ((0, 0), (0, Np - N)))
    shift_p = jnp.pad(shift.reshape(1, N).astype(jnp.float32), ((0, 0), (0, Np - N)))

    grid = (Mp // tm, Np // tn, Kp // tk)
    out_bytes = jnp.dtype(out_dtype).itemsize
    cost = pl.CostEstimate(
        flops=2 * Mp * Np * Kp,
        transcendentals=0,
        bytes_accessed=Mp * Kp * 2 + Kp * Np * 2 + Mp * Np * out_bytes,
    )

    kernel = functools.partial(_fused_matmul_kernel, relu=relu)
    out = pl.pallas_call(
        kernel,
        out_shape=jax.ShapeDtypeStruct((Mp, Np), out_dtype),
        grid_spec=pltpu.PrefetchScalarGridSpec(
            num_scalar_prefetch=0,
            grid=grid,
            in_specs=[
                pl.BlockSpec((tm, tk), lambda i, j, k: (i, k)),
                pl.BlockSpec((tk, tn), lambda i, j, k: (k, j)),
                pl.BlockSpec((1, tn), lambda i, j, k: (0, j)),
                pl.BlockSpec((1, tn), lambda i, j, k: (0, j)),
            ],
            out_specs=pl.BlockSpec((tm, tn), lambda i, j, k: (i, j)),
            scratch_shapes=[pltpu.VMEM((tm, tn), jnp.float32)],
        ),
        compiler_params=pltpu.CompilerParams(
            dimension_semantics=("parallel", "parallel", "arbitrary"),
            # Explicit scoped-VMEM budget; tiles above use ~2 MiB double-buffered,
            # 48 MiB stays inside v7x's 64 MiB physical VMEM (128 MiB on v5e/v6e).
            vmem_limit_bytes=48 * 1024 * 1024,
        ),
        cost_estimate=cost,
    )(xp, wp, scale_p, shift_p)
    return out[:M, :N]


# ----------------------------------------------------------------------------
# Pallas kernel 2: fused FC stack  fc1 -> ReLU -> fc2 -> ReLU -> fc3
# (dropout1/dropout2 are identity in inference). Weights live in VMEM; only the
# batch axis is gridded. Final output padded to 128 lanes, sliced in wrapper.
# ----------------------------------------------------------------------------
def _fc_stack_kernel(x_ref, w1_ref, b1_ref, w2_ref, b2_ref, w3_ref, b3_ref, o_ref):
    h = jnp.dot(x_ref[...], w1_ref[...], preferred_element_type=jnp.float32)
    h = jnp.maximum(h + b1_ref[...], 0.0).astype(jnp.bfloat16)   # fc1 + ReLU
    h = jnp.dot(h, w2_ref[...], preferred_element_type=jnp.float32)
    h = jnp.maximum(h + b2_ref[...], 0.0).astype(jnp.bfloat16)   # fc2 + ReLU
    y = jnp.dot(h, w3_ref[...], preferred_element_type=jnp.float32) + b3_ref[...]
    o_ref[...] = y.astype(o_ref.dtype)                           # fc3 (logits)


def fc_stack(x, w1, b1, w2, b2, w3, b3, *, tm=256):
    M, K1 = x.shape
    D1, D2, D3 = w1.shape[1], w2.shape[1], w3.shape[1]
    assert K1 % 128 == 0 and D1 % 128 == 0 and D2 % 128 == 0

    tm = min(tm, _round_up(M, 16))
    Mp = _round_up(M, tm)
    D3p = _round_up(D3, 128)  # lane-dense final store (fc3 has only 10 outputs)

    xp = jnp.pad(x.astype(jnp.bfloat16), ((0, Mp - M), (0, 0)))
    w1b = w1.astype(jnp.bfloat16)
    w2b = w2.astype(jnp.bfloat16)
    w3b = jnp.pad(w3.astype(jnp.bfloat16), ((0, 0), (0, D3p - D3)))
    b1f = b1.reshape(1, D1).astype(jnp.float32)
    b2f = b2.reshape(1, D2).astype(jnp.float32)
    b3f = jnp.pad(b3.reshape(1, D3).astype(jnp.float32), ((0, 0), (0, D3p - D3)))

    cost = pl.CostEstimate(
        flops=2 * Mp * (K1 * D1 + D1 * D2 + D2 * D3p),
        transcendentals=0,
        bytes_accessed=Mp * K1 * 2 + (K1 * D1 + D1 * D2 + D2 * D3p) * 2 + Mp * D3p * 4,
    )
    out = pl.pallas_call(
        _fc_stack_kernel,
        out_shape=jax.ShapeDtypeStruct((Mp, D3p), jnp.float32),
        grid_spec=pltpu.PrefetchScalarGridSpec(
            num_scalar_prefetch=0,
            grid=(Mp // tm,),
            in_specs=[
                pl.BlockSpec((tm, K1), lambda i: (i, 0)),
                pl.BlockSpec((K1, D1), lambda i: (0, 0)),
                pl.BlockSpec((1, D1), lambda i: (0, 0)),
                pl.BlockSpec((D1, D2), lambda i: (0, 0)),
                pl.BlockSpec((1, D2), lambda i: (0, 0)),
                pl.BlockSpec((D2, D3p), lambda i: (0, 0)),
                pl.BlockSpec((1, D3p), lambda i: (0, 0)),
            ],
            out_specs=pl.BlockSpec((tm, D3p), lambda i: (i, 0)),
        ),
        compiler_params=pltpu.CompilerParams(
            dimension_semantics=("parallel",),
            vmem_limit_bytes=48 * 1024 * 1024,
        ),
        cost_estimate=cost,
    )(xp, w1b, b1f, w2b, b2f, w3b, b3f)
    return out[:M, :D3]


# ----------------------------------------------------------------------------
# Layout plumbing (plain JAX / XLA): im2col patch extraction, 2x2 max pool.
# ----------------------------------------------------------------------------
def im2col_3x3_pad1(x_nhwc):
    """(N,H,W,C) -> (N*H*W, 9*C); column order = (ky*3+kx)*C + c."""
    N, H, W, C = x_nhwc.shape
    xp = jnp.pad(x_nhwc, ((0, 0), (1, 1), (1, 1), (0, 0)))
    taps = [xp[:, dy:dy + H, dx:dx + W, :] for dy in range(3) for dx in range(3)]
    return jnp.concatenate(taps, axis=-1).reshape(N * H * W, 9 * C)


def maxpool_2x2(x_nhwc):
    """MaxPool2d(2,2) with floor division of spatial dims (PyTorch default)."""
    N, H, W, C = x_nhwc.shape
    H2, W2 = H // 2, W // 2
    x = x_nhwc[:, : H2 * 2, : W2 * 2, :]
    return jnp.max(x.reshape(N, H2, 2, W2, 2, C), axis=(2, 4))


# ----------------------------------------------------------------------------
# Layers
# ----------------------------------------------------------------------------
def conv_bn_relu(x_nhwc, w, b, gamma, beta, mean, var, eps=1e-5):
    """3x3 conv (pad=1) + BatchNorm(eval) + ReLU; hot path in the tiled Pallas kernel.

    Note: conv1 has K=9 after im2col (MXU-starved); it still reuses the same
    kernel with a single padded K step so it costs one launch, same as any
    alternative -- the real work is conv2/conv3.
    """
    N, H, W, C_in = x_nhwc.shape
    C_out = w.shape[0]
    patches = im2col_3x3_pad1(x_nhwc)                              # (N*H*W, 9*C_in)
    # PyTorch conv weight (C_out, C_in, kh, kw) -> (kh*kw*C_in, C_out), matching patches.
    w_mat = jnp.transpose(w, (2, 3, 1, 0)).reshape(9 * C_in, C_out)
    scale = gamma / jnp.sqrt(var + eps)                            # BN fold
    shift = beta - mean * scale + b * scale                        # conv bias folded in
    out = fused_matmul(patches, w_mat, scale, shift, relu=True,
                       out_dtype=jnp.bfloat16)                     # (N*H*W, C_out)
    return out.reshape(N, H, W, C_out)


def enhanced_cnn_forward(x_nchw, params):
    x = jnp.transpose(x_nchw, (0, 2, 3, 1)).astype(jnp.bfloat16)   # NCHW -> NHWC, bf16
    x = conv_bn_relu(x, *params["conv1"])                          # (N,28,28,32)
    x = maxpool_2x2(x)                                             # 28 -> 14
    x = conv_bn_relu(x, *params["conv2"])                          # (N,14,14,64)
    x = maxpool_2x2(x)                                             # 14 -> 7
    x = conv_bn_relu(x, *params["conv3"])                          # (N,7,7,128)
    x = maxpool_2x2(x)                                             # 7 -> 3
    # match torch x.view(-1, 128*3*3): flatten in (C, H, W) order
    N = x.shape[0]
    x = jnp.transpose(x, (0, 3, 1, 2)).reshape(N, 128 * 3 * 3)
    # fc1+ReLU+(dropout1)+fc2+ReLU+(dropout2)+fc3 fused into one Pallas call.
    # TODO(synk): training-mode dropout RNG masks omitted (inference semantics).
    return fc_stack(x, params["fc1_w"], params["fc1_b"],
                    params["fc2_w"], params["fc2_b"],
                    params["fc3_w"], params["fc3_b"])


# ----------------------------------------------------------------------------
# Deterministic parameter initialization
# (FC weights stored as (d_in, d_out); porting real nn.Linear weights, which are
#  (out_features, in_features), requires a transpose.)
# ----------------------------------------------------------------------------
def init_params(key):
    keys = jax.random.split(key, 12)

    def conv_params(kw, kb, c_out, c_in):
        fan_in = c_in * 9
        w = jax.random.normal(kw, (c_out, c_in, 3, 3), jnp.float32) / jnp.sqrt(fan_in)
        b = 0.01 * jax.random.normal(kb, (c_out,), jnp.float32)
        gamma = jnp.ones((c_out,), jnp.float32)
        beta = jnp.zeros((c_out,), jnp.float32)
        mean = jnp.zeros((c_out,), jnp.float32)
        var = jnp.ones((c_out,), jnp.float32)
        return (w, b, gamma, beta, mean, var)

    def fc_params(kw, kb, d_in, d_out):
        w = jax.random.normal(kw, (d_in, d_out), jnp.float32) / jnp.sqrt(d_in)
        b = 0.01 * jax.random.normal(kb, (d_out,), jnp.float32)
        return w, b

    params = {}
    params["conv1"] = conv_params(keys[0], keys[1], 32, 1)
    params["conv2"] = conv_params(keys[2], keys[3], 64, 32)
    params["conv3"] = conv_params(keys[4], keys[5], 128, 64)
    params["fc1_w"], params["fc1_b"] = fc_params(keys[6], keys[7], 128 * 3 * 3, 256)
    params["fc2_w"], params["fc2_b"] = fc_params(keys[8], keys[9], 256, 128)
    params["fc3_w"], params["fc3_b"] = fc_params(keys[10], keys[11], 128, 10)
    return params


if __name__ == "__main__":
    key = jax.random.PRNGKey(0)
    k_x, k_p = jax.random.split(key)
    # Input implied by the module (fc1 expects 128*3*3 after 3 pools): (N, 1, 28, 28).
    # NOTE: tiles above are sized for production batches (>=256); batch 2 here is only
    # a small correctness/run harness.
    x = jax.random.normal(k_x, (2, 1, 28, 28), jnp.float32)
    params = init_params(k_p)

    fwd = jax.jit(enhanced_cnn_forward)
    out = jax.block_until_ready(fwd(x, params))
    assert out.shape == (2, 10), out.shape
    assert bool(jnp.all(jnp.isfinite(out)))
    print("KERNEL_OK")
</pallas_src>

<mosaic_0001>
module attributes {stable_mosaic.version = 11 : i64} {
  func.func @_fused_matmul_kernel(%arg0: i32, %arg1: i32, %arg2: i32, %arg3: memref<512x128xbf16, #tpu.memory_space<vmem>>, %arg4: memref<128x128xbf16, #tpu.memory_space<vmem>>, %arg5: memref<1x128xf32, #tpu.memory_space<vmem>>, %arg6: memref<1x128xf32, #tpu.memory_space<vmem>>, %arg7: memref<512x128xbf16, #tpu.memory_space<vmem>>, %arg8: memref<512x128xf32, #tpu.memory_space<vmem>>) attributes {dimension_semantics = [#tpu.dimension_semantics<parallel>, #tpu.dimension_semantics<parallel>, #tpu.dimension_semantics<arbitrary>], iteration_bounds = array<i64: 4, 1, 1>, scalar_prefetch = 0 : i64, scratch_operands = 1 : i64, tpu.core_type = #tpu.core_type<tc>, window_params = [{transform_indices = @transform_0, window_bounds = array<i64: 512, 128>}, {transform_indices = @transform_1, window_bounds = array<i64: 128, 128>}, {transform_indices = @transform_2, window_bounds = array<i64: 1, 128>}, {transform_indices = @transform_3, window_bounds = array<i64: 1, 128>}, {transform_indices = @transform_4, window_bounds = array<i64: 512, 128>}]} {
    %c0_i32 = arith.constant 0 : i32
    %0 = arith.cmpi eq, %arg2, %c0_i32 : i32
    %1 = arith.extui %0 : i1 to i32
    %c0_i32_0 = arith.constant 0 : i32
    %2 = arith.cmpi ne, %1, %c0_i32_0 : i32
    scf.if %2 {
      %cst_10 = arith.constant 0.000000e+00 : f32
      %12 = vector.broadcast %cst_10 : f32 to vector<512x128xf32>
      %c0_11 = arith.constant 0 : index
      %c0_12 = arith.constant 0 : index
      %13 = vector.load %arg8[%c0_11, %c0_12] : memref<512x128xf32, #tpu.memory_space<vmem>>, vector<512x128xf32>
      tpu.vector_store %arg8[%c0_11, %c0_12], %12 {strides = array<i32>} : memref<512x128xf32, #tpu.memory_space<vmem>>, vector<512x128xf32>,
    } else {
    }
    %c0 = arith.constant 0 : index
    %c0_1 = arith.constant 0 : index
    %3 = vector.load %arg8[%c0, %c0_1] : memref<512x128xf32, #tpu.memory_space<vmem>>, vector<512x128xf32>
    %c0_2 = arith.constant 0 : index
    %c0_3 = arith.constant 0 : index
    %4 = vector.load %arg3[%c0_2, %c0_3] : memref<512x128xbf16, #tpu.memory_space<vmem>>, vector<512x128xbf16>
    %c0_4 = arith.constant 0 : index
    %c0_5 = arith.constant 0 : index
    %5 = vector.load %arg4[%c0_4, %c0_5] : memref<128x128xbf16, #tpu.memory_space<vmem>>, vector<128x128xbf16>
    %cst = arith.constant dense<0.000000e+00> : vector<512x128xf32>
    %6 = tpu.matmul %4, %5, %cst {dimension_numbers = #tpu.dot_dimension_numbers<[1], [0], [0], [1], [0, 0, 1, 1], [], []>} : vector<512x128xbf16>, vector<128x128xbf16>, vector<512x128xf32> -> vector<512x128xf32>
    %7 = arith.addf %3, %6 : vector<512x128xf32>
    %c0_6 = arith.constant 0 : index
    %c0_7 = arith.constant 0 : index
    %8 = vector.load %arg8[%c0_6, %c0_7] : memref<512x128xf32, #tpu.memory_space<vmem>>, vector<512x128xf32>
    tpu.vector_store %arg8[%c0_6, %c0_7], %7 {strides = array<i32>} : memref<512x128xf32, #tpu.memory_space<vmem>>, vector<512x128xf32>,
    %c0_i32_8 = arith.constant 0 : i32
    %9 = arith.cmpi eq, %arg2, %c0_i32_8 : i32
    %10 = arith.extui %9 : i1 to i32
    %c0_i32_9 = arith.constant 0 : i32
    %11 = arith.cmpi ne, %10, %c0_i32_9 : i32
    scf.if %11 {
      %c0_10 = arith.constant 0 : index
      %c0_11 = arith.constant 0 : index
      %12 = vector.load %arg8[%c0_10, %c0_11] : memref<512x128xf32, #tpu.memory_space<vmem>>, vector<512x128xf32>
      %c0_12 = arith.constant 0 : index
      %c0_13 = arith.constant 0 : index
      %13 = vector.load %arg5[%c0_12, %c0_13] : memref<1x128xf32, #tpu.memory_space<vmem>>, vector<1x128xf32>
      %14 = vector.broadcast %13 : vector<1x128xf32> to vector<512x128xf32>
      %15 = arith.mulf %12, %14 : vector<512x128xf32>
      %c0_14 = arith.constant 0 : index
      %c0_15 = arith.constant 0 : index
      %16 = vector.load %arg6[%c0_14, %c0_15] : memref<1x128xf32, #tpu.memory_space<vmem>>, vector<1x128xf32>
      %17 = vector.broadcast %16 : vector<1x128xf32> to vector<512x128xf32>
      %18 = arith.addf %15, %17 : vector<512x128xf32>
      %cst_16 = arith.constant 0.000000e+00 : f32
      %19 = vector.broadcast %cst_16 : f32 to vector<512x128xf32>
      %20 = arith.maximumf %18, %19 : vector<512x128xf32>
      %21 = arith.truncf %20 : vector<512x128xf32> to vector<512x128xbf16>
      %c0_17 = arith.constant 0 : index
      %c0_18 = arith.constant 0 : index
      %22 = vector.load %arg7[%c0_17, %c0_18] : memref<512x128xbf16, #tpu.memory_space<vmem>>, vector<512x128xbf16>
      tpu.vector_store %arg7[%c0_17, %c0_18], %21 {strides = array<i32>} : memref<512x128xbf16, #tpu.memory_space<vmem>>, vector<512x128xbf16>,
    } else {
    }
    return
  }
  func.func @transform_0(%arg0: i32, %arg1: i32, %arg2: i32) -> (i32, i32) {
    %c0_i32 = arith.constant 0 : i32
    return %arg0, %arg2 : i32, i32
  }
  func.func @transform_1(%arg0: i32, %arg1: i32, %arg2: i32) -> (i32, i32) {
    %c0_i32 = arith.constant 0 : i32
    return %arg2, %arg1 : i32, i32
  }
  func.func @transform_2(%arg0: i32, %arg1: i32, %arg2: i32) -> (i32, i32) {
    %c0_i32 = arith.constant 0 : i32
    %c0_i32_0 = arith.constant 0 : i32
    return %c0_i32, %arg1 : i32, i32
  }
  func.func @transform_3(%arg0: i32, %arg1: i32, %arg2: i32) -> (i32, i32) {
    %c0_i32 = arith.constant 0 : i32
    %c0_i32_0 = arith.constant 0 : i32
    return %c0_i32, %arg1 : i32, i32
  }
  func.func @transform_4(%arg0: i32, %arg1: i32, %arg2: i32) -> (i32, i32) {
    %c0_i32 = arith.constant 0 : i32
    return %arg0, %arg1 : i32, i32
  }
}

module attributes {stable_mosaic.version = 11 : i64} {
  func.func @_fused_matmul_kernel(%arg0: i32, %arg1: i32, %arg2: i32, %arg3: memref<400x384xbf16, #tpu.memory_space<vmem>>, %arg4: memref<384x128xbf16, #tpu.memory_space<vmem>>, %arg5: memref<1x128xf32, #tpu.memory_space<vmem>>, %arg6: memref<1x128xf32, #tpu.memory_space<vmem>>, %arg7: memref<400x128xbf16, #tpu.memory_space<vmem>>, %arg8: memref<400x128xf32, #tpu.memory_space<vmem>>) attributes {dimension_semantics = [#tpu.dimension_semantics<parallel>, #tpu.dimension_semantics<parallel>, #tpu.dimension_semantics<arbitrary>], iteration_bounds = array<i64: 1, 1, 1>, scalar_prefetch = 0 : i64, scratch_operands = 1 : i64, tpu.core_type = #tpu.core_type<tc>, window_params = [{transform_indices = @transform_0, window_bounds = array<i64: 400, 384>}, {transform_indices = @transform_1, window_bounds = array<i64: 384, 128>}, {transform_indices = @transform_2, window_bounds = array<i64: 1, 128>}, {transform_indices = @transform_3, window_bounds = array<i64: 1, 128>}, {transform_indices = @transform_4, window_bounds = array<i64: 400, 128>}]} {
    %c0_i32 = arith.constant 0 : i32
    %0 = arith.cmpi eq, %arg2, %c0_i32 : i32
    %1 = arith.extui %0 : i1 to i32
    %c0_i32_0 = arith.constant 0 : i32
    %2 = arith.cmpi ne, %1, %c0_i32_0 : i32
    scf.if %2 {
      %cst_10 = arith.constant 0.000000e+00 : f32
      %12 = vector.broadcast %cst_10 : f32 to vector<400x128xf32>
      %c0_11 = arith.constant 0 : index
      %c0_12 = arith.constant 0 : index
      %13 = vector.load %arg8[%c0_11, %c0_12] : memref<400x128xf32, #tpu.memory_space<vmem>>, vector<400x128xf32>
      tpu.vector_store %arg8[%c0_11, %c0_12], %12 {strides = array<i32>} : memref<400x128xf32, #tpu.memory_space<vmem>>, vector<400x128xf32>,
    } else {
    }
    %c0 = arith.constant 0 : index
    %c0_1 = arith.constant 0 : index
    %3 = vector.load %arg8[%c0, %c0_1] : memref<400x128xf32, #tpu.memory_space<vmem>>, vector<400x128xf32>
    %c0_2 = arith.constant 0 : index
    %c0_3 = arith.constant 0 : index
    %4 = vector.load %arg3[%c0_2, %c0_3] : memref<400x384xbf16, #tpu.memory_space<vmem>>, vector<400x384xbf16>
    %c0_4 = arith.constant 0 : index
    %c0_5 = arith.constant 0 : index
    %5 = vector.load %arg4[%c0_4, %c0_5] : memref<384x128xbf16, #tpu.memory_space<vmem>>, vector<384x128xbf16>
    %cst = arith.constant dense<0.000000e+00> : vector<400x128xf32>
    %6 = tpu.matmul %4, %5, %cst {dimension_numbers = #tpu.dot_dimension_numbers<[1], [0], [0], [1], [0, 0, 1, 1], [], []>} : vector<400x384xbf16>, vector<384x128xbf16>, vector<400x128xf32> -> vector<400x128xf32>
    %7 = arith.addf %3, %6 : vector<400x128xf32>
    %c0_6 = arith.constant 0 : index
    %c0_7 = arith.constant 0 : index
    %8 = vector.load %arg8[%c0_6, %c0_7] : memref<400x128xf32, #tpu.memory_space<vmem>>, vector<400x128xf32>
    tpu.vector_store %arg8[%c0_6, %c0_7], %7 {strides = array<i32>} : memref<400x128xf32, #tpu.memory_space<vmem>>, vector<400x128xf32>,
    %c0_i32_8 = arith.constant 0 : i32
    %9 = arith.cmpi eq, %arg2, %c0_i32_8 : i32
    %10 = arith.extui %9 : i1 to i32
    %c0_i32_9 = arith.constant 0 : i32
    %11 = arith.cmpi ne, %10, %c0_i32_9 : i32
    scf.if %11 {
      %c0_10 = arith.constant 0 : index
      %c0_11 = arith.constant 0 : index
      %12 = vector.load %arg8[%c0_10, %c0_11] : memref<400x128xf32, #tpu.memory_space<vmem>>, vector<400x128xf32>
      %c0_12 = arith.constant 0 : index
      %c0_13 = arith.constant 0 : index
      %13 = vector.load %arg5[%c0_12, %c0_13] : memref<1x128xf32, #tpu.memory_space<vmem>>, vector<1x128xf32>
      %14 = vector.broadcast %13 : vector<1x128xf32> to vector<400x128xf32>
      %15 = arith.mulf %12, %14 : vector<400x128xf32>
      %c0_14 = arith.constant 0 : index
      %c0_15 = arith.constant 0 : index
      %16 = vector.load %arg6[%c0_14, %c0_15] : memref<1x128xf32, #tpu.memory_space<vmem>>, vector<1x128xf32>
      %17 = vector.broadcast %16 : vector<1x128xf32> to vector<400x128xf32>
      %18 = arith.addf %15, %17 : vector<400x128xf32>
      %cst_16 = arith.constant 0.000000e+00 : f32
      %19 = vector.broadcast %cst_16 : f32 to vector<400x128xf32>
      %20 = arith.maximumf %18, %19 : vector<400x128xf32>
      %21 = arith.truncf %20 : vector<400x128xf32> to vector<400x128xbf16>
      %c0_17 = arith.constant 0 : index
      %c0_18 = arith.constant 0 : index
      %22 = vector.load %arg7[%c0_17, %c0_18] : memref<400x128xbf16, #tpu.memory_space<vmem>>, vector<400x128xbf16>
      tpu.vector_store %arg7[%c0_17, %c0_18], %21 {strides = array<i32>} : memref<400x128xbf16, #tpu.memory_space<vmem>>, vector<400x128xbf16>,
    } else {
    }
    return
  }
  func.func @transform_0(%arg0: i32, %arg1: i32, %arg2: i32) -> (i32, i32) {
    %c0_i32 = arith.constant 0 : i32
    return %arg0, %arg2 : i32, i32
  }
  func.func @transform_1(%arg0: i32, %arg1: i32, %arg2: i32) -> (i32, i32) {
    %c0_i32 = arith.constant 0 : i32
    return %arg2, %arg1 : i32, i32
  }
  func.func @transform_2(%arg0: i32, %arg1: i32, %arg2: i32) -> (i32, i32) {
    %c0_i32 = arith.constant 0 : i32
    %c0_i32_0 = arith.constant 0 : i32
    return %c0_i32, %arg1 : i32, i32
  }
  func.func @transform_3(%arg0: i32, %arg1: i32, %arg2: i32) -> (i32, i32) {
    %c0_i32 = arith.constant 0 : i32
    %c0_i32_0 = arith.constant 0 : i32
    return %c0_i32, %arg1 : i32, i32
  }
  func.func @transform_4(%arg0: i32, %arg1: i32, %arg2: i32) -> (i32, i32) {
    %c0_i32 = arith.constant 0 : i32
    return %arg0, %arg1 : i32, i32
  }
}

module attributes {stable_mosaic.version = 11 : i64} {
  func.func @_fused_matmul_kernel(%arg0: i32, %arg1: i32, %arg2: i32, %arg3: memref<112x640xbf16, #tpu.memory_space<vmem>>, %arg4: memref<640x128xbf16, #tpu.memory_space<vmem>>, %arg5: memref<1x128xf32, #tpu.memory_space<vmem>>, %arg6: memref<1x128xf32, #tpu.memory_space<vmem>>, %arg7: memref<112x128xbf16, #tpu.memory_space<vmem>>, %arg8: memref<112x128xf32, #tpu.memory_space<vmem>>) attributes {dimension_semantics = [#tpu.dimension_semantics<parallel>, #tpu.dimension_semantics<parallel>, #tpu.dimension_semantics<arbitrary>], iteration_bounds = array<i64: 1, 1, 1>, scalar_prefetch = 0 : i64, scratch_operands = 1 : i64, tpu.core_type = #tpu.core_type<tc>, window_params = [{transform_indices = @transform_0, window_bounds = array<i64: 112, 640>}, {transform_indices = @transform_1, window_bounds = array<i64: 640, 128>}, {transform_indices = @transform_2, window_bounds = array<i64: 1, 128>}, {transform_indices = @transform_3, window_bounds = array<i64: 1, 128>}, {transform_indices = @transform_4, window_bounds = array<i64: 112, 128>}]} {
    %c0_i32 = arith.constant 0 : i32
    %0 = arith.cmpi eq, %arg2, %c0_i32 : i32
    %1 = arith.extui %0 : i1 to i32
    %c0_i32_0 = arith.constant 0 : i32
    %2 = arith.cmpi ne, %1, %c0_i32_0 : i32
    scf.if %2 {
      %cst_10 = arith.constant 0.000000e+00 : f32
      %12 = vector.broadcast %cst_10 : f32 to vector<112x128xf32>
      %c0_11 = arith.constant 0 : index
      %c0_12 = arith.constant 0 : index
      %13 = vector.load %arg8[%c0_11, %c0_12] : memref<112x128xf32, #tpu.memory_space<vmem>>, vector<112x128xf32>
      tpu.vector_store %arg8[%c0_11, %c0_12], %12 {strides = array<i32>} : memref<112x128xf32, #tpu.memory_space<vmem>>, vector<112x128xf32>,
    } else {
    }
    %c0 = arith.constant 0 : index
    %c0_1 = arith.constant 0 : index
    %3 = vector.load %arg8[%c0, %c0_1] : memref<112x128xf32, #tpu.memory_space<vmem>>, vector<112x128xf32>
    %c0_2 = arith.constant 0 : index
    %c0_3 = arith.constant 0 : index
    %4 = vector.load %arg3[%c0_2, %c0_3] : memref<112x640xbf16, #tpu.memory_space<vmem>>, vector<112x640xbf16>
    %c0_4 = arith.constant 0 : index
    %c0_5 = arith.constant 0 : index
    %5 = vector.load %arg4[%c0_4, %c0_5] : memref<640x128xbf16, #tpu.memory_space<vmem>>, vector<640x128xbf16>
    %cst = arith.constant dense<0.000000e+00> : vector<112x128xf32>
    %6 = tpu.matmul %4, %5, %cst {dimension_numbers = #tpu.dot_dimension_numbers<[1], [0], [0], [1], [0, 0, 1, 1], [], []>} : vector<112x640xbf16>, vector<640x128xbf16>, vector<112x128xf32> -> vector<112x128xf32>
    %7 = arith.addf %3, %6 : vector<112x128xf32>
    %c0_6 = arith.constant 0 : index
    %c0_7 = arith.constant 0 : index
    %8 = vector.load %arg8[%c0_6, %c0_7] : memref<112x128xf32, #tpu.memory_space<vmem>>, vector<112x128xf32>
    tpu.vector_store %arg8[%c0_6, %c0_7], %7 {strides = array<i32>} : memref<112x128xf32, #tpu.memory_space<vmem>>, vector<112x128xf32>,
    %c0_i32_8 = arith.constant 0 : i32
    %9 = arith.cmpi eq, %arg2, %c0_i32_8 : i32
    %10 = arith.extui %9 : i1 to i32
    %c0_i32_9 = arith.constant 0 : i32
    %11 = arith.cmpi ne, %10, %c0_i32_9 : i32
    scf.if %11 {
      %c0_10 = arith.constant 0 : index
      %c0_11 = arith.constant 0 : index
      %12 = vector.load %arg8[%c0_10, %c0_11] : memref<112x128xf32, #tpu.memory_space<vmem>>, vector<112x128xf32>
      %c0_12 = arith.constant 0 : index
      %c0_13 = arith.constant 0 : index
      %13 = vector.load %arg5[%c0_12, %c0_13] : memref<1x128xf32, #tpu.memory_space<vmem>>, vector<1x128xf32>
      %14 = vector.broadcast %13 : vector<1x128xf32> to vector<112x128xf32>
      %15 = arith.mulf %12, %14 : vector<112x128xf32>
      %c0_14 = arith.constant 0 : index
      %c0_15 = arith.constant 0 : index
      %16 = vector.load %arg6[%c0_14, %c0_15] : memref<1x128xf32, #tpu.memory_space<vmem>>, vector<1x128xf32>
      %17 = vector.broadcast %16 : vector<1x128xf32> to vector<112x128xf32>
      %18 = arith.addf %15, %17 : vector<112x128xf32>
      %cst_16 = arith.constant 0.000000e+00 : f32
      %19 = vector.broadcast %cst_16 : f32 to vector<112x128xf32>
      %20 = arith.maximumf %18, %19 : vector<112x128xf32>
      %21 = arith.truncf %20 : vector<112x128xf32> to vector<112x128xbf16>
      %c0_17 = arith.constant 0 : index
      %c0_18 = arith.constant 0 : index
      %22 = vector.load %arg7[%c0_17, %c0_18] : memref<112x128xbf16, #tpu.memory_space<vmem>>, vector<112x128xbf16>
      tpu.vector_store %arg7[%c0_17, %c0_18], %21 {strides = array<i32>} : memref<112x128xbf16, #tpu.memory_space<vmem>>, vector<112x128xbf16>,
    } else {
    }
    return
  }
  func.func @transform_0(%arg0: i32, %arg1: i32, %arg2: i32) -> (i32, i32) {
    %c0_i32 = arith.constant 0 : i32
    return %arg0, %arg2 : i32, i32
  }
  func.func @transform_1(%arg0: i32, %arg1: i32, %arg2: i32) -> (i32, i32) {
    %c0_i32 = arith.constant 0 : i32
    return %arg2, %arg1 : i32, i32
  }
  func.func @transform_2(%arg0: i32, %arg1: i32, %arg2: i32) -> (i32, i32) {
    %c0_i32 = arith.constant 0 : i32
    %c0_i32_0 = arith.constant 0 : i32
    return %c0_i32, %arg1 : i32, i32
  }
  func.func @transform_3(%arg0: i32, %arg1: i32, %arg2: i32) -> (i32, i32) {
    %c0_i32 = arith.constant 0 : i32
    %c0_i32_0 = arith.constant 0 : i32
    return %c0_i32, %arg1 : i32, i32
  }
  func.func @transform_4(%arg0: i32, %arg1: i32, %arg2: i32) -> (i32, i32) {
    %c0_i32 = arith.constant 0 : i32
    return %arg0, %arg1 : i32, i32
  }
}

module attributes {stable_mosaic.version = 11 : i64} {
  func.func @_fc_stack_kernel(%arg0: i32, %arg1: memref<16x1152xbf16, #tpu.memory_space<vmem>>, %arg2: memref<1152x256xbf16, #tpu.memory_space<vmem>>, %arg3: memref<1x256xf32, #tpu.memory_space<vmem>>, %arg4: memref<256x128xbf16, #tpu.memory_space<vmem>>, %arg5: memref<1x128xf32, #tpu.memory_space<vmem>>, %arg6: memref<128x128xbf16, #tpu.memory_space<vmem>>, %arg7: memref<1x128xf32, #tpu.memory_space<vmem>>, %arg8: memref<16x128xf32, #tpu.memory_space<vmem>>) attributes {dimension_semantics = [#tpu.dimension_semantics<parallel>], iteration_bounds = array<i64: 1>, scalar_prefetch = 0 : i64, scratch_operands = 0 : i64, tpu.core_type = #tpu.core_type<tc>, window_params = [{transform_indices = @transform_0, window_bounds = array<i64: 16, 1152>}, {pipeline_mode = #tpu.pipeline_mode<synchronous>, transform_indices = @transform_1, window_bounds = array<i64: 1152, 256>}, {pipeline_mode = #tpu.pipeline_mode<synchronous>, transform_indices = @transform_2, window_bounds = array<i64: 1, 256>}, {pipeline_mode = #tpu.pipeline_mode<synchronous>, transform_indices = @transform_3, window_bounds = array<i64: 256, 128>}, {pipeline_mode = #tpu.pipeline_mode<synchronous>, transform_indices = @transform_4, window_bounds = array<i64: 1, 128>}, {pipeline_mode = #tpu.pipeline_mode<synchronous>, transform_indices = @transform_5, window_bounds = array<i64: 128, 128>}, {pipeline_mode = #tpu.pipeline_mode<synchronous>, transform_indices = @transform_6, window_bounds = array<i64: 1, 128>}, {transform_indices = @transform_7, window_bounds = array<i64: 16, 128>}]} {
    %c0 = arith.constant 0 : index
    %c0_0 = arith.constant 0 : index
    %0 = vector.load %arg1[%c0, %c0_0] : memref<16x1152xbf16, #tpu.memory_space<vmem>>, vector<16x1152xbf16>
    %c0_1 = arith.constant 0 : index
    %c0_2 = arith.constant 0 : index
    %1 = vector.load %arg2[%c0_1, %c0_2] : memref<1152x256xbf16, #tpu.memory_space<vmem>>, vector<1152x256xbf16>
    %cst = arith.constant dense<0.000000e+00> : vector<16x256xf32>
    %2 = tpu.matmul %0, %1, %cst {dimension_numbers = #tpu.dot_dimension_numbers<[1], [0], [0], [1], [0, 0, 1, 1], [], []>} : vector<16x1152xbf16>, vector<1152x256xbf16>, vector<16x256xf32> -> vector<16x256xf32>
    %c0_3 = arith.constant 0 : index
    %c0_4 = arith.constant 0 : index
    %3 = vector.load %arg3[%c0_3, %c0_4] : memref<1x256xf32, #tpu.memory_space<vmem>>, vector<1x256xf32>
    %4 = vector.broadcast %3 : vector<1x256xf32> to vector<16x256xf32>
    %5 = arith.addf %2, %4 : vector<16x256xf32>
    %cst_5 = arith.constant 0.000000e+00 : f32
    %6 = vector.broadcast %cst_5 : f32 to vector<16x256xf32>
    %7 = arith.maximumf %5, %6 : vector<16x256xf32>
    %8 = arith.truncf %7 : vector<16x256xf32> to vector<16x256xbf16>
    %c0_6 = arith.constant 0 : index
    %c0_7 = arith.constant 0 : index
    %9 = vector.load %arg4[%c0_6, %c0_7] : memref<256x128xbf16, #tpu.memory_space<vmem>>, vector<256x128xbf16>
    %cst_8 = arith.constant dense<0.000000e+00> : vector<16x128xf32>
    %10 = tpu.matmul %8, %9, %cst_8 {dimension_numbers = #tpu.dot_dimension_numbers<[1], [0], [0], [1], [0, 0, 1, 1], [], []>} : vector<16x256xbf16>, vector<256x128xbf16>, vector<16x128xf32> -> vector<16x128xf32>
    %c0_9 = arith.constant 0 : index
    %c0_10 = arith.constant 0 : index
    %11 = vector.load %arg5[%c0_9, %c0_10] : memref<1x128xf32, #tpu.memory_space<vmem>>, vector<1x128xf32>
    %12 = vector.broadcast %11 : vector<1x128xf32> to vector<16x128xf32>
    %13 = arith.addf %10, %12 : vector<16x128xf32>
    %cst_11 = arith.constant 0.000000e+00 : f32
    %14 = vector.broadcast %cst_11 : f32 to vector<16x128xf32>
    %15 = arith.maximumf %13, %14 : vector<16x128xf32>
    %16 = arith.truncf %15 : vector<16x128xf32> to vector<16x128xbf16>
    %c0_12 = arith.constant 0 : index
    %c0_13 = arith.constant 0 : index
    %17 = vector.load %arg6[%c0_12, %c0_13] : memref<128x128xbf16, #tpu.memory_space<vmem>>, vector<128x128xbf16>
    %cst_14 = arith.constant dense<0.000000e+00> : vector<16x128xf32>
    %18 = tpu.matmul %16, %17, %cst_14 {dimension_numbers = #tpu.dot_dimension_numbers<[1], [0], [0], [1], [0, 0, 1, 1], [], []>} : vector<16x128xbf16>, vector<128x128xbf16>, vector<16x128xf32> -> vector<16x128xf32>
    %c0_15 = arith.constant 0 : index
    %c0_16 = arith.constant 0 : index
    %19 = vector.load %arg7[%c0_15, %c0_16] : memref<1x128xf32, #tpu.memory_space<vmem>>, vector<1x128xf32>
    %20 = vector.broadcast %19 : vector<1x128xf32> to vector<16x128xf32>
    %21 = arith.addf %18, %20 : vector<16x128xf32>
    %c0_17 = arith.constant 0 : index
    %c0_18 = arith.constant 0 : index
    %22 = vector.load %arg8[%c0_17, %c0_18] : memref<16x128xf32, #tpu.memory_space<vmem>>, vector<16x128xf32>
    tpu.vector_store %arg8[%c0_17, %c0_18], %21 {strides = array<i32>} : memref<16x128xf32, #tpu.memory_space<vmem>>, vector<16x128xf32>,
    return
  }
  func.func @transform_0(%arg0: i32) -> (i32, i32) {
    %c0_i32 = arith.constant 0 : i32
    %c0_i32_0 = arith.constant 0 : i32
    return %arg0, %c0_i32 : i32, i32
  }
  func.func @transform_1(%arg0: i32) -> (i32, i32) {
    %c0_i32 = arith.constant 0 : i32
    %c0_i32_0 = arith.constant 0 : i32
    %c0_i32_1 = arith.constant 0 : i32
    return %c0_i32, %c0_i32_0 : i32, i32
  }
  func.func @transform_2(%arg0: i32) -> (i32, i32) {
    %c0_i32 = arith.constant 0 : i32
    %c0_i32_0 = arith.constant 0 : i32
    %c0_i32_1 = arith.constant 0 : i32
    return %c0_i32, %c0_i32_0 : i32, i32
  }
  func.func @transform_3(%arg0: i32) -> (i32, i32) {
    %c0_i32 = arith.constant 0 : i32
    %c0_i32_0 = arith.constant 0 : i32
    %c0_i32_1 = arith.constant 0 : i32
    return %c0_i32, %c0_i32_0 : i32, i32
  }
  func.func @transform_4(%arg0: i32) -> (i32, i32) {
    %c0_i32 = arith.constant 0 : i32
    %c0_i32_0 = arith.constant 0 : i32
    %c0_i32_1 = arith.constant 0 : i32
    return %c0_i32, %c0_i32_0 : i32, i32
  }
  func.func @transform_5(%arg0: i32) -> (i32, i32) {
    %c0_i32 = arith.constant 0 : i32
    %c0_i32_0 = arith.constant 0 : i32
    %c0_i32_1 = arith.constant 0 : i32
    return %c0_i32, %c0_i32_0 : i32, i32
  }
  func.func @transform_6(%arg0: i32) -> (i32, i32) {
    %c0_i32 = arith.constant 0 : i32
    %c0_i32_0 = arith.constant 0 : i32
    %c0_i32_1 = arith.constant 0 : i32
    return %c0_i32, %c0_i32_0 : i32, i32
  }
  func.func @transform_7(%arg0: i32) -> (i32, i32) {
    %c0_i32 = arith.constant 0 : i32
    %c0_i32_0 = arith.constant 0 : i32
    return %arg0, %c0_i32 : i32, i32
  }
}

</mosaic_0001>

<bundles_post_ra>
// kernel: enhanced_cnn_forward.4
= control target key start
LH: loop header
LB: loop body
LE: loop exit
PB: predicated region body
PF: predicated region fallthrough
CT: control target
= control target key end

     0   :  { %s2510_s15 = smov 0   ;;  %s2512_s16 = smov 0   ;;  %s2780_s0 = inlined_call_operand.vmem [shape: bf16[2048,128], index: 0, kind: input, shape index: {}]   ;;  %s2781_s1 = inlined_call_operand.vmem [shape: bf16[128,128], index: 1, kind: input, shape index: {}]   ;;  %s2782_s2 = inlined_call_operand.vmem [shape: f32[1,128], index: 2, kind: input, shape index: {}]   ;;  %s2783_s3 = inlined_call_operand.vmem [shape: f32[1,128], index: 3, kind: input, shape index: {}]   ;;  %s2784_s4 = inlined_call_operand.vmem [shape: bf16[2048,128], index: 4, kind: output, shape index: {}]  }
   0x1   :  { %s2514_s17 = smov 0  }
   0x2 LB: > { %s33_s18 = sadd.s32 1, %s2479_s16  ;;  %p1893_p0 = scmp.ge.s32.totalorder %s2483_s17, 1  ;;  %s2483_s17 = sphi %s2514_s17, %s14_s17   ;;  %s2479_s16 = sphi %s2512_s16, %s2786_s16   ;;  %s2475_s15 = sphi %s2510_s15, %s2785_s15  }
   0x3   : > { %p35_p1 = scmp.ge.s32.totalorder %s33_s18, 4  ;;  %p221_p2 = scmp.lt.s32.totalorder %s2483_s17, 5 }
   0x5   : > { %s2788_s18 = smov (%p35_p1, %s33_s18), 0  ;;  %p222_p3 = pnand %p1893_p0, %p221_p2 }
   0x6   : > { %v2421_v0 = vld [vmem:[%s2781_s1] sm:$0xff] (!%p222_p3)   ;;  %s1894_s21 = sshll.u32 (!%p222_p3), %s2475_s15, 6  ;;  %v2422_v1 = vld [vmem:[%s2781_s1 + $0x8] sm:$0xff] (!%p222_p3)   ;;  %v2423_v2 = vld [vmem:[%s2781_s1 + $0x10] sm:$0xff] (!%p222_p3)  }
   0x7   : > { %225 = sbr.rel (%p222_p3) target bundleno = 320 (0x140), region = 36  ;;  %p268_p4 = scmp.lt.s32.totalorder (!%p222_p3), %s1894_s21, 255  ;;  %2301 = vmatprep.subr.bf16.mxu0 (!%p222_p3), %v2421_v0  ;;  %2381 = vmatprep.subr.bf16.mxu1 (!%p222_p3), %v2421_v0  ;;  %v2424_v3 = vld [vmem:[%s2781_s1 + $0x18] sm:$0xff] (!%p222_p3)   ;;  %v2425_v6 = vld [vmem:[%s2781_s1 + $0x20] sm:$0xff] (!%p222_p3)   ;;  %v2426_v7 = vld [vmem:[%s2781_s1 + $0x28] sm:$0xff] (!%p222_p3)  }
   0x8   : > { %2302 = vmatpush3.bf16.msra.mxu0 (!%p222_p3), %v2421_v0  ;;  %2389 = vmatpush3.bf16.msra.mxu1 (!%p222_p3), %v2421_v0  ;;  %v2427_v8 = vld [vmem:[%s2781_s1 + $0x30] sm:$0xff] (!%p222_p3)   ;;  %v2428_v9 = vld [vmem:[%s2781_s1 + $0x38] sm:$0xff] (!%p222_p3)   ;;  %v2597_v40 = vld [vmem:[%s2782_s2] ss:$0 sm:$0xff] (!%p222_p3) }
   0x9   : > { %2303 = vmatprep.subr.bf16.mxu0 (!%p222_p3), %v2422_v1  ;;  %2382 = vmatprep.subr.bf16.mxu1 (!%p222_p3), %v2422_v1  ;;  %v2602_v42 = vld [vmem:[%s2783_s3] ss:$0 sm:$0xff] (!%p222_p3) }
   0xc   : > { %2304 = vmatpush3.bf16.msra.mxu0 (!%p222_p3), %v2422_v1  ;;  %2390 = vmatpush3.bf16.msra.mxu1 (!%p222_p3), %v2422_v1 }
   0xd   : > { %2305 = vmatprep.subr.bf16.mxu0 (!%p222_p3), %v2423_v2  ;;  %2383 = vmatprep.subr.bf16.mxu1 (!%p222_p3), %v2423_v2 }
   0xe   : > { %s2790_s21 = smov (!%p268_p4, %s1894_s21), 255 }
   0xf   : > { %s1895_s26 = sshll.u32 %s2790_s21, 2 }
  0x10   : > { %s2545_s29 = scalar_lea.vmem %s2780_s0, %s1895_s26  ;;  %2306 = vmatpush3.bf16.msra.mxu0 %v2423_v2  ;;  %2391 = vmatpush3.bf16.msra.mxu1 %v2423_v2  ;;  %s2625_s24 = scalar_lea.vmem %s2784_s4, %s1895_s26 }
  0x11   : > { %v2429_v4 = vld [vmem:[%s2545_s29] sm:$0xff]   ;;  %2307 = vmatprep.subr.bf16.mxu0 %v2424_v3  ;;  %2384 = vmatprep.subr.bf16.mxu1 %v2424_v3  ;;  %v2431_v10 = vld [vmem:[%s2545_s29 + $0x8] sm:$0xff]   ;;  %v2433_v12 = vld [vmem:[%s2545_s29 + $0x10] sm:$0xff]  }
  0x12   : > { %v2430_v5 = vld [vmem:[%s2545_s29 + $0x80] sm:$0xff]   ;;  %2317 = vmatprep.mubr.bf16.mxu0 %v2429_v4  ;;  %v2432_v11 = vld [vmem:[%s2545_s29 + $0x88] sm:$0xff]   ;;  %v2434_v13 = vld [vmem:[%s2545_s29 + $0x90] sm:$0xff]  }
  0x13   : > { %2349 = vmatprep.mubr.bf16.mxu1 %v2430_v5  ;;  %v2435_v14 = vld [vmem:[%s2545_s29 + $0x18] sm:$0xff]   ;;  %v2437_v16 = vld [vmem:[%s2545_s29 + $0x20] sm:$0xff]   ;;  %v2439_v18 = vld [vmem:[%s2545_s29 + $0x28] sm:$0xff]  }
  0x14   : > { %2308 = vmatpush3.bf16.msra.mxu0 %v2424_v3  ;;  %2392 = vmatpush3.bf16.msra.mxu1 %v2424_v3  ;;  %v2436_v15 = vld [vmem:[%s2545_s29 + $0x98] sm:$0xff]   ;;  %v2438_v17 = vld [vmem:[%s2545_s29 + $0xa0] sm:$0xff]   ;;  %v2440_v19 = vld [vmem:[%s2545_s29 + $0xa8] sm:$0xff]  }
  0x15   : > { %2309 = vmatprep.subr.bf16.mxu0 %v2425_v6  ;;  %2385 = vmatprep.subr.bf16.mxu1 %v2425_v6  ;;  %v2441_v20 = vld [vmem:[%s2545_s29 + $0x30] sm:$0xff]   ;;  %v2443_v22 = vld [vmem:[%s2545_s29 + $0x38] sm:$0xff]   ;;  %v2445_v24 = vld [vmem:[%s2545_s29 + $0x40] sm:$0xff]  }
  0x16   : > { %v2442_v21 = vld [vmem:[%s2545_s29 + $0xb0] sm:$0xff]   ;;  %v2444_v23 = vld [vmem:[%s2545_s29 + $0xb8] sm:$0xff]   ;;  %v2446_v25 = vld [vmem:[%s2545_s29 + $0xc0] sm:$0xff]  }
  0x17   : > { %v2447_v26 = vld [vmem:[%s2545_s29 + $0x48] sm:$0xff]   ;;  %v2449_v28 = vld [vmem:[%s2545_s29 + $0x50] sm:$0xff]   ;;  %v2451_v30 = vld [vmem:[%s2545_s29 + $0x58] sm:$0xff]  }
  0x18   : > { %2310 = vmatpush3.bf16.msra.mxu0 %v2425_v6  ;;  %2393 = vmatpush3.bf16.msra.mxu1 %v2425_v6  ;;  %v2448_v27 = vld [vmem:[%s2545_s29 + $0xc8] sm:$0xff]   ;;  %v2450_v29 = vld [vmem:[%s2545_s29 + $0xd0] sm:$0xff]   ;;  %v2452_v31 = vld [vmem:[%s2545_s29 + $0xd8] sm:$0xff]  }
  0x19   : > { %2311 = vmatprep.subr.bf16.mxu0 %v2426_v7  ;;  %2386 = vmatprep.subr.bf16.mxu1 %v2426_v7  ;;  %v2453_v32 = vld [vmem:[%s2545_s29 + $0x60] sm:$0xff]   ;;  %v2455_v34 = vld [vmem:[%s2545_s29 + $0x68] sm:$0xff]   ;;  %v2457_v36 = vld [vmem:[%s2545_s29 + $0x70] sm:$0xff]  }
  0x1a   : > { %v2454_v33 = vld [vmem:[%s2545_s29 + $0xe0] sm:$0xff]   ;;  %v2456_v35 = vld [vmem:[%s2545_s29 + $0xe8] sm:$0xff]   ;;  %v2458_v37 = vld [vmem:[%s2545_s29 + $0xf0] sm:$0xff]  }
  0x1b   : > { %v2459_v38 = vld [vmem:[%s2545_s29 + $0x78] sm:$0xff]  }
  0x1c   : > { %2312 = vmatpush3.bf16.msra.mxu0 %v2426_v7  ;;  %2394 = vmatpush3.bf16.msra.mxu1 %v2426_v7  ;;  %v2460_v39 = vld [vmem:[%s2545_s29 + $0xf8] sm:$0xff]  }
  0x1d   : > { %2313 = vmatprep.subr.bf16.mxu0 %v2427_v8  ;;  %2387 = vmatprep.subr.bf16.mxu1 %v2427_v8 }
  0x20   : > { %2314 = vmatpush3.bf16.msra.mxu0 %v2427_v8  ;;  %2395 = vmatpush3.bf16.msra.mxu1 %v2427_v8 }
  0x21   : > { %2315 = vmatprep.subr.bf16.mxu0 %v2428_v9  ;;  %2388 = vmatprep.subr.bf16.mxu1 %v2428_v9 }
  0x24   : > { %2316 = vmatpush3.bf16.msra.mxu0 %v2428_v9  ;;  %2396 = vmatpush3.bf16.msra.mxu1 %v2428_v9 }
  0x27   : > { %2318 = vmatmul.mubr.bf16.vlgmr.msra.gmra.mrb[0].mxu0 %v2431_v10  ;;  %2350 = vmatmul.mubr.bf16.vlgmr.msra.gmra.mrb[0].mxu1 %v2432_v11 }
  0x28   : > { %2321 = vmatprep.mubr.bf16.mxu0 %v2433_v12  ;;  %2353 = vmatprep.mubr.bf16.mxu1 %v2434_v13 }
  0x2f   : > { %2322 = vmatmul.mubr.bf16.gmra.mrb[4].mxu0 %v2435_v14  ;;  %2354 = vmatmul.mubr.bf16.gmra.mrb[4].mxu1 %v2436_v15 }
  0x30   : > { %2325 = vmatprep.mubr.bf16.mxu0 %v2437_v16  ;;  %2357 = vmatprep.mubr.bf16.mxu1 %v2438_v17 }
  0x37   : > { %2326 = vmatmul.mubr.bf16.gmra.mrb[8].mxu0 %v2439_v18  ;;  %2358 = vmatmul.mubr.bf16.gmra.mrb[8].mxu1 %v2440_v19 }
  0x38   : > { %2329 = vmatprep.mubr.bf16.mxu0 %v2441_v20  ;;  %2361 = vmatprep.mubr.bf16.mxu1 %v2442_v21 }
  0x3f   : > { %2330 = vmatmul.mubr.bf16.gmra.mrb[12].mxu0 %v2443_v22  ;;  %2362 = vmatmul.mubr.bf16.gmra.mrb[12].mxu1 %v2444_v23 }
  0x40   : > { %2333 = vmatprep.mubr.bf16.mxu0 %v2445_v24  ;;  %2365 = vmatprep.mubr.bf16.mxu1 %v2446_v25 }
  0x47   : > { %2334 = vmatmul.mubr.bf16.gmra.mrb[16].mxu0 %v2447_v26  ;;  %2366 = vmatmul.mubr.bf16.gmra.mrb[16].mxu1 %v2448_v27 }
  0x48   : > { %2337 = vmatprep.mubr.bf16.mxu0 %v2449_v28  ;;  %2369 = vmatprep.mubr.bf16.mxu1 %v2450_v29 }
  0x4f   : > { %2338 = vmatmul.mubr.bf16.gmra.mrb[20].mxu0 %v2451_v30  ;;  %2370 = vmatmul.mubr.bf16.gmra.mrb[20].mxu1 %v2452_v31 }
  0x50   : > { %2341 = vmatprep.mubr.bf16.mxu0 %v2453_v32  ;;  %2373 = vmatprep.mubr.bf16.mxu1 %v2454_v33 }
  0x57   : > { %2342 = vmatmul.mubr.bf16.gmra.mrb[24].mxu0 %v2455_v34  ;;  %2374 = vmatmul.mubr.bf16.gmra.mrb[24].mxu1 %v2456_v35 }
  0x58   : > { %2345 = vmatprep.mubr.bf16.mxu0 %v2457_v36  ;;  %2377 = vmatprep.mubr.bf16.mxu1 %v2458_v37 }
  0x5f   : > { %2346 = vmatmul.mubr.bf16.gmra.mrb[28].mxu0 %v2459_v38  ;;  %2378 = vmatmul.mubr.bf16.gmra.mrb[28].mxu1 %v2460_v39 }
  0xfa   : > { %v2319_v41 = vpop.f32.mrb[0].mxu0  ;;  %v2351_v43 = vpop.f32.mrb[0].mxu1 }
  0xfb   : > { %v1246_v44 = vmul.f32 %v2319_v41, %v2597_v40  ;;  %v1278_v45 = vmul.f32 %v2351_v43, %v2597_v40  ;;  %v787_v46 = vpop.f32.mrb[1].mxu0  ;;  %v915_v47 = vpop.f32.mrb[1].mxu1 }
  0xfc   : > { %v1244_v48 = vmul.f32 %v2597_v40, %v787_v46  ;;  %v1276_v49 = vmul.f32 %v2597_v40, %v915_v47  ;;  %v2320_v50 = vpop.f32.mrb[2].mxu0  ;;  %v2352_v51 = vpop.f32.mrb[2].mxu1 }
  0xfd   : > { %v1317_v52 = vadd.f32 %v2602_v42, %v1246_v44  ;;  %v1349_v53 = vadd.f32 %v2602_v42, %v1278_v45  ;;  %v1247_v54 = vmul.f32 %v2320_v50, %v2597_v40  ;;  %v1279_v55 = vmul.f32 %v2352_v51, %v2597_v40  ;;  %v790_v56 = vpop.f32.mrb[3].mxu0  ;;  %v918_v57 = vpop.f32.mrb[3].mxu1 }
  0xfe   : > { %v1315_v58 = vadd.f32 %v2602_v42, %v1244_v48  ;;  %v1347_v59 = vadd.f32 %v2602_v42, %v1276_v49  ;;  %v1245_v60 = vmul.f32 %v2597_v40, %v790_v56  ;;  %v1277_v61 = vmul.f32 %v2597_v40, %v918_v57 }
  0xff   : > { %v1318_v62 = vadd.f32 %v2602_v42, %v1247_v54  ;;  %v1350_v63 = vadd.f32 %v2602_v42, %v1279_v55  ;;  %v1381_v2 = vmax.f32 %v1317_v52, 0.0  ;;  %v1413_v3 = vmax.f32 %v1349_v53, 0.0 }
 0x100   : > { %v1316_v0 = vadd.f32 %v2602_v42, %v1245_v60  ;;  %v1348_v1 = vadd.f32 %v2602_v42, %v1277_v61  ;;  %v1379_v6 = vmax.f32 %v1315_v58, 0.0  ;;  %v1411_v7 = vmax.f32 %v1347_v59, 0.0 }
 0x101   : > { %v1382_v4 = vmax.f32 %v1318_v62, 0.0  ;;  %v1414_v5 = vmax.f32 %v1350_v63, 0.0 }
 0x102   : > { %v1380_v8 = vmax.f32 %v1316_v0, 0.0  ;;  %v1412_v9 = vmax.f32 %v1348_v1, 0.0  ;;  %v2323_v10 = vpop.f32.mrb[4].mxu0  ;;  %v2355_v11 = vpop.f32.mrb[4].mxu1 }
 0x103   : > { %v2078_v12 = vpack.c.bf16 %v1382_v4, %v1381_v2  ;;  %v2158_v13 = vpack.c.bf16 %v1414_v5, %v1413_v3  ;;  %v1250_v14 = vmul.f32 %v2323_v10, %v2597_v40  ;;  %v1282_v15 = vmul.f32 %v2355_v11, %v2597_v40  ;;  %v803_v16 = vpop.f32.mrb[5].mxu0  ;;  %v931_v17 = vpop.f32.mrb[5].mxu1 }
 0x104   : > { %v2073_v18 = vpack.c.bf16 %v1380_v8, %v1379_v6  ;;  %v2153_v19 = vpack.c.bf16 %v1412_v9, %v1411_v7  ;;  %v1248_v20 = vmul.f32 %v2597_v40, %v803_v16  ;;  %v1280_v21 = vmul.f32 %v2597_v40, %v931_v17  ;;  %v2324_v22 = vpop.f32.mrb[6].mxu0  ;;  %v2356_v23 = vpop.f32.mrb[6].mxu1 }
 0x105   : > { %2230 = vst [vmem:[%s2625_s24 + $0x8] sm:$0xff] %v2078_v12   ;;  %2246 = vst [vmem:[%s2625_s24 + $0x88] sm:$0xff] %v2158_v13   ;;  %v1321_v24 = vadd.f32 %v2602_v42, %v1250_v14  ;;  %v1353_v25 = vadd.f32 %v2602_v42, %v1282_v15  ;;  %v1251_v26 = vmul.f32 %v2324_v22, %v2597_v40  ;;  %v806_v28 = vpop.f32.mrb[7].mxu0  ;;  %v934_v29 = vpop.f32.mrb[7].mxu1 }
 0x106   : > { %v1283_v27 = vmul.f32 %v2356_v23, %v2597_v40  ;;  %2074 = vst [vmem:[%s2625_s24] sm:$0xff] %v2073_v18   ;;  %2245 = vst [vmem:[%s2625_s24 + $0x80] sm:$0xff] %v2153_v19   ;;  %v1319_v30 = vadd.f32 %v2602_v42, %v1248_v20  ;;  %v1351_v31 = vadd.f32 %v2602_v42, %v1280_v21 }
 0x107   : > { %v1249_v32 = vmul.f32 %v2597_v40, %v806_v28  ;;  %v1281_v33 = vmul.f32 %v2597_v40, %v934_v29  ;;  %v1322_v34 = vadd.f32 %v2602_v42, %v1251_v26  ;;  %v1385_v38 = vmax.f32 %v1321_v24, 0.0 }
 0x108   : > { %v1354_v35 = vadd.f32 %v2602_v42, %v1283_v27  ;;  %v1417_v39 = vmax.f32 %v1353_v25, 0.0  ;;  %v1383_v44 = vmax.f32 %v1319_v30, 0.0  ;;  %v1415_v45 = vmax.f32 %v1351_v31, 0.0 }
 0x109   : > { %v1320_v36 = vadd.f32 %v2602_v42, %v1249_v32  ;;  %v1352_v37 = vadd.f32 %v2602_v42, %v1281_v33  ;;  %v1386_v41 = vmax.f32 %v1322_v34, 0.0 }
 0x10a   : > { %v1418_v43 = vmax.f32 %v1354_v35, 0.0  ;;  %v2327_v48 = vpop.f32.mrb[8].mxu0  ;;  %v2359_v49 = vpop.f32.mrb[8].mxu1 }
 0x10b   : > { %v1384_v46 = vmax.f32 %v1320_v36, 0.0  ;;  %v1416_v47 = vmax.f32 %v1352_v37, 0.0  ;;  %v2088_v50 = vpack.c.bf16 %v1386_v41, %v1385_v38  ;;  %v1254_v52 = vmul.f32 %v2327_v48, %v2597_v40  ;;  %v819_v54 = vpop.f32.mrb[9].mxu0  ;;  %v947_v55 = vpop.f32.mrb[9].mxu1 }
 0x10c   : > { %v2168_v51 = vpack.c.bf16 %v1418_v43, %v1417_v39  ;;  %v1286_v53 = vmul.f32 %v2359_v49, %v2597_v40  ;;  %v1252_v58 = vmul.f32 %v2597_v40, %v819_v54  ;;  %v1284_v59 = vmul.f32 %v2597_v40, %v947_v55  ;;  %v2328_v60 = vpop.f32.mrb[10].mxu0  ;;  %v2360_v61 = vpop.f32.mrb[10].mxu1 }
 0x10d   : > { %v2083_v56 = vpack.c.bf16 %v1384_v46, %v1383_v44  ;;  %v2163_v57 = vpack.c.bf16 %v1416_v47, %v1415_v45  ;;  %2232 = vst [vmem:[%s2625_s24 + $0x18] sm:$0xff] %v2088_v50   ;;  %v1325_v62 = vadd.f32 %v2602_v42, %v1254_v52  ;;  %v1255_v0 = vmul.f32 %v2328_v60, %v2597_v40  ;;  %v822_v2 = vpop.f32.mrb[11].mxu0  ;;  %v950_v3 = vpop.f32.mrb[11].mxu1 }
 0x10e   : > { %2248 = vst [vmem:[%s2625_s24 + $0x98] sm:$0xff] %v2168_v51   ;;  %v1357_v63 = vadd.f32 %v2602_v42, %v1286_v53  ;;  %v1287_v1 = vmul.f32 %v2360_v61, %v2597_v40  ;;  %v1323_v4 = vadd.f32 %v2602_v42, %v1252_v58  ;;  %v1355_v5 = vadd.f32 %v2602_v42, %v1284_v59 }
 0x10f   : > { %2231 = vst [vmem:[%s2625_s24 + $0x10] sm:$0xff] %v2083_v56   ;;  %2247 = vst [vmem:[%s2625_s24 + $0x90] sm:$0xff] %v2163_v57   ;;  %v1253_v6 = vmul.f32 %v2597_v40, %v822_v2  ;;  %v1285_v7 = vmul.f32 %v2597_v40, %v950_v3  ;;  %v1326_v8 = vadd.f32 %v2602_v42, %v1255_v0  ;;  %v1389_v12 = vmax.f32 %v1325_v62, 0.0 }
 0x110   : > { %v1358_v9 = vadd.f32 %v2602_v42, %v1287_v1  ;;  %v1421_v13 = vmax.f32 %v1357_v63, 0.0  ;;  %v1387_v16 = vmax.f32 %v1323_v4, 0.0  ;;  %v1419_v17 = vmax.f32 %v1355_v5, 0.0 }
 0x111   : > { %v1324_v10 = vadd.f32 %v2602_v42, %v1253_v6  ;;  %v1356_v11 = vadd.f32 %v2602_v42, %v1285_v7  ;;  %v1390_v14 = vmax.f32 %v1326_v8, 0.0 }
 0x112   : > { %v1422_v15 = vmax.f32 %v1358_v9, 0.0  ;;  %v2331_v20 = vpop.f32.mrb[12].mxu0  ;;  %v2363_v21 = vpop.f32.mrb[12].mxu1 }
 0x113   : > { %v1388_v18 = vmax.f32 %v1324_v10, 0.0  ;;  %v1420_v19 = vmax.f32 %v1356_v11, 0.0  ;;  %v2098_v22 = vpack.c.bf16 %v1390_v14, %v1389_v12  ;;  %v1258_v24 = vmul.f32 %v2331_v20, %v2597_v40  ;;  %v835_v26 = vpop.f32.mrb[13].mxu0  ;;  %v963_v27 = vpop.f32.mrb[13].mxu1 }
 0x114   : > { %v2178_v23 = vpack.c.bf16 %v1422_v15, %v1421_v13  ;;  %v1290_v25 = vmul.f32 %v2363_v21, %v2597_v40  ;;  %v1256_v30 = vmul.f32 %v2597_v40, %v835_v26  ;;  %v1288_v31 = vmul.f32 %v2597_v40, %v963_v27  ;;  %v2332_v32 = vpop.f32.mrb[14].mxu0  ;;  %v2364_v33 = vpop.f32.mrb[14].mxu1 }
 0x115   : > { %v2093_v28 = vpack.c.bf16 %v1388_v18, %v1387_v16  ;;  %v2173_v29 = vpack.c.bf16 %v1420_v19, %v1419_v17  ;;  %2234 = vst [vmem:[%s2625_s24 + $0x28] sm:$0xff] %v2098_v22   ;;  %v1329_v34 = vadd.f32 %v2602_v42, %v1258_v24  ;;  %v1259_v36 = vmul.f32 %v2332_v32, %v2597_v40  ;;  %v838_v38 = vpop.f32.mrb[15].mxu0  ;;  %v966_v39 = vpop.f32.mrb[15].mxu1 }
 0x116   : > { %2250 = vst [vmem:[%s2625_s24 + $0xa8] sm:$0xff] %v2178_v23   ;;  %v1361_v35 = vadd.f32 %v2602_v42, %v1290_v25  ;;  %v1291_v37 = vmul.f32 %v2364_v33, %v2597_v40  ;;  %v1327_v41 = vadd.f32 %v2602_v42, %v1256_v30  ;;  %v1359_v43 = vadd.f32 %v2602_v42, %v1288_v31 }
 0x117   : > { %2233 = vst [vmem:[%s2625_s24 + $0x20] sm:$0xff] %v2093_v28   ;;  %2249 = vst [vmem:[%s2625_s24 + $0xa0] sm:$0xff] %v2173_v29   ;;  %v1257_v44 = vmul.f32 %v2597_v40, %v838_v38  ;;  %v1289_v45 = vmul.f32 %v2597_v40, %v966_v39  ;;  %v1330_v46 = vadd.f32 %v2602_v42, %v1259_v36  ;;  %v1393_v50 = vmax.f32 %v1329_v34, 0.0 }
 0x118   : > { %v1362_v47 = vadd.f32 %v2602_v42, %v1291_v37  ;;  %v1425_v51 = vmax.f32 %v1361_v35, 0.0  ;;  %v1391_v54 = vmax.f32 %v1327_v41, 0.0  ;;  %v1423_v55 = vmax.f32 %v1359_v43, 0.0 }
 0x119   : > { %v1328_v48 = vadd.f32 %v2602_v42, %v1257_v44  ;;  %v1360_v49 = vadd.f32 %v2602_v42, %v1289_v45  ;;  %v1394_v52 = vmax.f32 %v1330_v46, 0.0 }
 0x11a   : > { %v1426_v53 = vmax.f32 %v1362_v47, 0.0  ;;  %v2335_v58 = vpop.f32.mrb[16].mxu0  ;;  %v2367_v59 = vpop.f32.mrb[16].mxu1 }
 0x11b   : > { %v1392_v56 = vmax.f32 %v1328_v48, 0.0  ;;  %v1424_v57 = vmax.f32 %v1360_v49, 0.0  ;;  %v2108_v60 = vpack.c.bf16 %v1394_v52, %v1393_v50  ;;  %v1262_v62 = vmul.f32 %v2335_v58, %v2597_v40  ;;  %v851_v0 = vpop.f32.mrb[17].mxu0  ;;  %v979_v1 = vpop.f32.mrb[17].mxu1 }
 0x11c   : > { %v2188_v61 = vpack.c.bf16 %v1426_v53, %v1425_v51  ;;  %v1294_v63 = vmul.f32 %v2367_v59, %v2597_v40  ;;  %v1260_v4 = vmul.f32 %v2597_v40, %v851_v0  ;;  %v1292_v5 = vmul.f32 %v2597_v40, %v979_v1  ;;  %v2336_v6 = vpop.f32.mrb[18].mxu0  ;;  %v2368_v7 = vpop.f32.mrb[18].mxu1 }
 0x11d   : > { %v2103_v2 = vpack.c.bf16 %v1392_v56, %v1391_v54  ;;  %v2183_v3 = vpack.c.bf16 %v1424_v57, %v1423_v55  ;;  %2236 = vst [vmem:[%s2625_s24 + $0x38] sm:$0xff] %v2108_v60   ;;  %v1333_v8 = vadd.f32 %v2602_v42, %v1262_v62  ;;  %v1263_v10 = vmul.f32 %v2336_v6, %v2597_v40  ;;  %v854_v12 = vpop.f32.mrb[19].mxu0  ;;  %v982_v13 = vpop.f32.mrb[19].mxu1 }
 0x11e   : > { %2252 = vst [vmem:[%s2625_s24 + $0xb8] sm:$0xff] %v2188_v61   ;;  %v1365_v9 = vadd.f32 %v2602_v42, %v1294_v63  ;;  %v1295_v11 = vmul.f32 %v2368_v7, %v2597_v40  ;;  %v1331_v14 = vadd.f32 %v2602_v42, %v1260_v4  ;;  %v1363_v15 = vadd.f32 %v2602_v42, %v1292_v5 }
 0x11f   : > { %2235 = vst [vmem:[%s2625_s24 + $0x30] sm:$0xff] %v2103_v2   ;;  %2251 = vst [vmem:[%s2625_s24 + $0xb0] sm:$0xff] %v2183_v3   ;;  %v1261_v16 = vmul.f32 %v2597_v40, %v854_v12  ;;  %v1293_v17 = vmul.f32 %v2597_v40, %v982_v13  ;;  %v1334_v18 = vadd.f32 %v2602_v42, %v1263_v10  ;;  %v1397_v22 = vmax.f32 %v1333_v8, 0.0 }
 0x120   : > { %v1366_v19 = vadd.f32 %v2602_v42, %v1295_v11  ;;  %v1429_v23 = vmax.f32 %v1365_v9, 0.0  ;;  %v1395_v26 = vmax.f32 %v1331_v14, 0.0  ;;  %v1427_v27 = vmax.f32 %v1363_v15, 0.0 }
 0x121   : > { %v1332_v20 = vadd.f32 %v2602_v42, %v1261_v16  ;;  %v1364_v21 = vadd.f32 %v2602_v42, %v1293_v17  ;;  %v1398_v24 = vmax.f32 %v1334_v18, 0.0 }
 0x122   : > { %v1430_v25 = vmax.f32 %v1366_v19, 0.0  ;;  %v2339_v30 = vpop.f32.mrb[20].mxu0  ;;  %v2371_v31 = vpop.f32.mrb[20].mxu1 }
 0x123   : > { %v1396_v28 = vmax.f32 %v1332_v20, 0.0  ;;  %v1428_v29 = vmax.f32 %v1364_v21, 0.0  ;;  %v2118_v32 = vpack.c.bf16 %v1398_v24, %v1397_v22  ;;  %v1266_v34 = vmul.f32 %v2339_v30, %v2597_v40  ;;  %v867_v36 = vpop.f32.mrb[21].mxu0  ;;  %v995_v37 = vpop.f32.mrb[21].mxu1 }
 0x124   : > { %v2198_v33 = vpack.c.bf16 %v1430_v25, %v1429_v23  ;;  %v1298_v35 = vmul.f32 %v2371_v31, %v2597_v40  ;;  %v1264_v41 = vmul.f32 %v2597_v40, %v867_v36  ;;  %v1296_v43 = vmul.f32 %v2597_v40, %v995_v37  ;;  %v2340_v44 = vpop.f32.mrb[22].mxu0  ;;  %v2372_v45 = vpop.f32.mrb[22].mxu1 }
 0x125   : > { %v2113_v38 = vpack.c.bf16 %v1396_v28, %v1395_v26  ;;  %v2193_v39 = vpack.c.bf16 %v1428_v29, %v1427_v27  ;;  %2238 = vst [vmem:[%s2625_s24 + $0x48] sm:$0xff] %v2118_v32   ;;  %v1337_v46 = vadd.f32 %v2602_v42, %v1266_v34  ;;  %v1267_v48 = vmul.f32 %v2340_v44, %v2597_v40  ;;  %v870_v50 = vpop.f32.mrb[23].mxu0  ;;  %v998_v51 = vpop.f32.mrb[23].mxu1 }
 0x126   : > { %2254 = vst [vmem:[%s2625_s24 + $0xc8] sm:$0xff] %v2198_v33   ;;  %v1369_v47 = vadd.f32 %v2602_v42, %v1298_v35  ;;  %v1299_v49 = vmul.f32 %v2372_v45, %v2597_v40  ;;  %v1335_v52 = vadd.f32 %v2602_v42, %v1264_v41  ;;  %v1367_v53 = vadd.f32 %v2602_v42, %v1296_v43 }
 0x127   : > { %2237 = vst [vmem:[%s2625_s24 + $0x40] sm:$0xff] %v2113_v38   ;;  %2253 = vst [vmem:[%s2625_s24 + $0xc0] sm:$0xff] %v2193_v39   ;;  %v1265_v54 = vmul.f32 %v2597_v40, %v870_v50  ;;  %v1297_v55 = vmul.f32 %v2597_v40, %v998_v51  ;;  %v1338_v56 = vadd.f32 %v2602_v42, %v1267_v48  ;;  %v1401_v60 = vmax.f32 %v1337_v46, 0.0 }
 0x128   : > { %v1370_v57 = vadd.f32 %v2602_v42, %v1299_v49  ;;  %v1433_v61 = vmax.f32 %v1369_v47, 0.0  ;;  %v1399_v0 = vmax.f32 %v1335_v52, 0.0  ;;  %v1431_v1 = vmax.f32 %v1367_v53, 0.0 }
 0x129   : > { %v1336_v58 = vadd.f32 %v2602_v42, %v1265_v54  ;;  %v1368_v59 = vadd.f32 %v2602_v42, %v1297_v55  ;;  %v1402_v62 = vmax.f32 %v1338_v56, 0.0 }
 0x12a   : > { %v1434_v63 = vmax.f32 %v1370_v57, 0.0  ;;  %v2343_v4 = vpop.f32.mrb[24].mxu0  ;;  %v2375_v5 = vpop.f32.mrb[24].mxu1 }
 0x12b   : > { %v1400_v2 = vmax.f32 %v1336_v58, 0.0  ;;  %v1432_v3 = vmax.f32 %v1368_v59, 0.0  ;;  %v2128_v6 = vpack.c.bf16 %v1402_v62, %v1401_v60  ;;  %v1270_v8 = vmul.f32 %v2343_v4, %v2597_v40  ;;  %v883_v10 = vpop.f32.mrb[25].mxu0  ;;  %v1011_v11 = vpop.f32.mrb[25].mxu1 }
 0x12c   : > { %v2208_v7 = vpack.c.bf16 %v1434_v63, %v1433_v61  ;;  %v1302_v9 = vmul.f32 %v2375_v5, %v2597_v40  ;;  %v1268_v14 = vmul.f32 %v2597_v40, %v883_v10  ;;  %v1300_v15 = vmul.f32 %v2597_v40, %v1011_v11  ;;  %v2344_v16 = vpop.f32.mrb[26].mxu0  ;;  %v2376_v17 = vpop.f32.mrb[26].mxu1 }
 0x12d   : > { %v2123_v12 = vpack.c.bf16 %v1400_v2, %v1399_v0  ;;  %v2203_v13 = vpack.c.bf16 %v1432_v3, %v1431_v1  ;;  %2240 = vst [vmem:[%s2625_s24 + $0x58] sm:$0xff] %v2128_v6   ;;  %v1341_v18 = vadd.f32 %v2602_v42, %v1270_v8  ;;  %v1271_v20 = vmul.f32 %v2344_v16, %v2597_v40  ;;  %v886_v22 = vpop.f32.mrb[27].mxu0  ;;  %v1014_v23 = vpop.f32.mrb[27].mxu1 }
 0x12e   : > { %2256 = vst [vmem:[%s2625_s24 + $0xd8] sm:$0xff] %v2208_v7   ;;  %v1373_v19 = vadd.f32 %v2602_v42, %v1302_v9  ;;  %v1303_v21 = vmul.f32 %v2376_v17, %v2597_v40  ;;  %v1339_v24 = vadd.f32 %v2602_v42, %v1268_v14  ;;  %v1371_v25 = vadd.f32 %v2602_v42, %v1300_v15 }
 0x12f   : > { %2239 = vst [vmem:[%s2625_s24 + $0x50] sm:$0xff] %v2123_v12   ;;  %2255 = vst [vmem:[%s2625_s24 + $0xd0] sm:$0xff] %v2203_v13   ;;  %v1269_v26 = vmul.f32 %v2597_v40, %v886_v22  ;;  %v1301_v27 = vmul.f32 %v2597_v40, %v1014_v23  ;;  %v1342_v28 = vadd.f32 %v2602_v42, %v1271_v20  ;;  %v1405_v32 = vmax.f32 %v1341_v18, 0.0 }
 0x130   : > { %v1374_v29 = vadd.f32 %v2602_v42, %v1303_v21  ;;  %v1437_v33 = vmax.f32 %v1373_v19, 0.0  ;;  %v1403_v36 = vmax.f32 %v1339_v24, 0.0  ;;  %v1435_v37 = vmax.f32 %v1371_v25, 0.0 }
 0x131   : > { %v1340_v30 = vadd.f32 %v2602_v42, %v1269_v26  ;;  %v1372_v31 = vadd.f32 %v2602_v42, %v1301_v27  ;;  %v1406_v34 = vmax.f32 %v1342_v28, 0.0 }
 0x132   : > { %v1438_v35 = vmax.f32 %v1374_v29, 0.0  ;;  %v2347_v41 = vpop.f32.mrb[28].mxu0  ;;  %v2379_v43 = vpop.f32.mrb[28].mxu1 }
 0x133   : > { %v1404_v38 = vmax.f32 %v1340_v30, 0.0  ;;  %v1436_v39 = vmax.f32 %v1372_v31, 0.0  ;;  %v2138_v44 = vpack.c.bf16 %v1406_v34, %v1405_v32  ;;  %v1274_v46 = vmul.f32 %v2347_v41, %v2597_v40  ;;  %v899_v48 = vpop.f32.mrb[29].mxu0  ;;  %v1027_v49 = vpop.f32.mrb[29].mxu1 }
 0x134   : > { %v2218_v45 = vpack.c.bf16 %v1438_v35, %v1437_v33  ;;  %v1306_v47 = vmul.f32 %v2379_v43, %v2597_v40  ;;  %v1272_v52 = vmul.f32 %v2597_v40, %v899_v48  ;;  %v1304_v53 = vmul.f32 %v2597_v40, %v1027_v49  ;;  %v2348_v54 = vpop.f32.mrb[30].mxu0  ;;  %v2380_v55 = vpop.f32.mrb[30].mxu1 }
 0x135   : > { %v2133_v50 = vpack.c.bf16 %v1404_v38, %v1403_v36  ;;  %v2213_v51 = vpack.c.bf16 %v1436_v39, %v1435_v37  ;;  %2242 = vst [vmem:[%s2625_s24 + $0x68] sm:$0xff] %v2138_v44   ;;  %v1345_v56 = vadd.f32 %v2602_v42, %v1274_v46  ;;  %v1275_v58 = vmul.f32 %v2348_v54, %v2597_v40  ;;  %v902_v60 = vpop.f32.mrb[31].mxu0  ;;  %v1030_v61 = vpop.f32.mrb[31].mxu1 }
 0x136   : > { %2258 = vst [vmem:[%s2625_s24 + $0xe8] sm:$0xff] %v2218_v45   ;;  %v1377_v57 = vadd.f32 %v2602_v42, %v1306_v47  ;;  %v1307_v59 = vmul.f32 %v2380_v55, %v2597_v40  ;;  %v1343_v62 = vadd.f32 %v2602_v42, %v1272_v52  ;;  %v1375_v63 = vadd.f32 %v2602_v42, %v1304_v53 }
 0x137   : > { %2241 = vst [vmem:[%s2625_s24 + $0x60] sm:$0xff] %v2133_v50   ;;  %2257 = vst [vmem:[%s2625_s24 + $0xe0] sm:$0xff] %v2213_v51   ;;  %v1273_v0 = vmul.f32 %v2597_v40, %v902_v60  ;;  %v1305_v1 = vmul.f32 %v2597_v40, %v1030_v61  ;;  %v1346_v2 = vadd.f32 %v2602_v42, %v1275_v58  ;;  %v1409_v6 = vmax.f32 %v1345_v56, 0.0 }
 0x138   : > { %v1378_v3 = vadd.f32 %v2602_v42, %v1307_v59  ;;  %v1441_v7 = vmax.f32 %v1377_v57, 0.0  ;;  %v1407_v10 = vmax.f32 %v1343_v62, 0.0  ;;  %v1439_v11 = vmax.f32 %v1375_v63, 0.0 }
 0x139   : > { %v1344_v4 = vadd.f32 %v2602_v42, %v1273_v0  ;;  %v1376_v5 = vadd.f32 %v2602_v42, %v1305_v1  ;;  %v1410_v8 = vmax.f32 %v1346_v2, 0.0 }
 0x13a   : > { %v1442_v9 = vmax.f32 %v1378_v3, 0.0 }
 0x13b   : > { %v1408_v12 = vmax.f32 %v1344_v4, 0.0  ;;  %v1440_v40 = vmax.f32 %v1376_v5, 0.0  ;;  %v2148_v13 = vpack.c.bf16 %v1410_v8, %v1409_v6 }
 0x13c   : > { %v2228_v14 = vpack.c.bf16 %v1442_v9, %v1441_v7 }
 0x13d   : > { %v2143_v15 = vpack.c.bf16 %v1408_v12, %v1407_v10  ;;  %v2223_v16 = vpack.c.bf16 %v1440_v40, %v1439_v11  ;;  %2244 = vst [vmem:[%s2625_s24 + $0x78] sm:$0xff] %v2148_v13  }
 0x13e   : > { %2260 = vst [vmem:[%s2625_s24 + $0xf8] sm:$0xff] %v2228_v14  }
 0x13f   : > { %2243 = vst [vmem:[%s2625_s24 + $0x70] sm:$0xff] %v2143_v15   ;;  %2259 = vst [vmem:[%s2625_s24 + $0xf0] sm:$0xff] %v2223_v16  }
 0x140 PF: > { %s14_s17 = sadd.s32 1, %s2483_s17   ;;  %s2785_s15 = smov %s2479_s16 }
 0x141   : > { %p11_p5 = scmp.ge.s32.totalorder %s14_s17, 6   ;;  %s2786_s16 = smov %s2788_s18 }
 0x143   :  { %13 = sbr.rel (!%p11_p5) target bundleno = 2 (0x2), region = 83 }

// kernel: enhanced_cnn_forward.5
= control target key start
LH: loop header
LB: loop body
LE: loop exit
PB: predicated region body
PF: predicated region fallthrough
CT: control target
= control target key end

     0   :  { %v2527_v0 = vmov 0   ;;  %v2528_v2 = vmov 0.0   ;;  %vm2529_vm0 = vmmov 0   ;;  %s3111_s1 = inlined_call_operand.vmem [shape: bf16[384,128], index: 1, kind: input, shape index: {}]   ;;  %s3112_s0 = inlined_call_operand.vmem [shape: bf16[400,384], index: 0, kind: input, shape index: {}]   ;;  %s3113_s2 = inlined_call_operand.vmem [shape: f32[1,128], index: 2, kind: input, shape index: {}]   ;;  %s3114_s3 = inlined_call_operand.vmem [shape: f32[1,128], index: 3, kind: input, shape index: {}]   ;;  %s3115_s4 = inlined_call_operand.vmem [shape: bf16[400,128], index: 4, kind: output, shape index: {}]  }
   0x1   :  { %814 = vmatprep.subr.bf16.mxu1 %v2527_v0  ;;  %v2403_v1 = vld [vmem:[%s3111_s1] sm:$0xff]   ;;  %2234 = vmatprep.subr.bf16.mxu0 %v2528_v2  ;;  %v2404_v3 = vld [vmem:[%s3111_s1 + $0x8] sm:$0xff]   ;;  %v2405_v4 = vld [vmem:[%s3111_s1 + $0x10] sm:$0xff]  }
   0x2   :  { %2250 = vmatprep.mubr.msk.bf16.mxu0 %vm2529_vm0, %v2528_v2  ;;  %815 = vmatpush1.bf16.msra.mxu1 %v2403_v1  ;;  %v2411_v5 = vld [vmem:[%s3111_s1 + $0x80] sm:$0xff]   ;;  %v2406_v6 = vld [vmem:[%s3111_s1 + $0x18] sm:$0xff]   ;;  %v2413_v7 = vld [vmem:[%s3111_s1 + $0x88] sm:$0xff]  }
   0x3   :  { %816 = vmatprep.subr.bf16.mxu1 %v2527_v0  ;;  %2235 = vmatpush3.bf16.msra.mxu0 %v2411_v5  ;;  %v2407_v8 = vld [vmem:[%s3111_s1 + $0x20] sm:$0xff]   ;;  %v2415_v9 = vld [vmem:[%s3111_s1 + $0x90] sm:$0xff]   ;;  %v2408_v10 = vld [vmem:[%s3111_s1 + $0x28] sm:$0xff]  }
   0x4   :  { %2236 = vmatprep.subr.bf16.mxu0 %v2528_v2  ;;  %v2417_v11 = vld [vmem:[%s3111_s1 + $0x98] sm:$0xff]   ;;  %v2409_v12 = vld [vmem:[%s3111_s1 + $0x30] sm:$0xff]   ;;  %v2419_v13 = vld [vmem:[%s3111_s1 + $0xa0] sm:$0xff]  }
   0x5   :  { %v2410_v14 = vld [vmem:[%s3111_s1 + $0x38] sm:$0xff]   ;;  %v2421_v15 = vld [vmem:[%s3111_s1 + $0xa8] sm:$0xff]   ;;  %v2430_v16 = vld [vmem:[%s3112_s0 + $0x4] ss:$12 sps:$4 sm:$0xff]  }
   0x6   :  { %817 = vmatpush1.bf16.msra.mxu1 %v2404_v3  ;;  %846 = vmatprep.mubr.bf16.mxu1 %v2430_v16  ;;  %v2412_v17 = vld [vmem:[%s3111_s1 + $0x40] sm:$0xff]   ;;  %v2423_v18 = vld [vmem:[%s3111_s1 + $0xb0] sm:$0xff]   ;;  %v2414_v19 = vld [vmem:[%s3111_s1 + $0x48] sm:$0xff]  }
   0x7   :  { %818 = vmatprep.subr.bf16.mxu1 %v2527_v0  ;;  %2237 = vmatpush3.bf16.msra.mxu0 %v2413_v7  ;;  %v2425_v20 = vld [vmem:[%s3111_s1 + $0xb8] sm:$0xff]   ;;  %v2427_v21 = vld [vmem:[%s3112_s0 + $0x8] ss:$12 sps:$4 sm:$0xff]   ;;  %v2431_v24 = vld [vmem:[%s3112_s0 + $0x20] ss:$12 sps:$4 sm:$0xff]  }
   0x8   :  { %2238 = vmatprep.subr.bf16.mxu0 %v2528_v2  ;;  %v2416_v22 = vld [vmem:[%s3111_s1 + $0x50] sm:$0xff]   ;;  %v2418_v23 = vld [vmem:[%s3111_s1 + $0x58] sm:$0xff]   ;;  %v2420_v25 = vld [vmem:[%s3111_s1 + $0x60] sm:$0xff]  }
   0x9   :  { %v2422_v26 = vld [vmem:[%s3111_s1 + $0x68] sm:$0xff]   ;;  %v2435_v27 = vld [vmem:[%s3112_s0 + $0x38] ss:$12 sps:$4 sm:$0xff]   ;;  %v2424_v28 = vld [vmem:[%s3111_s1 + $0x70] sm:$0xff]  }
   0xa   :  { %819 = vmatpush1.bf16.msra.mxu1 %v2405_v4  ;;  %v2426_v29 = vld [vmem:[%s3111_s1 + $0x78] sm:$0xff]   ;;  %v2428_v30 = vld [vmem:[%s3112_s0] ss:$12 sps:$4 sm:$0xff]   ;;  %v2443_v34 = vld [vmem:[%s3112_s0 + $0x68] ss:$12 sps:$4 sm:$0xff]  }
   0xb   :  { %820 = vmatprep.subr.bf16.mxu1 %v2527_v0  ;;  %2239 = vmatpush3.bf16.msra.mxu0 %v2415_v9  ;;  %v2439_v31 = vld [vmem:[%s3112_s0 + $0x50] ss:$12 sps:$4 sm:$0xff]   ;;  %v2434_v33 = vld [vmem:[%s3112_s0 + $0x18] ss:$12 sps:$4 sm:$0xff]   ;;  %v2436_v35 = vld [vmem:[%s3112_s0 + $0x34] ss:$12 sps:$4 sm:$0xff]  }
   0xc   :  { %2240 = vmatprep.subr.bf16.mxu0 %v2528_v2  ;;  %v2432_v32 = vld [vmem:[%s3112_s0 + $0x1c] ss:$12 sps:$4 sm:$0xff]   ;;  %v2447_v37 = vld [vmem:[%s3112_s0 + $0x80] ss:$12 sps:$4 sm:$0xff]   ;;  %v2451_v40 = vld [vmem:[%s3112_s0 + $0x98] ss:$12 sps:$4 sm:$0xff]  }
   0xd   :  { %v2438_v36 = vld [vmem:[%s3112_s0 + $0x30] ss:$12 sps:$4 sm:$0xff]   ;;  %v2440_v38 = vld [vmem:[%s3112_s0 + $0x4c] ss:$12 sps:$4 sm:$0xff]   ;;  %v2442_v39 = vld [vmem:[%s3112_s0 + $0x48] ss:$12 sps:$4 sm:$0xff]  }
   0xe   :  { %821 = vmatpush1.bf16.msra.mxu1 %v2406_v6  ;;  %v2444_v41 = vld [vmem:[%s3112_s0 + $0x64] ss:$12 sps:$4 sm:$0xff]   ;;  %v2446_v42 = vld [vmem:[%s3112_s0 + $0x60] ss:$12 sps:$4 sm:$0xff]   ;;  %v2448_v44 = vld [vmem:[%s3112_s0 + $0x7c] ss:$12 sps:$4 sm:$0xff]  }
   0xf   :  { %822 = vmatprep.subr.bf16.mxu1 %v2527_v0  ;;  %2241 = vmatpush3.bf16.msra.mxu0 %v2417_v11  ;;  %v2455_v43 = vld [vmem:[%s3112_s0 + $0xb0] ss:$12 sps:$4 sm:$0xff]   ;;  %v2450_v45 = vld [vmem:[%s3112_s0 + $0x78] ss:$12 sps:$4 sm:$0xff]   ;;  %v2459_v46 = vld [vmem:[%s3112_s0 + $0xc8] ss:$12 sps:$4 sm:$0xff]  }
  0x10   :  { %2242 = vmatprep.subr.bf16.mxu0 %v2528_v2  ;;  %v2452_v47 = vld [vmem:[%s3112_s0 + $0x94] ss:$12 sps:$4 sm:$0xff]   ;;  %v2454_v48 = vld [vmem:[%s3112_s0 + $0x90] ss:$12 sps:$4 sm:$0xff]   ;;  %v2456_v50 = vld [vmem:[%s3112_s0 + $0xac] ss:$12 sps:$4 sm:$0xff]  }
  0x11   :  { %v2463_v49 = vld [vmem:[%s3112_s0 + $0xe0] ss:$12 sps:$4 sm:$0xff]   ;;  %v2458_v51 = vld [vmem:[%s3112_s0 + $0xa8] ss:$12 sps:$4 sm:$0xff]   ;;  %v2467_v52 = vld [vmem:[%s3112_s0 + $0xf8] ss:$12 sps:$4 sm:$0xff]  }
  0x12   :  { %823 = vmatpush1.bf16.msra.mxu1 %v2407_v8  ;;  %v2460_v53 = vld [vmem:[%s3112_s0 + $0xc4] ss:$12 sps:$4 sm:$0xff]   ;;  %v2462_v54 = vld [vmem:[%s3112_s0 + $0xc0] ss:$12 sps:$4 sm:$0xff]   ;;  %v2464_v56 = vld [vmem:[%s3112_s0 + $0xdc] ss:$12 sps:$4 sm:$0xff]  }
  0x13   :  { %824 = vmatprep.subr.bf16.mxu1 %v2527_v0  ;;  %2243 = vmatpush3.bf16.msra.mxu0 %v2419_v13  ;;  %v2471_v55 = vld [vmem:[%s3112_s0 + $0x110] ss:$12 sps:$4 sm:$0xff]   ;;  %v2466_v57 = vld [vmem:[%s3112_s0 + $0xd8] ss:$12 sps:$4 sm:$0xff]   ;;  %v2475_v58 = vld [vmem:[%s3112_s0 + $0x128] ss:$12 sps:$4 sm:$0xff]  }
  0x14   :  { %2244 = vmatprep.subr.bf16.mxu0 %v2528_v2  ;;  %v2468_v59 = vld [vmem:[%s3112_s0 + $0xf4] ss:$12 sps:$4 sm:$0xff]   ;;  %v2470_v60 = vld [vmem:[%s3112_s0 + $0xf0] ss:$12 sps:$4 sm:$0xff]   ;;  %v2472_v62 = vld [vmem:[%s3112_s0 + $0x10c] ss:$12 sps:$4 sm:$0xff]  }
  0x15   :  { %v2479_v61 = vld [vmem:[%s3112_s0 + $0x140] ss:$12 sps:$4 sm:$0xff]   ;;  %v2474_v63 = vld [vmem:[%s3112_s0 + $0x108] ss:$12 sps:$4 sm:$0xff]   ;;  %v2476_v1 = vld [vmem:[%s3112_s0 + $0x124] ss:$12 sps:$4 sm:$0xff]  }
  0x16   :  { %825 = vmatpush1.bf16.msra.mxu1 %v2408_v10  ;;  %v2478_v3 = vld [vmem:[%s3112_s0 + $0x120] ss:$12 sps:$4 sm:$0xff]   ;;  %v2487_v4 = vld [vmem:[%s3112_s0 + $0x170] ss:$12 sps:$4 sm:$0xff]   ;;  %v2482_v6 = vld [vmem:[%s3112_s0 + $0x138] ss:$12 sps:$4 sm:$0xff]  }
  0x17   :  { %826 = vmatprep.subr.bf16.mxu1 %v2527_v0  ;;  %2245 = vmatpush3.bf16.msra.mxu0 %v2421_v15  ;;  %v2480_v5 = vld [vmem:[%s3112_s0 + $0x13c] ss:$12 sps:$4 sm:$0xff]   ;;  %v2484_v8 = vld [vmem:[%s3112_s0 + $0x154] ss:$12 sps:$4 sm:$0xff]   ;;  %v2488_v11 = vld [vmem:[%s3112_s0 + $0x16c] ss:$12 sps:$4 sm:$0xff]  }
  0x18   :  { %2246 = vmatprep.subr.bf16.mxu0 %v2528_v2  ;;  %v2491_v7 = vld [vmem:[%s3112_s0 + $0x188] ss:$12 sps:$4 sm:$0xff]   ;;  %v2486_v9 = vld [vmem:[%s3112_s0 + $0x150] ss:$12 sps:$4 sm:$0xff]   ;;  %v2495_v10 = vld [vmem:[%s3112_s0 + $0x1a0] ss:$12 sps:$4 sm:$0xff]  }
  0x19   :  { %v2499_v13 = vld [vmem:[%s3112_s0 + $0x1b8] ss:$12 sps:$4 sm:$0xff]   ;;  %v2494_v15 = vld [vmem:[%s3112_s0 + $0x180] ss:$12 sps:$4 sm:$0xff]   ;;  %v2503_v16 = vld [vmem:[%s3112_s0 + $0x1d0] ss:$12 sps:$4 sm:$0xff]  }
  0x1a   :  { %827 = vmatpush1.bf16.msra.mxu1 %v2409_v12  ;;  %v2490_v12 = vld [vmem:[%s3112_s0 + $0x168] ss:$12 sps:$4 sm:$0xff]  }
  0x1b   :  { %828 = vmatprep.subr.bf16.mxu1 %v2527_v0  ;;  %2247 = vmatpush3.bf16.msra.mxu0 %v2423_v18  ;;  %v2498_v18 = vld [vmem:[%s3112_s0 + $0x198] ss:$12 sps:$4 sm:$0xff]  }
  0x1c   :  { %2248 = vmatprep.subr.bf16.mxu0 %v2528_v2 }
  0x1e   :  { %829 = vmatpush1.bf16.msra.mxu1 %v2410_v14  ;;  %v2492_v14 = vld [vmem:[%s3112_s0 + $0x184] ss:$12 sps:$4 sm:$0xff]  }
  0x1f   :  { %830 = vmatprep.subr.bf16.mxu1 %v2527_v0  ;;  %2249 = vmatpush3.bf16.msra.mxu0 %v2425_v20  ;;  %v2500_v20 = vld [vmem:[%s3112_s0 + $0x1b4] ss:$12 sps:$4 sm:$0xff]  }
  0x22   :  { %831 = vmatpush1.bf16.msra.mxu1 %v2412_v17  ;;  %2251 = vmatmul.mubr.bf16.vlgmr.msra.gmra.mrb[0].mxu0 %v2427_v21  ;;  %v2496_v17 = vld [vmem:[%s3112_s0 + $0x19c] ss:$12 sps:$4 sm:$0xff]  }
  0x23   :  { %832 = vmatprep.subr.bf16.mxu1 %v2527_v0  ;;  %2254 = vmatprep.mubr.msk.bf16.mxu0 %vm2529_vm0, %v2528_v2  ;;  %v2502_v21 = vld [vmem:[%s3112_s0 + $0x1b0] ss:$12 sps:$4 sm:$0xff]  }
  0x26   :  { %833 = vmatpush1.bf16.msra.mxu1 %v2414_v19  ;;  %v2507_v19 = vld [vmem:[%s3112_s0 + $0x1e8] ss:$12 sps:$4 sm:$0xff]  }
  0x27   :  { %834 = vmatprep.subr.bf16.mxu1 %v2527_v0 }
  0x2a   :  { %835 = vmatpush1.bf16.msra.mxu1 %v2416_v22  ;;  %2255 = vmatmul.mubr.bf16.gmra.mrb[4].mxu0 %v2431_v24  ;;  %v2511_v22 = vld [vmem:[%s3112_s0 + $0x200] ss:$12 sps:$4 sm:$0xff]   ;;  %v2506_v24 = vld [vmem:[%s3112_s0 + $0x1c8] ss:$12 sps:$4 sm:$0xff]  }
  0x2b   :  { %836 = vmatprep.subr.bf16.mxu1 %v2527_v0  ;;  %2258 = vmatprep.mubr.msk.bf16.mxu0 %vm2529_vm0, %v2528_v2 }
  0x2e   :  { %837 = vmatpush1.bf16.msra.mxu1 %v2418_v23  ;;  %v2504_v23 = vld [vmem:[%s3112_s0 + $0x1cc] ss:$12 sps:$4 sm:$0xff]  }
  0x2f   :  { %838 = vmatprep.subr.bf16.mxu1 %v2527_v0 }
  0x32   :  { %839 = vmatpush1.bf16.msra.mxu1 %v2420_v25  ;;  %2259 = vmatmul.mubr.bf16.gmra.mrb[8].mxu0 %v2435_v27  ;;  %v2515_v25 = vld [vmem:[%s3112_s0 + $0x218] ss:$12 sps:$4 sm:$0xff]   ;;  %v2510_v27 = vld [vmem:[%s3112_s0 + $0x1e0] ss:$12 sps:$4 sm:$0xff]  }
  0x33   :  { %840 = vmatprep.subr.bf16.mxu1 %v2527_v0  ;;  %2262 = vmatprep.mubr.msk.bf16.mxu0 %vm2529_vm0, %v2528_v2 }
  0x36   :  { %841 = vmatpush1.bf16.msra.mxu1 %v2422_v26  ;;  %v2508_v26 = vld [vmem:[%s3112_s0 + $0x1e4] ss:$12 sps:$4 sm:$0xff]  }
  0x37   :  { %842 = vmatprep.subr.bf16.mxu1 %v2527_v0 }
  0x3a   :  { %843 = vmatpush1.bf16.msra.mxu1 %v2424_v28  ;;  %2263 = vmatmul.mubr.bf16.gmra.mrb[12].mxu0 %v2439_v31  ;;  %v2519_v28 = vld [vmem:[%s3112_s0 + $0x230] ss:$12 sps:$4 sm:$0xff]   ;;  %v2523_v31 = vld [vmem:[%s3112_s0 + $0x248] ss:$12 sps:$4 sm:$0xff]  }
  0x3b   :  { %844 = vmatprep.subr.bf16.mxu1 %v2527_v0  ;;  %2266 = vmatprep.mubr.msk.bf16.mxu0 %vm2529_vm0, %v2528_v2  ;;  %v2483_v0 = vld [vmem:[%s3112_s0 + $0x158] ss:$12 sps:$4 sm:$0xff]  }
  0x3e   :  { %845 = vmatpush1.bf16.msra.mxu1 %v2426_v29  ;;  %v2512_v29 = vld [vmem:[%s3112_s0 + $0x1fc] ss:$12 sps:$4 sm:$0xff]  }
  0x41   :  { %847 = vmatmul.mubr.bf16.vlgmr.msra.gmra.mrb[0].mxu1 %v2428_v30  ;;  %v2514_v30 = vld [vmem:[%s3112_s0 + $0x1f8] ss:$12 sps:$4 sm:$0xff]  }
  0x42   :  { %854 = vmatprep.mubr.bf16.mxu1 %v2432_v32  ;;  %2267 = vmatmul.mubr.bf16.gmra.mrb[16].mxu0 %v2443_v34  ;;  %v2516_v32 = vld [vmem:[%s3112_s0 + $0x214] ss:$12 sps:$4 sm:$0xff]  }
  0x43   :  { %2270 = vmatprep.mubr.msk.bf16.mxu0 %vm2529_vm0, %v2528_v2  ;;  %v2522_v34 = vld [vmem:[%s3112_s0 + $0x228] ss:$12 sps:$4 sm:$0xff]  }
  0x49   :  { %855 = vmatmul.mubr.bf16.gmra.mrb[4].mxu1 %v2434_v33  ;;  %v2518_v33 = vld [vmem:[%s3112_s0 + $0x210] ss:$12 sps:$4 sm:$0xff]  }
  0x4a   :  { %862 = vmatprep.mubr.bf16.mxu1 %v2436_v35  ;;  %2271 = vmatmul.mubr.bf16.gmra.mrb[20].mxu0 %v2447_v37  ;;  %v2524_v35 = vld [vmem:[%s3112_s0 + $0x244] ss:$12 sps:$4 sm:$0xff]   ;;  %v2526_v37 = vld [vmem:[%s3112_s0 + $0x240] ss:$12 sps:$4 sm:$0xff]  }
  0x4b   :  { %2274 = vmatprep.mubr.msk.bf16.mxu0 %vm2529_vm0, %v2528_v2 }
  0x51   :  { %863 = vmatmul.mubr.bf16.gmra.mrb[8].mxu1 %v2438_v36 }
  0x52   :  { %870 = vmatprep.mubr.bf16.mxu1 %v2440_v38  ;;  %2275 = vmatmul.mubr.bf16.gmra.mrb[24].mxu0 %v2451_v40 }
  0x53   :  { %2278 = vmatprep.mubr.msk.bf16.mxu0 %vm2529_vm0, %v2528_v2 }
  0x59   :  { %871 = vmatmul.mubr.bf16.gmra.mrb[12].mxu1 %v2442_v39 }
  0x5a   :  { %878 = vmatprep.mubr.bf16.mxu1 %v2444_v41  ;;  %2279 = vmatmul.mubr.bf16.gmra.mrb[28].mxu0 %v2455_v43 }
  0x5b   :  { %2282 = vmatprep.mubr.msk.bf16.mxu0 %vm2529_vm0, %v2528_v2 }
  0x61   :  { %879 = vmatmul.mubr.bf16.gmra.mrb[16].mxu1 %v2446_v42 }
  0x62   :  { %886 = vmatprep.mubr.bf16.mxu1 %v2448_v44  ;;  %2283 = vmatmul.mubr.bf16.gmra.mrb[32].mxu0 %v2459_v46 }
  0x63   :  { %2286 = vmatprep.mubr.msk.bf16.mxu0 %vm2529_vm0, %v2528_v2 }
  0x69   :  { %887 = vmatmul.mubr.bf16.gmra.mrb[20].mxu1 %v2450_v45 }
  0x6a   :  { %894 = vmatprep.mubr.bf16.mxu1 %v2452_v47  ;;  %2287 = vmatmul.mubr.bf16.gmra.mrb[36].mxu0 %v2463_v49 }
  0x6b   :  { %2290 = vmatprep.mubr.msk.bf16.mxu0 %vm2529_vm0, %v2528_v2 }
  0x71   :  { %895 = vmatmul.mubr.bf16.gmra.mrb[24].mxu1 %v2454_v48 }
  0x72   :  { %902 = vmatprep.mubr.bf16.mxu1 %v2456_v50  ;;  %2291 = vmatmul.mubr.bf16.gmra.mrb[40].mxu0 %v2467_v52  ;;  %v2929_v50 = vld [vmem:[%s3113_s2] ss:$0 sm:$0xff] }
  0x73   :  { %2294 = vmatprep.mubr.msk.bf16.mxu0 %vm2529_vm0, %v2528_v2 }
  0x79   :  { %903 = vmatmul.mubr.bf16.gmra.mrb[28].mxu1 %v2458_v51 }
  0x7a   :  { %910 = vmatprep.mubr.bf16.mxu1 %v2460_v53  ;;  %2295 = vmatmul.mubr.bf16.gmra.mrb[44].mxu0 %v2471_v55  ;;  %v2934_v55 = vld [vmem:[%s3114_s3] ss:$0 sm:$0xff] }
  0x7b   :  { %2298 = vmatprep.mubr.msk.bf16.mxu0 %vm2529_vm0, %v2528_v2 }
  0x81   :  { %911 = vmatmul.mubr.bf16.gmra.mrb[32].mxu1 %v2462_v54 }
  0x82   :  { %918 = vmatprep.mubr.bf16.mxu1 %v2464_v56  ;;  %2299 = vmatmul.mubr.bf16.gmra.mrb[48].mxu0 %v2475_v58 }
  0x83   :  { %2302 = vmatprep.mubr.msk.bf16.mxu0 %vm2529_vm0, %v2528_v2 }
  0x89   :  { %919 = vmatmul.mubr.bf16.gmra.mrb[36].mxu1 %v2466_v57 }
  0x8a   :  { %926 = vmatprep.mubr.bf16.mxu1 %v2468_v59  ;;  %2303 = vmatmul.mubr.bf16.gmra.mrb[52].mxu0 %v2479_v61 }
  0x8b   :  { %2306 = vmatprep.mubr.msk.bf16.mxu0 %vm2529_vm0, %v2528_v2 }
  0x91   :  { %927 = vmatmul.mubr.bf16.gmra.mrb[40].mxu1 %v2470_v60 }
  0x92   :  { %934 = vmatprep.mubr.bf16.mxu1 %v2472_v62  ;;  %2307 = vmatmul.mubr.bf16.gmra.mrb[56].mxu0 %v2483_v0 }
  0x93   :  { %2310 = vmatprep.mubr.msk.bf16.mxu0 %vm2529_vm0, %v2528_v2 }
  0x99   :  { %935 = vmatmul.mubr.bf16.gmra.mrb[44].mxu1 %v2474_v63 }
  0x9a   :  { %942 = vmatprep.mubr.bf16.mxu1 %v2476_v1  ;;  %2311 = vmatmul.mubr.bf16.gmra.mrb[60].mxu0 %v2487_v4 }
  0x9b   :  { %2314 = vmatprep.mubr.msk.bf16.mxu0 %vm2529_vm0, %v2528_v2 }
  0xa1   :  { %943 = vmatmul.mubr.bf16.gmra.mrb[48].mxu1 %v2478_v3 }
  0xa2   :  { %950 = vmatprep.mubr.bf16.mxu1 %v2480_v5  ;;  %2315 = vmatmul.mubr.bf16.gmra.mrb[64].mxu0 %v2491_v7 }
  0xa3   :  { %2318 = vmatprep.mubr.msk.bf16.mxu0 %vm2529_vm0, %v2528_v2 }
  0xa9   :  { %951 = vmatmul.mubr.bf16.gmra.mrb[52].mxu1 %v2482_v6 }
  0xaa   :  { %958 = vmatprep.mubr.bf16.mxu1 %v2484_v8  ;;  %2319 = vmatmul.mubr.bf16.gmra.mrb[68].mxu0 %v2495_v10 }
  0xab   :  { %2322 = vmatprep.mubr.msk.bf16.mxu0 %vm2529_vm0, %v2528_v2 }
  0xb1   :  { %959 = vmatmul.mubr.bf16.gmra.mrb[56].mxu1 %v2486_v9 }
  0xb2   :  { %966 = vmatprep.mubr.bf16.mxu1 %v2488_v11  ;;  %2323 = vmatmul.mubr.bf16.gmra.mrb[72].mxu0 %v2499_v13 }
  0xb3   :  { %2326 = vmatprep.mubr.msk.bf16.mxu0 %vm2529_vm0, %v2528_v2 }
  0xb9   :  { %967 = vmatmul.mubr.bf16.gmra.mrb[60].mxu1 %v2490_v12 }
  0xba   :  { %974 = vmatprep.mubr.bf16.mxu1 %v2492_v14  ;;  %2327 = vmatmul.mubr.bf16.gmra.mrb[76].mxu0 %v2503_v16 }
  0xbb   :  { %2330 = vmatprep.mubr.msk.bf16.mxu0 %vm2529_vm0, %v2528_v2 }
  0xc1   :  { %975 = vmatmul.mubr.bf16.gmra.mrb[64].mxu1 %v2494_v15 }
  0xc2   :  { %982 = vmatprep.mubr.bf16.mxu1 %v2496_v17  ;;  %2331 = vmatmul.mubr.bf16.gmra.mrb[80].mxu0 %v2507_v19 }
  0xc3   :  { %2334 = vmatprep.mubr.msk.bf16.mxu0 %vm2529_vm0, %v2528_v2 }
  0xc9   :  { %983 = vmatmul.mubr.bf16.gmra.mrb[68].mxu1 %v2498_v18 }
  0xca   :  { %990 = vmatprep.mubr.bf16.mxu1 %v2500_v20  ;;  %2335 = vmatmul.mubr.bf16.gmra.mrb[84].mxu0 %v2511_v22 }
  0xcb   :  { %2338 = vmatprep.mubr.msk.bf16.mxu0 %vm2529_vm0, %v2528_v2 }
  0xd1   :  { %991 = vmatmul.mubr.bf16.gmra.mrb[72].mxu1 %v2502_v21 }
  0xd2   :  { %998 = vmatprep.mubr.bf16.mxu1 %v2504_v23  ;;  %2339 = vmatmul.mubr.bf16.gmra.mrb[88].mxu0 %v2515_v25 }
  0xd3   :  { %2342 = vmatprep.mubr.msk.bf16.mxu0 %vm2529_vm0, %v2528_v2 }
  0xd9   :  { %999 = vmatmul.mubr.bf16.gmra.mrb[76].mxu1 %v2506_v24 }
  0xda   :  { %1006 = vmatprep.mubr.bf16.mxu1 %v2508_v26  ;;  %2343 = vmatmul.mubr.bf16.gmra.mrb[92].mxu0 %v2519_v28 }
  0xdb   :  { %2346 = vmatprep.mubr.msk.bf16.mxu0 %vm2529_vm0, %v2528_v2  ;;  %v2520_v2 = vld [vmem:[%s3112_s0 + $0x22c] ss:$12 sps:$4 sm:$0xff]  }
  0xe1   :  { %1007 = vmatmul.mubr.bf16.gmra.mrb[80].mxu1 %v2510_v27 }
  0xe2   :  { %1014 = vmatprep.mubr.bf16.mxu1 %v2512_v29  ;;  %2347 = vmatmul.mubr.bf16.gmra.mrb[96].mxu0 %v2523_v31 }
  0xe9   :  { %1015 = vmatmul.mubr.bf16.gmra.mrb[84].mxu1 %v2514_v30 }
  0xea   :  { %1022 = vmatprep.mubr.bf16.mxu1 %v2516_v32 }
  0xf1   :  { %1023 = vmatmul.mubr.bf16.gmra.mrb[88].mxu1 %v2518_v33 }
  0xf2   :  { %1030 = vmatprep.mubr.bf16.mxu1 %v2520_v2 }
  0xf5   :  { %v1081_v36 = vpop.f32.mrb[0].mxu0 }
  0xf6   :  { %v2252_v38 = vpop.f32.mrb[1].mxu0 }
  0xf7   :  { %v1084_v39 = vpop.f32.mrb[2].mxu0 }
  0xf8   :  { %v2253_v40 = vpop.f32.mrb[3].mxu0 }
  0xf9   :  { %1031 = vmatmul.mubr.bf16.gmra.mrb[92].mxu1 %v2522_v34 }
  0xfa   :  { %1038 = vmatprep.mubr.bf16.mxu1 %v2524_v35 }
  0xfd   :  { %v1089_v41 = vpop.f32.mrb[4].mxu0 }
  0xfe   :  { %v2256_v42 = vpop.f32.mrb[5].mxu0 }
  0xff   :  { %v1092_v43 = vpop.f32.mrb[6].mxu0 }
 0x100   :  { %v2257_v44 = vpop.f32.mrb[7].mxu0 }
 0x101   :  { %1039 = vmatmul.mubr.bf16.gmra.mrb[96].mxu1 %v2526_v37 }
 0x105   :  { %v1097_v45 = vpop.f32.mrb[8].mxu0 }
 0x106   :  { %v2260_v46 = vpop.f32.mrb[9].mxu0 }
 0x107   :  { %v1100_v47 = vpop.f32.mrb[10].mxu0 }
 0x108   :  { %v2261_v48 = vpop.f32.mrb[11].mxu0 }
 0x10d   :  { %v1105_v51 = vpop.f32.mrb[12].mxu0 }
 0x10e   :  { %v2264_v54 = vpop.f32.mrb[13].mxu0 }
 0x10f   :  { %v1108_v57 = vpop.f32.mrb[14].mxu0 }
 0x110   :  { %v2265_v61 = vpop.f32.mrb[15].mxu0 }
 0x114   :  { %v848_v49 = vpop.f32.mrb[0].mxu1 }
 0x115   :  { %v1082_v52 = vadd.f32 %v1081_v36, %v848_v49  ;;  %v850_v53 = vpop.f32.mrb[1].mxu1  ;;  %v1113_v3 = vpop.f32.mrb[16].mxu0 }
 0x116   :  { %v851_v56 = vpop.f32.mrb[2].mxu1  ;;  %v2268_v8 = vpop.f32.mrb[17].mxu0 }
 0x117   :  { %v1440_v58 = vmul.f32 %v2929_v50, %v1082_v52  ;;  %v1085_v59 = vadd.f32 %v1084_v39, %v851_v56  ;;  %v853_v60 = vpop.f32.mrb[3].mxu1  ;;  %v1116_v10 = vpop.f32.mrb[18].mxu0 }
 0x118   :  { %v2269_v15 = vpop.f32.mrb[19].mxu0 }
 0x119   :  { %v1497_v62 = vadd.f32 %v2934_v55, %v1440_v58  ;;  %v1441_v63 = vmul.f32 %v2929_v50, %v1085_v59 }
 0x11b   :  { %v1498_v0 = vadd.f32 %v2934_v55, %v1441_v63  ;;  %v1547_v4 = vmax.f32 %v1497_v62, 0.0 }
 0x11c   :  { %v856_v1 = vpop.f32.mrb[4].mxu1 }
 0x11d   :  { %v1548_v5 = vmax.f32 %v1498_v0, 0.0  ;;  %v1090_v6 = vadd.f32 %v1089_v41, %v856_v1  ;;  %v858_v7 = vpop.f32.mrb[5].mxu1  ;;  %v1121_v20 = vpop.f32.mrb[20].mxu0 }
 0x11e   :  { %v859_v9 = vpop.f32.mrb[6].mxu1  ;;  %v2272_v25 = vpop.f32.mrb[21].mxu0 }
 0x11f   :  { %v2055_v11 = vpack.c.bf16 %v1548_v5, %v1547_v4  ;;  %v1442_v12 = vmul.f32 %v2929_v50, %v1090_v6  ;;  %v1093_v13 = vadd.f32 %v1092_v43, %v859_v9  ;;  %v861_v14 = vpop.f32.mrb[7].mxu1  ;;  %v1124_v27 = vpop.f32.mrb[22].mxu0 }
 0x120   :  { %v2273_v32 = vpop.f32.mrb[23].mxu0 }
 0x121   :  { %2056 = vst [vmem:[%s3115_s4] sm:$0xff] %v2055_v11   ;;  %v1499_v16 = vadd.f32 %v2934_v55, %v1442_v12  ;;  %v1443_v17 = vmul.f32 %v2929_v50, %v1093_v13 }
 0x123   :  { %v1500_v18 = vadd.f32 %v2934_v55, %v1443_v17  ;;  %v1549_v21 = vmax.f32 %v1499_v16, 0.0 }
 0x124   :  { %v864_v19 = vpop.f32.mrb[8].mxu1 }
 0x125   :  { %v1550_v22 = vmax.f32 %v1500_v18, 0.0  ;;  %v1098_v23 = vadd.f32 %v1097_v45, %v864_v19  ;;  %v866_v24 = vpop.f32.mrb[9].mxu1  ;;  %v1129_v36 = vpop.f32.mrb[24].mxu0 }
 0x126   :  { %v867_v26 = vpop.f32.mrb[10].mxu1  ;;  %v2276_v41 = vpop.f32.mrb[25].mxu0 }
 0x127   :  { %v2060_v28 = vpack.c.bf16 %v1550_v22, %v1549_v21  ;;  %v1444_v29 = vmul.f32 %v2929_v50, %v1098_v23  ;;  %v1101_v30 = vadd.f32 %v1100_v47, %v867_v26  ;;  %v869_v31 = vpop.f32.mrb[11].mxu1  ;;  %v1132_v43 = vpop.f32.mrb[26].mxu0 }
 0x128   :  { %v2277_v48 = vpop.f32.mrb[27].mxu0 }
 0x129   :  { %2177 = vst [vmem:[%s3115_s4 + $0x8] sm:$0xff] %v2060_v28   ;;  %v1501_v33 = vadd.f32 %v2934_v55, %v1444_v29  ;;  %v1445_v2 = vmul.f32 %v2929_v50, %v1101_v30 }
 0x12b   :  { %v1502_v34 = vadd.f32 %v2934_v55, %v1445_v2  ;;  %v1551_v37 = vmax.f32 %v1501_v33, 0.0 }
 0x12c   :  { %v872_v35 = vpop.f32.mrb[12].mxu1 }
 0x12d   :  { %v1552_v38 = vmax.f32 %v1502_v34, 0.0  ;;  %v1106_v39 = vadd.f32 %v1105_v51, %v872_v35  ;;  %v874_v40 = vpop.f32.mrb[13].mxu1  ;;  %v1137_v54 = vpop.f32.mrb[28].mxu0 }
 0x12e   :  { %v875_v42 = vpop.f32.mrb[14].mxu1  ;;  %v2280_v61 = vpop.f32.mrb[29].mxu0 }
 0x12f   :  { %v2065_v44 = vpack.c.bf16 %v1552_v38, %v1551_v37  ;;  %v1446_v45 = vmul.f32 %v2929_v50, %v1106_v39  ;;  %v1109_v46 = vadd.f32 %v1108_v57, %v875_v42  ;;  %v877_v47 = vpop.f32.mrb[15].mxu1  ;;  %v1140_v62 = vpop.f32.mrb[30].mxu0 }
 0x130   :  { %v2281_v5 = vpop.f32.mrb[31].mxu0 }
 0x131   :  { %2178 = vst [vmem:[%s3115_s4 + $0x10] sm:$0xff] %v2065_v44   ;;  %v1503_v49 = vadd.f32 %v2934_v55, %v1446_v45  ;;  %v1447_v52 = vmul.f32 %v2929_v50, %v1109_v46 }
 0x133   :  { %v1504_v51 = vadd.f32 %v2934_v55, %v1447_v52  ;;  %v1553_v56 = vmax.f32 %v1503_v49, 0.0 }
 0x134   :  { %v880_v53 = vpop.f32.mrb[16].mxu1 }
 0x135   :  { %v1554_v58 = vmax.f32 %v1504_v51, 0.0  ;;  %v1114_v59 = vadd.f32 %v1113_v3, %v880_v53  ;;  %v882_v60 = vpop.f32.mrb[17].mxu1  ;;  %v1145_v9 = vpop.f32.mrb[32].mxu0 }
 0x136   :  { %v883_v57 = vpop.f32.mrb[18].mxu1  ;;  %v2284_v15 = vpop.f32.mrb[33].mxu0 }
 0x137   :  { %v2070_v63 = vpack.c.bf16 %v1554_v58, %v1553_v56  ;;  %v1448_v0 = vmul.f32 %v2929_v50, %v1114_v59  ;;  %v1117_v1 = vadd.f32 %v1116_v10, %v883_v57  ;;  %v885_v4 = vpop.f32.mrb[19].mxu1  ;;  %v1148_v16 = vpop.f32.mrb[34].mxu0 }
 0x138   :  { %v2285_v22 = vpop.f32.mrb[35].mxu0 }
 0x139   :  { %2179 = vst [vmem:[%s3115_s4 + $0x18] sm:$0xff] %v2070_v63   ;;  %v1505_v6 = vadd.f32 %v2934_v55, %v1448_v0  ;;  %v1449_v7 = vmul.f32 %v2929_v50, %v1117_v1 }
 0x13b   :  { %v1506_v3 = vadd.f32 %v2934_v55, %v1449_v7  ;;  %v1555_v11 = vmax.f32 %v1505_v6, 0.0 }
 0x13c   :  { %v888_v8 = vpop.f32.mrb[20].mxu1 }
 0x13d   :  { %v1556_v12 = vmax.f32 %v1506_v3, 0.0  ;;  %v1122_v13 = vadd.f32 %v1121_v20, %v888_v8  ;;  %v890_v14 = vpop.f32.mrb[21].mxu1  ;;  %v1153_v26 = vpop.f32.mrb[36].mxu0 }
 0x13e   :  { %v891_v10 = vpop.f32.mrb[22].mxu1  ;;  %v2288_v32 = vpop.f32.mrb[37].mxu0 }
 0x13f   :  { %v2075_v17 = vpack.c.bf16 %v1556_v12, %v1555_v11  ;;  %v1450_v18 = vmul.f32 %v2929_v50, %v1122_v13  ;;  %v1125_v19 = vadd.f32 %v1124_v27, %v891_v10  ;;  %v893_v21 = vpop.f32.mrb[23].mxu1  ;;  %v1156_v33 = vpop.f32.mrb[38].mxu0 }
 0x140   :  { %v2289_v38 = vpop.f32.mrb[39].mxu0 }
 0x141   :  { %2180 = vst [vmem:[%s3115_s4 + $0x20] sm:$0xff] %v2075_v17   ;;  %v1507_v23 = vadd.f32 %v2934_v55, %v1450_v18  ;;  %v1451_v24 = vmul.f32 %v2929_v50, %v1125_v19 }
 0x143   :  { %v1508_v20 = vadd.f32 %v2934_v55, %v1451_v24  ;;  %v1557_v28 = vmax.f32 %v1507_v23, 0.0 }
 0x144   :  { %v896_v25 = vpop.f32.mrb[24].mxu1 }
 0x145   :  { %v1558_v29 = vmax.f32 %v1508_v20, 0.0  ;;  %v1130_v30 = vadd.f32 %v1129_v36, %v896_v25  ;;  %v898_v31 = vpop.f32.mrb[25].mxu1  ;;  %v1161_v42 = vpop.f32.mrb[40].mxu0 }
 0x146   :  { %v899_v27 = vpop.f32.mrb[26].mxu1  ;;  %v2292_v48 = vpop.f32.mrb[41].mxu0 }
 0x147   :  { %v2080_v2 = vpack.c.bf16 %v1558_v29, %v1557_v28  ;;  %v1452_v34 = vmul.f32 %v2929_v50, %v1130_v30  ;;  %v1133_v35 = vadd.f32 %v1132_v43, %v899_v27  ;;  %v901_v37 = vpop.f32.mrb[27].mxu1  ;;  %v1164_v49 = vpop.f32.mrb[42].mxu0 }
 0x148   :  { %v2293_v58 = vpop.f32.mrb[43].mxu0 }
 0x149   :  { %2181 = vst [vmem:[%s3115_s4 + $0x28] sm:$0xff] %v2080_v2   ;;  %v1509_v39 = vadd.f32 %v2934_v55, %v1452_v34  ;;  %v1453_v40 = vmul.f32 %v2929_v50, %v1133_v35 }
 0x14b   :  { %v1510_v36 = vadd.f32 %v2934_v55, %v1453_v40  ;;  %v1559_v44 = vmax.f32 %v1509_v39, 0.0 }
 0x14c   :  { %v904_v41 = vpop.f32.mrb[28].mxu1 }
 0x14d   :  { %v1560_v45 = vmax.f32 %v1510_v36, 0.0  ;;  %v1138_v46 = vadd.f32 %v1137_v54, %v904_v41  ;;  %v906_v47 = vpop.f32.mrb[29].mxu1  ;;  %v1169_v57 = vpop.f32.mrb[44].mxu0 }
 0x14e   :  { %v907_v43 = vpop.f32.mrb[30].mxu1  ;;  %v2296_v5 = vpop.f32.mrb[45].mxu0 }
 0x14f   :  { %v2085_v52 = vpack.c.bf16 %v1560_v45, %v1559_v44  ;;  %v1454_v51 = vmul.f32 %v2929_v50, %v1138_v46  ;;  %v1141_v53 = vadd.f32 %v1140_v62, %v907_v43  ;;  %v909_v56 = vpop.f32.mrb[31].mxu1  ;;  %v1172_v6 = vpop.f32.mrb[46].mxu0 }
 0x150   :  { %v2297_v12 = vpop.f32.mrb[47].mxu0 }
 0x151   :  { %2182 = vst [vmem:[%s3115_s4 + $0x30] sm:$0xff] %v2085_v52   ;;  %v1511_v59 = vadd.f32 %v2934_v55, %v1454_v51  ;;  %v1455_v60 = vmul.f32 %v2929_v50, %v1141_v53 }
 0x153   :  { %v1512_v54 = vadd.f32 %v2934_v55, %v1455_v60  ;;  %v1561_v63 = vmax.f32 %v1511_v59, 0.0 }
 0x154   :  { %v912_v61 = vpop.f32.mrb[32].mxu1 }
 0x155   :  { %v1562_v0 = vmax.f32 %v1512_v54, 0.0  ;;  %v1146_v1 = vadd.f32 %v1145_v9, %v912_v61  ;;  %v914_v4 = vpop.f32.mrb[33].mxu1  ;;  %v1177_v10 = vpop.f32.mrb[48].mxu0 }
 0x156   :  { %v915_v62 = vpop.f32.mrb[34].mxu1  ;;  %v2300_v22 = vpop.f32.mrb[49].mxu0 }
 0x157   :  { %v2090_v7 = vpack.c.bf16 %v1562_v0, %v1561_v63  ;;  %v1456_v3 = vmul.f32 %v2929_v50, %v1146_v1  ;;  %v1149_v8 = vadd.f32 %v1148_v16, %v915_v62  ;;  %v917_v11 = vpop.f32.mrb[35].mxu1  ;;  %v1180_v23 = vpop.f32.mrb[50].mxu0 }
 0x158   :  { %v2301_v29 = vpop.f32.mrb[51].mxu0 }
 0x159   :  { %2183 = vst [vmem:[%s3115_s4 + $0x38] sm:$0xff] %v2090_v7   ;;  %v1513_v13 = vadd.f32 %v2934_v55, %v1456_v3  ;;  %v1457_v14 = vmul.f32 %v2929_v50, %v1149_v8 }
 0x15b   :  { %v1514_v9 = vadd.f32 %v2934_v55, %v1457_v14  ;;  %v1563_v17 = vmax.f32 %v1513_v13, 0.0 }
 0x15c   :  { %v920_v15 = vpop.f32.mrb[36].mxu1 }
 0x15d   :  { %v1564_v18 = vmax.f32 %v1514_v9, 0.0  ;;  %v1154_v19 = vadd.f32 %v1153_v26, %v920_v15  ;;  %v922_v21 = vpop.f32.mrb[37].mxu1  ;;  %v1185_v27 = vpop.f32.mrb[52].mxu0 }
 0x15e   :  { %v923_v16 = vpop.f32.mrb[38].mxu1  ;;  %v2304_v38 = vpop.f32.mrb[53].mxu0 }
 0x15f   :  { %v2095_v24 = vpack.c.bf16 %v1564_v18, %v1563_v17  ;;  %v1458_v20 = vmul.f32 %v2929_v50, %v1154_v19  ;;  %v1157_v25 = vadd.f32 %v1156_v33, %v923_v16  ;;  %v925_v28 = vpop.f32.mrb[39].mxu1  ;;  %v1188_v39 = vpop.f32.mrb[54].mxu0 }
 0x160   :  { %v2305_v45 = vpop.f32.mrb[55].mxu0 }
 0x161   :  { %2184 = vst [vmem:[%s3115_s4 + $0x40] sm:$0xff] %v2095_v24   ;;  %v1515_v30 = vadd.f32 %v2934_v55, %v1458_v20  ;;  %v1459_v31 = vmul.f32 %v2929_v50, %v1157_v25 }
 0x163   :  { %v1516_v26 = vadd.f32 %v2934_v55, %v1459_v31  ;;  %v1565_v2 = vmax.f32 %v1515_v30, 0.0 }
 0x164   :  { %v928_v32 = vpop.f32.mrb[40].mxu1 }
 0x165   :  { %v1566_v34 = vmax.f32 %v1516_v26, 0.0  ;;  %v1162_v35 = vadd.f32 %v1161_v42, %v928_v32  ;;  %v930_v37 = vpop.f32.mrb[41].mxu1  ;;  %v1193_v43 = vpop.f32.mrb[56].mxu0 }
 0x166   :  { %v931_v33 = vpop.f32.mrb[42].mxu1  ;;  %v2308_v58 = vpop.f32.mrb[57].mxu0 }
 0x167   :  { %v2100_v40 = vpack.c.bf16 %v1566_v34, %v1565_v2  ;;  %v1460_v36 = vmul.f32 %v2929_v50, %v1162_v35  ;;  %v1165_v41 = vadd.f32 %v1164_v49, %v931_v33  ;;  %v933_v44 = vpop.f32.mrb[43].mxu1  ;;  %v1196_v59 = vpop.f32.mrb[58].mxu0 }
 0x168   :  { %v2309_v0 = vpop.f32.mrb[59].mxu0 }
 0x169   :  { %2185 = vst [vmem:[%s3115_s4 + $0x48] sm:$0xff] %v2100_v40   ;;  %v1517_v46 = vadd.f32 %v2934_v55, %v1460_v36  ;;  %v1461_v47 = vmul.f32 %v2929_v50, %v1165_v41 }
 0x16b   :  { %v1518_v42 = vadd.f32 %v2934_v55, %v1461_v47  ;;  %v1567_v52 = vmax.f32 %v1517_v46, 0.0 }
 0x16c   :  { %v936_v48 = vpop.f32.mrb[44].mxu1 }
 0x16d   :  { %v1568_v51 = vmax.f32 %v1518_v42, 0.0  ;;  %v1170_v53 = vadd.f32 %v1169_v57, %v936_v48  ;;  %v938_v56 = vpop.f32.mrb[45].mxu1  ;;  %v1201_v62 = vpop.f32.mrb[60].mxu0 }
 0x16e   :  { %v939_v49 = vpop.f32.mrb[46].mxu1  ;;  %v2312_v12 = vpop.f32.mrb[61].mxu0 }
 0x16f   :  { %v2105_v60 = vpack.c.bf16 %v1568_v51, %v1567_v52  ;;  %v1462_v54 = vmul.f32 %v2929_v50, %v1170_v53  ;;  %v1173_v61 = vadd.f32 %v1172_v6, %v939_v49  ;;  %v941_v63 = vpop.f32.mrb[47].mxu1  ;;  %v1204_v13 = vpop.f32.mrb[62].mxu0 }
 0x170   :  { %v2313_v18 = vpop.f32.mrb[63].mxu0 }
 0x171   :  { %2186 = vst [vmem:[%s3115_s4 + $0x50] sm:$0xff] %v2105_v60   ;;  %v1519_v1 = vadd.f32 %v2934_v55, %v1462_v54  ;;  %v1463_v4 = vmul.f32 %v2929_v50, %v1173_v61 }
 0x173   :  { %v1520_v57 = vadd.f32 %v2934_v55, %v1463_v4  ;;  %v1569_v7 = vmax.f32 %v1519_v1, 0.0 }
 0x174   :  { %v944_v5 = vpop.f32.mrb[48].mxu1 }
 0x175   :  { %v1570_v3 = vmax.f32 %v1520_v57, 0.0  ;;  %v1178_v8 = vadd.f32 %v1177_v10, %v944_v5  ;;  %v946_v11 = vpop.f32.mrb[49].mxu1  ;;  %v1209_v16 = vpop.f32.mrb[64].mxu0 }
 0x176   :  { %v947_v6 = vpop.f32.mrb[50].mxu1  ;;  %v2316_v29 = vpop.f32.mrb[65].mxu0 }
 0x177   :  { %v2110_v14 = vpack.c.bf16 %v1570_v3, %v1569_v7  ;;  %v1464_v9 = vmul.f32 %v2929_v50, %v1178_v8  ;;  %v1181_v15 = vadd.f32 %v1180_v23, %v947_v6  ;;  %v949_v17 = vpop.f32.mrb[51].mxu1  ;;  %v1212_v30 = vpop.f32.mrb[66].mxu0 }
 0x178   :  { %v2317_v34 = vpop.f32.mrb[67].mxu0 }
 0x179   :  { %2187 = vst [vmem:[%s3115_s4 + $0x58] sm:$0xff] %v2110_v14   ;;  %v1521_v19 = vadd.f32 %v2934_v55, %v1464_v9  ;;  %v1465_v21 = vmul.f32 %v2929_v50, %v1181_v15 }
 0x17b   :  { %v1522_v10 = vadd.f32 %v2934_v55, %v1465_v21  ;;  %v1571_v24 = vmax.f32 %v1521_v19, 0.0 }
 0x17c   :  { %v952_v22 = vpop.f32.mrb[52].mxu1 }
 0x17d   :  { %v1572_v20 = vmax.f32 %v1522_v10, 0.0  ;;  %v1186_v25 = vadd.f32 %v1185_v27, %v952_v22  ;;  %v954_v28 = vpop.f32.mrb[53].mxu1  ;;  %v1217_v33 = vpop.f32.mrb[68].mxu0 }
 0x17e   :  { %v955_v23 = vpop.f32.mrb[54].mxu1  ;;  %v2320_v45 = vpop.f32.mrb[69].mxu0 }
 0x17f   :  { %v2115_v31 = vpack.c.bf16 %v1572_v20, %v1571_v24  ;;  %v1466_v26 = vmul.f32 %v2929_v50, %v1186_v25  ;;  %v1189_v32 = vadd.f32 %v1188_v39, %v955_v23  ;;  %v957_v2 = vpop.f32.mrb[55].mxu1  ;;  %v1220_v46 = vpop.f32.mrb[70].mxu0 }
 0x180   :  { %v2321_v51 = vpop.f32.mrb[71].mxu0 }
 0x181   :  { %2188 = vst [vmem:[%s3115_s4 + $0x60] sm:$0xff] %v2115_v31   ;;  %v1523_v35 = vadd.f32 %v2934_v55, %v1466_v26  ;;  %v1467_v37 = vmul.f32 %v2929_v50, %v1189_v32 }
 0x183   :  { %v1524_v27 = vadd.f32 %v2934_v55, %v1467_v37  ;;  %v1573_v40 = vmax.f32 %v1523_v35, 0.0 }
 0x184   :  { %v960_v38 = vpop.f32.mrb[56].mxu1 }
 0x185   :  { %v1574_v36 = vmax.f32 %v1524_v27, 0.0  ;;  %v1194_v41 = vadd.f32 %v1193_v43, %v960_v38  ;;  %v962_v44 = vpop.f32.mrb[57].mxu1  ;;  %v1225_v49 = vpop.f32.mrb[72].mxu0 }
 0x186   :  { %v963_v39 = vpop.f32.mrb[58].mxu1  ;;  %v2324_v0 = vpop.f32.mrb[73].mxu0 }
 0x187   :  { %v2120_v47 = vpack.c.bf16 %v1574_v36, %v1573_v40  ;;  %v1468_v42 = vmul.f32 %v2929_v50, %v1194_v41  ;;  %v1197_v48 = vadd.f32 %v1196_v59, %v963_v39  ;;  %v965_v52 = vpop.f32.mrb[59].mxu1  ;;  %v1228_v1 = vpop.f32.mrb[74].mxu0 }
 0x188   :  { %v2325_v3 = vpop.f32.mrb[75].mxu0 }
 0x189   :  { %2189 = vst [vmem:[%s3115_s4 + $0x68] sm:$0xff] %v2120_v47   ;;  %v1525_v53 = vadd.f32 %v2934_v55, %v1468_v42  ;;  %v1469_v56 = vmul.f32 %v2929_v50, %v1197_v48 }
 0x18b   :  { %v1526_v43 = vadd.f32 %v2934_v55, %v1469_v56  ;;  %v1575_v60 = vmax.f32 %v1525_v53, 0.0 }
 0x18c   :  { %v968_v58 = vpop.f32.mrb[60].mxu1 }
 0x18d   :  { %v1576_v54 = vmax.f32 %v1526_v43, 0.0  ;;  %v1202_v61 = vadd.f32 %v1201_v62, %v968_v58  ;;  %v970_v63 = vpop.f32.mrb[61].mxu1  ;;  %v1233_v6 = vpop.f32.mrb[76].mxu0 }
 0x18e   :  { %v971_v59 = vpop.f32.mrb[62].mxu1  ;;  %v2328_v18 = vpop.f32.mrb[77].mxu0 }
 0x18f   :  { %v2125_v4 = vpack.c.bf16 %v1576_v54, %v1575_v60  ;;  %v1470_v57 = vmul.f32 %v2929_v50, %v1202_v61  ;;  %v1205_v5 = vadd.f32 %v1204_v13, %v971_v59  ;;  %v973_v7 = vpop.f32.mrb[63].mxu1  ;;  %v1236_v19 = vpop.f32.mrb[78].mxu0 }
 0x190   :  { %v2329_v20 = vpop.f32.mrb[79].mxu0 }
 0x191   :  { %2190 = vst [vmem:[%s3115_s4 + $0x70] sm:$0xff] %v2125_v4   ;;  %v1527_v8 = vadd.f32 %v2934_v55, %v1470_v57  ;;  %v1471_v11 = vmul.f32 %v2929_v50, %v1205_v5 }
 0x193   :  { %v1528_v62 = vadd.f32 %v2934_v55, %v1471_v11  ;;  %v1577_v14 = vmax.f32 %v1527_v8, 0.0 }
 0x194   :  { %v976_v12 = vpop.f32.mrb[64].mxu1 }
 0x195   :  { %v1578_v9 = vmax.f32 %v1528_v62, 0.0  ;;  %v1210_v15 = vadd.f32 %v1209_v16, %v976_v12  ;;  %v978_v17 = vpop.f32.mrb[65].mxu1  ;;  %v1241_v23 = vpop.f32.mrb[80].mxu0 }
 0x196   :  { %v979_v13 = vpop.f32.mrb[66].mxu1  ;;  %v2332_v34 = vpop.f32.mrb[81].mxu0 }
 0x197   :  { %v2130_v21 = vpack.c.bf16 %v1578_v9, %v1577_v14  ;;  %v1472_v10 = vmul.f32 %v2929_v50, %v1210_v15  ;;  %v1213_v22 = vadd.f32 %v1212_v30, %v979_v13  ;;  %v981_v24 = vpop.f32.mrb[67].mxu1  ;;  %v1244_v35 = vpop.f32.mrb[82].mxu0 }
 0x198   :  { %v2333_v36 = vpop.f32.mrb[83].mxu0 }
 0x199   :  { %2191 = vst [vmem:[%s3115_s4 + $0x78] sm:$0xff] %v2130_v21   ;;  %v1529_v25 = vadd.f32 %v2934_v55, %v1472_v10  ;;  %v1473_v28 = vmul.f32 %v2929_v50, %v1213_v22 }
 0x19b   :  { %v1530_v16 = vadd.f32 %v2934_v55, %v1473_v28  ;;  %v1579_v31 = vmax.f32 %v1529_v25, 0.0 }
 0x19c   :  { %v984_v29 = vpop.f32.mrb[68].mxu1 }
 0x19d   :  { %v1580_v26 = vmax.f32 %v1530_v16, 0.0  ;;  %v1218_v32 = vadd.f32 %v1217_v33, %v984_v29  ;;  %v986_v2 = vpop.f32.mrb[69].mxu1  ;;  %v1249_v39 = vpop.f32.mrb[84].mxu0 }
 0x19e   :  { %v987_v30 = vpop.f32.mrb[70].mxu1  ;;  %v2336_v51 = vpop.f32.mrb[85].mxu0 }
 0x19f   :  { %v2135_v37 = vpack.c.bf16 %v1580_v26, %v1579_v31  ;;  %v1474_v27 = vmul.f32 %v2929_v50, %v1218_v32  ;;  %v1221_v38 = vadd.f32 %v1220_v46, %v987_v30  ;;  %v989_v40 = vpop.f32.mrb[71].mxu1  ;;  %v1252_v53 = vpop.f32.mrb[86].mxu0 }
 0x1a0   :  { %v2337_v54 = vpop.f32.mrb[87].mxu0 }
 0x1a1   :  { %2192 = vst [vmem:[%s3115_s4 + $0x80] sm:$0xff] %v2135_v37   ;;  %v1531_v41 = vadd.f32 %v2934_v55, %v1474_v27  ;;  %v1475_v44 = vmul.f32 %v2929_v50, %v1221_v38 }
 0x1a3   :  { %v1532_v33 = vadd.f32 %v2934_v55, %v1475_v44  ;;  %v1581_v47 = vmax.f32 %v1531_v41, 0.0 }
 0x1a4   :  { %v992_v45 = vpop.f32.mrb[72].mxu1 }
 0x1a5   :  { %v1582_v42 = vmax.f32 %v1532_v33, 0.0  ;;  %v1226_v48 = vadd.f32 %v1225_v49, %v992_v45  ;;  %v994_v52 = vpop.f32.mrb[73].mxu1  ;;  %v1257_v59 = vpop.f32.mrb[88].mxu0 }
 0x1a6   :  { %v995_v46 = vpop.f32.mrb[74].mxu1  ;;  %v2340_v3 = vpop.f32.mrb[89].mxu0 }
 0x1a7   :  { %v2140_v56 = vpack.c.bf16 %v1582_v42, %v1581_v47  ;;  %v1476_v43 = vmul.f32 %v2929_v50, %v1226_v48  ;;  %v1229_v58 = vadd.f32 %v1228_v1, %v995_v46  ;;  %v997_v60 = vpop.f32.mrb[75].mxu1  ;;  %v1260_v8 = vpop.f32.mrb[90].mxu0 }
 0x1a8   :  { %v2341_v9 = vpop.f32.mrb[91].mxu0 }
 0x1a9   :  { %2193 = vst [vmem:[%s3115_s4 + $0x88] sm:$0xff] %v2140_v56   ;;  %v1533_v61 = vadd.f32 %v2934_v55, %v1476_v43  ;;  %v1477_v63 = vmul.f32 %v2929_v50, %v1229_v58 }
 0x1ab   :  { %v1534_v49 = vadd.f32 %v2934_v55, %v1477_v63  ;;  %v1583_v4 = vmax.f32 %v1533_v61, 0.0 }
 0x1ac   :  { %v1000_v0 = vpop.f32.mrb[76].mxu1 }
 0x1ad   :  { %v1584_v57 = vmax.f32 %v1534_v49, 0.0  ;;  %v1234_v5 = vadd.f32 %v1233_v6, %v1000_v0  ;;  %v1002_v7 = vpop.f32.mrb[77].mxu1  ;;  %v1265_v13 = vpop.f32.mrb[92].mxu0 }
 0x1ae   :  { %v1003_v1 = vpop.f32.mrb[78].mxu1  ;;  %v2344_v20 = vpop.f32.mrb[93].mxu0 }
 0x1af   :  { %v2145_v11 = vpack.c.bf16 %v1584_v57, %v1583_v4  ;;  %v1478_v62 = vmul.f32 %v2929_v50, %v1234_v5  ;;  %v1237_v12 = vadd.f32 %v1236_v19, %v1003_v1  ;;  %v1005_v14 = vpop.f32.mrb[79].mxu1  ;;  %v1268_v25 = vpop.f32.mrb[94].mxu0 }
 0x1b0   :  { %v2345_v26 = vpop.f32.mrb[95].mxu0 }
 0x1b1   :  { %2194 = vst [vmem:[%s3115_s4 + $0x90] sm:$0xff] %v2145_v11   ;;  %v1535_v15 = vadd.f32 %v2934_v55, %v1478_v62  ;;  %v1479_v17 = vmul.f32 %v2929_v50, %v1237_v12 }
 0x1b3   :  { %v1536_v6 = vadd.f32 %v2934_v55, %v1479_v17  ;;  %v1585_v21 = vmax.f32 %v1535_v15, 0.0 }
 0x1b4   :  { %v1008_v18 = vpop.f32.mrb[80].mxu1 }
 0x1b5   :  { %v1586_v10 = vmax.f32 %v1536_v6, 0.0  ;;  %v1242_v22 = vadd.f32 %v1241_v23, %v1008_v18  ;;  %v1010_v24 = vpop.f32.mrb[81].mxu1  ;;  %v1273_v30 = vpop.f32.mrb[96].mxu0 }
 0x1b6   :  { %v1011_v19 = vpop.f32.mrb[82].mxu1  ;;  %v2348_v36 = vpop.f32.mrb[97].mxu0 }
 0x1b7   :  { %v2150_v28 = vpack.c.bf16 %v1586_v10, %v1585_v21  ;;  %v1480_v16 = vmul.f32 %v2929_v50, %v1242_v22  ;;  %v1245_v29 = vadd.f32 %v1244_v35, %v1011_v19  ;;  %v1013_v31 = vpop.f32.mrb[83].mxu1  ;;  %v1276_v41 = vpop.f32.mrb[98].mxu0 }
 0x1b8   :  { %v2349_v42 = vpop.f32.mrb[99].mxu0 }
 0x1b9   :  { %2195 = vst [vmem:[%s3115_s4 + $0x98] sm:$0xff] %v2150_v28   ;;  %v1537_v32 = vadd.f32 %v2934_v55, %v1480_v16  ;;  %v1481_v2 = vmul.f32 %v2929_v50, %v1245_v29 }
 0x1bb   :  { %v1538_v23 = vadd.f32 %v2934_v55, %v1481_v2  ;;  %v1587_v37 = vmax.f32 %v1537_v32, 0.0 }
 0x1bc   :  { %v1016_v34 = vpop.f32.mrb[84].mxu1 }
 0x1bd   :  { %v1588_v27 = vmax.f32 %v1538_v23, 0.0  ;;  %v1250_v38 = vadd.f32 %v1249_v39, %v1016_v34  ;;  %v1018_v40 = vpop.f32.mrb[85].mxu1 }
 0x1be   :  { %v1019_v35 = vpop.f32.mrb[86].mxu1 }
 0x1bf   :  { %v2155_v44 = vpack.c.bf16 %v1588_v27, %v1587_v37  ;;  %v1482_v33 = vmul.f32 %v2929_v50, %v1250_v38  ;;  %v1253_v45 = vadd.f32 %v1252_v53, %v1019_v35  ;;  %v1021_v47 = vpop.f32.mrb[87].mxu1 }
 0x1c1   :  { %2196 = vst [vmem:[%s3115_s4 + $0xa0] sm:$0xff] %v2155_v44   ;;  %v1539_v48 = vadd.f32 %v2934_v55, %v1482_v33  ;;  %v1483_v52 = vmul.f32 %v2929_v50, %v1253_v45 }
 0x1c3   :  { %v1540_v39 = vadd.f32 %v2934_v55, %v1483_v52  ;;  %v1589_v46 = vmax.f32 %v1539_v48, 0.0 }
 0x1c4   :  { %v1024_v51 = vpop.f32.mrb[88].mxu1 }
 0x1c5   :  { %v1590_v56 = vmax.f32 %v1540_v39, 0.0  ;;  %v1258_v43 = vadd.f32 %v1257_v59, %v1024_v51  ;;  %v1026_v58 = vpop.f32.mrb[89].mxu1 }
 0x1c6   :  { %v1027_v60 = vpop.f32.mrb[90].mxu1 }
 0x1c7   :  { %v2160_v54 = vpack.c.bf16 %v1590_v56, %v1589_v46  ;;  %v1484_v53 = vmul.f32 %v2929_v50, %v1258_v43  ;;  %v1261_v61 = vadd.f32 %v1260_v8, %v1027_v60  ;;  %v1029_v63 = vpop.f32.mrb[91].mxu1 }
 0x1c9   :  { %2197 = vst [vmem:[%s3115_s4 + $0xa8] sm:$0xff] %v2160_v54   ;;  %v1541_v49 = vadd.f32 %v2934_v55, %v1484_v53  ;;  %v1485_v0 = vmul.f32 %v2929_v50, %v1261_v61 }
 0x1cb   :  { %v1542_v4 = vadd.f32 %v2934_v55, %v1485_v0  ;;  %v1591_v5 = vmax.f32 %v1541_v49, 0.0 }
 0x1cc   :  { %v1032_v57 = vpop.f32.mrb[92].mxu1 }
 0x1cd   :  { %v1592_v59 = vmax.f32 %v1542_v4, 0.0  ;;  %v1266_v7 = vadd.f32 %v1265_v13, %v1032_v57  ;;  %v1034_v3 = vpop.f32.mrb[93].mxu1 }
 0x1ce   :  { %v1035_v1 = vpop.f32.mrb[94].mxu1 }
 0x1cf   :  { %v2165_v11 = vpack.c.bf16 %v1592_v59, %v1591_v5  ;;  %v1486_v8 = vmul.f32 %v2929_v50, %v1266_v7  ;;  %v1269_v62 = vadd.f32 %v1268_v25, %v1035_v1  ;;  %v1037_v12 = vpop.f32.mrb[95].mxu1 }
 0x1d1   :  { %2198 = vst [vmem:[%s3115_s4 + $0xb0] sm:$0xff] %v2165_v11   ;;  %v1543_v14 = vadd.f32 %v2934_v55, %v1486_v8  ;;  %v1487_v9 = vmul.f32 %v2929_v50, %v1269_v62 }
 0x1d3   :  { %v1544_v15 = vadd.f32 %v2934_v55, %v1487_v9  ;;  %v1593_v6 = vmax.f32 %v1543_v14, 0.0 }
 0x1d4   :  { %v1040_v17 = vpop.f32.mrb[96].mxu1 }
 0x1d5   :  { %v1594_v18 = vmax.f32 %v1544_v15, 0.0  ;;  %v1274_v13 = vadd.f32 %v1273_v30, %v1040_v17  ;;  %v1042_v21 = vpop.f32.mrb[97].mxu1 }
 0x1d6   :  { %v1043_v10 = vpop.f32.mrb[98].mxu1 }
 0x1d7   :  { %v2170_v22 = vpack.c.bf16 %v1594_v18, %v1593_v6  ;;  %v1488_v24 = vmul.f32 %v2929_v50, %v1274_v13  ;;  %v1277_v20 = vadd.f32 %v1276_v41, %v1043_v10  ;;  %v1045_v19 = vpop.f32.mrb[99].mxu1 }
 0x1d9   :  { %2199 = vst [vmem:[%s3115_s4 + $0xb8] sm:$0xff] %v2170_v22   ;;  %v1545_v25 = vadd.f32 %v2934_v55, %v1488_v24  ;;  %v1489_v28 = vmul.f32 %v2929_v50, %v1277_v20 }
 0x1db   :  { %v1546_v16 = vadd.f32 %v2934_v55, %v1489_v28  ;;  %v1595_v29 = vmax.f32 %v1545_v25, 0.0 }
 0x1dd   :  { %v1596_v31 = vmax.f32 %v1546_v16, 0.0 }
 0x1df   :  { %v2175_v26 = vpack.c.bf16 %v1596_v31, %v1595_v29 }
 0x1e1   :  { %2200 = vst [vmem:[%s3115_s4 + $0xc0] sm:$0xff] %v2175_v26  }

// kernel: enhanced_cnn_forward.6
= control target key start
LH: loop header
LB: loop body
LE: loop exit
PB: predicated region body
PF: predicated region fallthrough
CT: control target
= control target key end

     0   :  { %v1464_v24 = vmov 0.0   ;;  %vm1465_vm0 = vmmov 0   ;;  %s1827_s1 = inlined_call_operand.vmem [shape: bf16[640,128], index: 1, kind: input, shape index: {}]   ;;  %s1828_s0 = inlined_call_operand.vmem [shape: bf16[112,640], index: 0, kind: input, shape index: {}]   ;;  %s1829_s2 = inlined_call_operand.vmem [shape: f32[1,128], index: 2, kind: input, shape index: {}]   ;;  %s1830_s3 = inlined_call_operand.vmem [shape: f32[1,128], index: 3, kind: input, shape index: {}]   ;;  %s1831_s4 = inlined_call_operand.vmem [shape: bf16[112,128], index: 4, kind: output, shape index: {}]  }
   0x1   :  { %v1375_v0 = vld [vmem:[%s1827_s1 + $0x40] sm:$0xff]   ;;  %v1377_v2 = vld [vmem:[%s1827_s1 + $0x48] sm:$0xff]   ;;  %v1379_v4 = vld [vmem:[%s1827_s1 + $0x50] sm:$0xff]  }
   0x2   :  { %v1376_v1 = vld [vmem:[%s1827_s1] sm:$0xff]   ;;  %1357 = vmatprep.subr.bf16.mxu1 %v1375_v0  ;;  %1182 = vmatprep.subr.bf16.mxu0 %v1375_v0  ;;  %v1378_v3 = vld [vmem:[%s1827_s1 + $0x8] sm:$0xff]   ;;  %v1380_v5 = vld [vmem:[%s1827_s1 + $0x10] sm:$0xff]  }
   0x3   :  { %1365 = vmatpush3.bf16.msra.mxu1 %v1376_v1  ;;  %1183 = vmatpush3.bf16.msra.mxu0 %v1376_v1  ;;  %v1381_v6 = vld [vmem:[%s1827_s1 + $0x58] sm:$0xff]   ;;  %v1383_v8 = vld [vmem:[%s1827_s1 + $0x60] sm:$0xff]   ;;  %v1385_v10 = vld [vmem:[%s1827_s1 + $0x68] sm:$0xff]  }
   0x4   :  { %1358 = vmatprep.subr.bf16.mxu1 %v1377_v2  ;;  %1184 = vmatprep.subr.bf16.mxu0 %v1377_v2  ;;  %v1382_v7 = vld [vmem:[%s1827_s1 + $0x18] sm:$0xff]   ;;  %v1384_v9 = vld [vmem:[%s1827_s1 + $0x20] sm:$0xff]   ;;  %v1386_v12 = vld [vmem:[%s1827_s1 + $0x28] sm:$0xff]  }
   0x5   :  { %v1393_v11 = vld [vmem:[%s1828_s0 + $0xa4] ss:$20 sps:$4 sm:$0xff]   ;;  %v1387_v14 = vld [vmem:[%s1827_s1 + $0x70] sm:$0xff]   ;;  %v1400_v23 = vld [vmem:[%s1827_s1 + $0xc8] sm:$0xff]  }
   0x6   :  { %v1397_v13 = vld [vmem:[%s1828_s0 + $0x4] ss:$20 sps:$4 sm:$0xff]   ;;  %658 = vmatprep.mubr.bf16.mxu1 %v1393_v11  ;;  %v1388_v15 = vld [vmem:[%s1827_s1 + $0x30] sm:$0xff]   ;;  %v1404_v25 = vld [vmem:[%s1828_s0 + $0x2c] ss:$20 sps:$4 sm:$0xff]  }
   0x7   :  { %1366 = vmatpush3.bf16.msra.mxu1 %v1378_v3  ;;  %1185 = vmatpush3.bf16.msra.mxu0 %v1378_v3  ;;  %v1389_v16 = vld [vmem:[%s1827_s1 + $0x78] sm:$0xff]   ;;  %v1394_v18 = vld [vmem:[%s1827_s1 + $0xc0] sm:$0xff]   ;;  %v1401_v27 = vld [vmem:[%s1827_s1 + $0x88] sm:$0xff]  }
   0x8   :  { %1359 = vmatprep.subr.bf16.mxu1 %v1379_v4  ;;  %1186 = vmatprep.subr.bf16.mxu0 %v1379_v4  ;;  %v1390_v17 = vld [vmem:[%s1827_s1 + $0x38] sm:$0xff]   ;;  %v1391_v19 = vld [vmem:[%s1828_s0 + $0xa0] ss:$20 sps:$4 sm:$0xff]   ;;  %v1402_v28 = vld [vmem:[%s1827_s1 + $0x108] sm:$0xff]  }
   0x9   :  { %626 = vmatprep.mubr.bf16.mxu0 %v1397_v13  ;;  %v1395_v20 = vld [vmem:[%s1828_s0] ss:$20 sps:$4 sm:$0xff]   ;;  %v1407_v31 = vld [vmem:[%s1828_s0 + $0x28] ss:$20 sps:$4 sm:$0xff]   ;;  %v1419_v41 = vld [vmem:[%s1828_s0 + $0x50] ss:$20 sps:$4 sm:$0xff]  }
   0xa   :  { %v1398_v21 = vld [vmem:[%s1827_s1 + $0x80] sm:$0xff]   ;;  %v1403_v29 = vld [vmem:[%s1827_s1 + $0xd0] sm:$0xff]   ;;  %v1412_v32 = vld [vmem:[%s1828_s0 + $0xc8] ss:$20 sps:$4 sm:$0xff]  }
   0xb   :  { %1367 = vmatpush3.bf16.msra.mxu1 %v1380_v5  ;;  %1187 = vmatpush3.bf16.msra.mxu0 %v1380_v5  ;;  %v1399_v22 = vld [vmem:[%s1827_s1 + $0x100] sm:$0xff]   ;;  %v1406_v30 = vld [vmem:[%s1827_s1 + $0x90] sm:$0xff]   ;;  %v1411_v34 = vld [vmem:[%s1827_s1 + $0xd8] sm:$0xff]  }
   0xc   :  { %1360 = vmatprep.subr.bf16.mxu1 %v1381_v6  ;;  %1188 = vmatprep.subr.bf16.mxu0 %v1381_v6  ;;  %v1409_v26 = vld [vmem:[%s1828_s0 + $0xcc] ss:$20 sps:$4 sm:$0xff]   ;;  %v1408_v33 = vld [vmem:[%s1827_s1 + $0x110] sm:$0xff]   ;;  %v1413_v37 = vld [vmem:[%s1827_s1 + $0x98] sm:$0xff]  }
   0xd   :  { %v1416_v35 = vld [vmem:[%s1828_s0 + $0x54] ss:$20 sps:$4 sm:$0xff]   ;;  %v1414_v38 = vld [vmem:[%s1827_s1 + $0x118] sm:$0xff]   ;;  %v1415_v39 = vld [vmem:[%s1827_s1 + $0xe0] sm:$0xff]  }
   0xe   :  { %v1421_v36 = vld [vmem:[%s1828_s0 + $0xf4] ss:$20 sps:$4 sm:$0xff]   ;;  %v1418_v40 = vld [vmem:[%s1827_s1 + $0xa0] sm:$0xff]   ;;  %v1428_v45 = vld [vmem:[%s1828_s0 + $0x7c] ss:$20 sps:$4 sm:$0xff]  }
   0xf   :  { %1368 = vmatpush3.bf16.msra.mxu1 %v1382_v7  ;;  %1189 = vmatpush3.bf16.msra.mxu0 %v1382_v7  ;;  %v1424_v42 = vld [vmem:[%s1828_s0 + $0xf0] ss:$20 sps:$4 sm:$0xff]   ;;  %v1423_v44 = vld [vmem:[%s1827_s1 + $0xe8] sm:$0xff]   ;;  %v1433_v53 = vld [vmem:[%s1827_s1 + $0xf8] sm:$0xff]  }
  0x10   :  { %1361 = vmatprep.subr.bf16.mxu1 %v1383_v8  ;;  %1190 = vmatprep.subr.bf16.mxu0 %v1383_v8  ;;  %v1420_v43 = vld [vmem:[%s1827_s1 + $0x120] sm:$0xff]   ;;  %v1425_v47 = vld [vmem:[%s1827_s1 + $0xa8] sm:$0xff]   ;;  %v1427_v49 = vld [vmem:[%s1827_s1 + $0xf0] sm:$0xff]  }
  0x11   :  { %v1437_v46 = vld [vmem:[%s1828_s0 + $0xc] ss:$20 sps:$4 sm:$0xff]   ;;  %v1430_v50 = vld [vmem:[%s1827_s1 + $0xb0] sm:$0xff]   ;;  %v1434_v54 = vld [vmem:[%s1827_s1 + $0xb8] sm:$0xff]  }
  0x12   :  { %v1426_v48 = vld [vmem:[%s1827_s1 + $0x128] sm:$0xff]   ;;  %v1432_v52 = vld [vmem:[%s1827_s1 + $0x130] sm:$0xff]   ;;  %v1438_v55 = vld [vmem:[%s1827_s1 + $0x138] sm:$0xff]  }
  0x13   :  { %1369 = vmatpush3.bf16.msra.mxu1 %v1384_v9  ;;  %1191 = vmatpush3.bf16.msra.mxu0 %v1384_v9  ;;  %v1431_v51 = vld [vmem:[%s1828_s0 + $0x78] ss:$20 sps:$4 sm:$0xff]   ;;  %v1435_v56 = vld [vmem:[%s1828_s0 + $0x8] ss:$20 sps:$4 sm:$0xff]   ;;  %v1439_v57 = vld [vmem:[%s1828_s0 + $0x10] ss:$20 sps:$4 sm:$0xff]  }
  0x14   :  { %1362 = vmatprep.subr.bf16.mxu1 %v1385_v10  ;;  %1192 = vmatprep.subr.bf16.mxu0 %v1385_v10  ;;  %v1440_v58 = vld [vmem:[%s1828_s0 + $0x34] ss:$20 sps:$4 sm:$0xff]   ;;  %v1442_v59 = vld [vmem:[%s1828_s0 + $0x30] ss:$20 sps:$4 sm:$0xff]   ;;  %v1443_v60 = vld [vmem:[%s1828_s0 + $0x38] ss:$20 sps:$4 sm:$0xff]  }
  0x15   :  { %v1444_v61 = vld [vmem:[%s1828_s0 + $0x5c] ss:$20 sps:$4 sm:$0xff]   ;;  %v1446_v62 = vld [vmem:[%s1828_s0 + $0x58] ss:$20 sps:$4 sm:$0xff]   ;;  %v1447_v63 = vld [vmem:[%s1828_s0 + $0x60] ss:$20 sps:$4 sm:$0xff]  }
  0x16   :  { %v1448_v0 = vld [vmem:[%s1828_s0 + $0x84] ss:$20 sps:$4 sm:$0xff]   ;;  %v1450_v1 = vld [vmem:[%s1828_s0 + $0x80] ss:$20 sps:$4 sm:$0xff]   ;;  %v1451_v2 = vld [vmem:[%s1828_s0 + $0x88] ss:$20 sps:$4 sm:$0xff]  }
  0x17   :  { %1370 = vmatpush3.bf16.msra.mxu1 %v1386_v12  ;;  %1193 = vmatpush3.bf16.msra.mxu0 %v1386_v12  ;;  %v1452_v3 = vld [vmem:[%s1828_s0 + $0xac] ss:$20 sps:$4 sm:$0xff]   ;;  %v1454_v4 = vld [vmem:[%s1828_s0 + $0xa8] ss:$20 sps:$4 sm:$0xff]   ;;  %v1455_v5 = vld [vmem:[%s1828_s0 + $0xb0] ss:$20 sps:$4 sm:$0xff]  }
  0x18   :  { %1363 = vmatprep.subr.bf16.mxu1 %v1387_v14  ;;  %1194 = vmatprep.subr.bf16.mxu0 %v1387_v14  ;;  %v1456_v6 = vld [vmem:[%s1828_s0 + $0xd4] ss:$20 sps:$4 sm:$0xff]   ;;  %v1458_v7 = vld [vmem:[%s1828_s0 + $0xd0] ss:$20 sps:$4 sm:$0xff]   ;;  %v1459_v8 = vld [vmem:[%s1828_s0 + $0xd8] ss:$20 sps:$4 sm:$0xff]  }
  0x19   :  { %v1460_v9 = vld [vmem:[%s1828_s0 + $0xfc] ss:$20 sps:$4 sm:$0xff]   ;;  %v1462_v10 = vld [vmem:[%s1828_s0 + $0xf8] ss:$20 sps:$4 sm:$0xff]   ;;  %v1463_v11 = vld [vmem:[%s1828_s0 + $0x100] ss:$20 sps:$4 sm:$0xff]  }
  0x1b   :  { %1371 = vmatpush3.bf16.msra.mxu1 %v1388_v15  ;;  %1195 = vmatpush3.bf16.msra.mxu0 %v1388_v15 }
  0x1c   :  { %1364 = vmatprep.subr.bf16.mxu1 %v1389_v16  ;;  %1196 = vmatprep.subr.bf16.mxu0 %v1389_v16 }
  0x1f   :  { %1372 = vmatpush3.bf16.msra.mxu1 %v1390_v17  ;;  %1197 = vmatpush3.bf16.msra.mxu0 %v1390_v17 }
  0x20   :  { %1240 = vmatprep.subr.bf16.mxu1 %v1394_v18  ;;  %1313 = vmatprep.subr.bf16.mxu0 %v1464_v24 }
  0x22   :  { %659 = vmatmul.mubr.bf16.vlgmr.msra.gmra.mrb[0].mxu1 %v1391_v19  ;;  %627 = vmatmul.mubr.bf16.vlgmr.msra.gmra.mrb[0].mxu0 %v1395_v20 }
  0x23   :  { %1241 = vmatpush3.bf16.msra.mxu1 %v1398_v21  ;;  %1314 = vmatpush3.bf16.msra.mxu0 %v1399_v22 }
  0x24   :  { %1242 = vmatprep.subr.bf16.mxu1 %v1400_v23  ;;  %1315 = vmatprep.subr.bf16.mxu0 %v1464_v24 }
  0x25   :  { %634 = vmatprep.mubr.bf16.mxu0 %v1404_v25  ;;  %666 = vmatprep.mubr.bf16.mxu1 %v1409_v26 }
  0x27   :  { %1243 = vmatpush3.bf16.msra.mxu1 %v1401_v27  ;;  %1316 = vmatpush3.bf16.msra.mxu0 %v1402_v28 }
  0x28   :  { %1244 = vmatprep.subr.bf16.mxu1 %v1403_v29  ;;  %1317 = vmatprep.subr.bf16.mxu0 %v1464_v24 }
  0x2a   :  { %635 = vmatmul.mubr.bf16.gmra.mrb[4].mxu0 %v1407_v31  ;;  %667 = vmatmul.mubr.bf16.gmra.mrb[4].mxu1 %v1412_v32 }
  0x2b   :  { %1245 = vmatpush3.bf16.msra.mxu1 %v1406_v30  ;;  %1318 = vmatpush3.bf16.msra.mxu0 %v1408_v33 }
  0x2c   :  { %1246 = vmatprep.subr.bf16.mxu1 %v1411_v34  ;;  %1319 = vmatprep.subr.bf16.mxu0 %v1464_v24 }
  0x2d   :  { %642 = vmatprep.mubr.bf16.mxu0 %v1416_v35  ;;  %674 = vmatprep.mubr.bf16.mxu1 %v1421_v36 }
  0x2f   :  { %1247 = vmatpush3.bf16.msra.mxu1 %v1413_v37  ;;  %1320 = vmatpush3.bf16.msra.mxu0 %v1414_v38 }
  0x30   :  { %1248 = vmatprep.subr.bf16.mxu1 %v1415_v39  ;;  %1321 = vmatprep.subr.bf16.mxu0 %v1464_v24 }
  0x32   :  { %643 = vmatmul.mubr.bf16.gmra.mrb[8].mxu0 %v1419_v41  ;;  %675 = vmatmul.mubr.bf16.gmra.mrb[8].mxu1 %v1424_v42 }
  0x33   :  { %1249 = vmatpush3.bf16.msra.mxu1 %v1418_v40  ;;  %1322 = vmatpush3.bf16.msra.mxu0 %v1420_v43 }
  0x34   :  { %1250 = vmatprep.subr.bf16.mxu1 %v1423_v44  ;;  %1323 = vmatprep.subr.bf16.mxu0 %v1464_v24 }
  0x35   :  { %650 = vmatprep.mubr.bf16.mxu0 %v1428_v45  ;;  %715 = vmatprep.mubr.bf16.mxu1 %v1437_v46 }
  0x37   :  { %1251 = vmatpush3.bf16.msra.mxu1 %v1425_v47  ;;  %1324 = vmatpush3.bf16.msra.mxu0 %v1426_v48 }
  0x38   :  { %1252 = vmatprep.subr.bf16.mxu1 %v1427_v49  ;;  %1325 = vmatprep.subr.bf16.mxu0 %v1464_v24 }
  0x3a   :  { %651 = vmatmul.mubr.bf16.gmra.mrb[12].mxu0 %v1431_v51 }
  0x3b   :  { %1253 = vmatpush3.bf16.msra.mxu1 %v1430_v50  ;;  %1326 = vmatpush3.bf16.msra.mxu0 %v1432_v52 }
  0x3c   :  { %1254 = vmatprep.subr.bf16.mxu1 %v1433_v53  ;;  %1327 = vmatprep.subr.bf16.mxu0 %v1464_v24 }
  0x3d   :  { %1329 = vmatprep.mubr.msk.bf16.mxu0 %vm1465_vm0, %v1464_v24 }
  0x3f   :  { %1255 = vmatpush3.bf16.msra.mxu1 %v1434_v54  ;;  %1328 = vmatpush3.bf16.msra.mxu0 %v1438_v55 }
  0x42   :  { %716 = vmatmul.mubr.bf16.vlgmr.msra.gmra.mrb[12].mxu1 %v1435_v56  ;;  %1330 = vmatmul.mubr.bf16.vlgmr.msra.gmra.mrb[16].mxu0 %v1439_v57 }
  0x43   :  { %723 = vmatprep.mubr.bf16.mxu1 %v1440_v58  ;;  %1333 = vmatprep.mubr.msk.bf16.mxu0 %vm1465_vm0, %v1464_v24 }
  0x4a   :  { %724 = vmatmul.mubr.bf16.gmra.mrb[16].mxu1 %v1442_v59  ;;  %1334 = vmatmul.mubr.bf16.gmra.mrb[20].mxu0 %v1443_v60 }
  0x4b   :  { %731 = vmatprep.mubr.bf16.mxu1 %v1444_v61  ;;  %1337 = vmatprep.mubr.msk.bf16.mxu0 %vm1465_vm0, %v1464_v24 }
  0x52   :  { %732 = vmatmul.mubr.bf16.gmra.mrb[20].mxu1 %v1446_v62  ;;  %1338 = vmatmul.mubr.bf16.gmra.mrb[24].mxu0 %v1447_v63 }
  0x53   :  { %739 = vmatprep.mubr.bf16.mxu1 %v1448_v0  ;;  %1341 = vmatprep.mubr.msk.bf16.mxu0 %vm1465_vm0, %v1464_v24 }
  0x5a   :  { %740 = vmatmul.mubr.bf16.gmra.mrb[24].mxu1 %v1450_v1  ;;  %1342 = vmatmul.mubr.bf16.gmra.mrb[28].mxu0 %v1451_v2  ;;  %v1761_v1 = vld [vmem:[%s1829_s2] ss:$0 sm:$0xff] }
  0x5b   :  { %747 = vmatprep.mubr.bf16.mxu1 %v1452_v3  ;;  %1345 = vmatprep.mubr.msk.bf16.mxu0 %vm1465_vm0, %v1464_v24 }
  0x62   :  { %748 = vmatmul.mubr.bf16.gmra.mrb[28].mxu1 %v1454_v4  ;;  %1346 = vmatmul.mubr.bf16.gmra.mrb[32].mxu0 %v1455_v5  ;;  %v1766_v4 = vld [vmem:[%s1830_s3] ss:$0 sm:$0xff] }
  0x63   :  { %755 = vmatprep.mubr.bf16.mxu1 %v1456_v6  ;;  %1349 = vmatprep.mubr.msk.bf16.mxu0 %vm1465_vm0, %v1464_v24 }
  0x6a   :  { %756 = vmatmul.mubr.bf16.gmra.mrb[32].mxu1 %v1458_v7  ;;  %1350 = vmatmul.mubr.bf16.gmra.mrb[36].mxu0 %v1459_v8 }
  0x6b   :  { %763 = vmatprep.mubr.bf16.mxu1 %v1460_v9  ;;  %1353 = vmatprep.mubr.msk.bf16.mxu0 %vm1465_vm0, %v1464_v24 }
  0x72   :  { %764 = vmatmul.mubr.bf16.gmra.mrb[36].mxu1 %v1462_v10  ;;  %1354 = vmatmul.mubr.bf16.gmra.mrb[40].mxu0 %v1463_v11 }
  0xf5   :  { %v1222_v12 = vpop.f32.mrb[0].mxu1  ;;  %v1198_v13 = vpop.f32.mrb[0].mxu0 }
  0xf6   :  { %v1223_v14 = vpop.f32.mrb[1].mxu1  ;;  %v1199_v15 = vpop.f32.mrb[1].mxu0 }
  0xf7   :  { %v1738_v16 = vadd.f32 %v1223_v14, %v1222_v12  ;;  %v1225_v17 = vpop.f32.mrb[2].mxu1  ;;  %v1200_v18 = vadd.f32 %v1199_v15, %v1198_v13  ;;  %v1201_v19 = vpop.f32.mrb[2].mxu0 }
  0xf8   :  { %v1226_v20 = vpop.f32.mrb[3].mxu1  ;;  %v1202_v21 = vpop.f32.mrb[3].mxu0 }
  0xf9   :  { %v1740_v22 = vadd.f32 %v1226_v20, %v1225_v17  ;;  %v1203_v23 = vadd.f32 %v1202_v21, %v1201_v19 }
  0xfd   :  { %v1204_v24 = vpop.f32.mrb[4].mxu0  ;;  %v1228_v25 = vpop.f32.mrb[4].mxu1 }
  0xfe   :  { %v1205_v26 = vpop.f32.mrb[5].mxu0  ;;  %v1229_v27 = vpop.f32.mrb[5].mxu1 }
  0xff   :  { %v1206_v28 = vadd.f32 %v1205_v26, %v1204_v24  ;;  %v1207_v29 = vpop.f32.mrb[6].mxu0  ;;  %v1742_v30 = vadd.f32 %v1229_v27, %v1228_v25  ;;  %v1231_v31 = vpop.f32.mrb[6].mxu1 }
 0x100   :  { %v1208_v32 = vpop.f32.mrb[7].mxu0  ;;  %v1232_v33 = vpop.f32.mrb[7].mxu1 }
 0x101   :  { %v1209_v34 = vadd.f32 %v1208_v32, %v1207_v29  ;;  %v1744_v35 = vadd.f32 %v1232_v33, %v1231_v31 }
 0x105   :  { %v1210_v36 = vpop.f32.mrb[8].mxu0  ;;  %v1234_v37 = vpop.f32.mrb[8].mxu1 }
 0x106   :  { %v1211_v38 = vpop.f32.mrb[9].mxu0  ;;  %v1235_v39 = vpop.f32.mrb[9].mxu1 }
 0x107   :  { %v1746_v40 = vadd.f32 %v1211_v38, %v1210_v36  ;;  %v1213_v41 = vpop.f32.mrb[10].mxu0  ;;  %v1748_v42 = vadd.f32 %v1235_v39, %v1234_v37  ;;  %v1237_v43 = vpop.f32.mrb[10].mxu1 }
 0x108   :  { %v1214_v44 = vpop.f32.mrb[11].mxu0  ;;  %v1238_v45 = vpop.f32.mrb[11].mxu1 }
 0x109   :  { %v1750_v46 = vadd.f32 %v1214_v44, %v1213_v41  ;;  %v1752_v47 = vadd.f32 %v1238_v45, %v1237_v43 }
 0x10d   :  { %v1216_v48 = vpop.f32.mrb[12].mxu0 }
 0x10e   :  { %v1217_v49 = vpop.f32.mrb[13].mxu0 }
 0x10f   :  { %v1754_v50 = vadd.f32 %v1217_v49, %v1216_v48  ;;  %v1219_v51 = vpop.f32.mrb[14].mxu0 }
 0x110   :  { %v1220_v52 = vpop.f32.mrb[15].mxu0 }
 0x111   :  { %v1756_v53 = vadd.f32 %v1220_v52, %v1219_v51 }
 0x115   :  { %v1256_v54 = vpop.f32.mrb[12].mxu1  ;;  %v806_v55 = vpop.f32.mrb[16].mxu0 }
 0x116   :  { %v1257_v56 = vpop.f32.mrb[13].mxu1  ;;  %v1331_v57 = vpop.f32.mrb[17].mxu0 }
 0x117   :  { %v1258_v58 = vadd.f32 %v1257_v56, %v1256_v54  ;;  %v1259_v59 = vpop.f32.mrb[14].mxu1  ;;  %v809_v60 = vpop.f32.mrb[18].mxu0 }
 0x118   :  { %v1260_v61 = vpop.f32.mrb[15].mxu1  ;;  %v1332_v62 = vpop.f32.mrb[19].mxu0 }
 0x119   :  { %v718_v63 = vadd.f32 %v1258_v58, %v1200_v18  ;;  %v1261_v0 = vadd.f32 %v1260_v61, %v1259_v59 }
 0x11b   :  { %v807_v2 = vadd.f32 %v806_v55, %v718_v63  ;;  %v721_v3 = vadd.f32 %v1261_v0, %v1203_v23 }
 0x11d   :  { %v913_v5 = vmul.f32 %v1761_v1, %v807_v2  ;;  %v810_v6 = vadd.f32 %v809_v60, %v721_v3  ;;  %v1262_v7 = vpop.f32.mrb[16].mxu1  ;;  %v814_v8 = vpop.f32.mrb[20].mxu0 }
 0x11e   :  { %v1263_v9 = vpop.f32.mrb[17].mxu1  ;;  %v1335_v10 = vpop.f32.mrb[21].mxu0 }
 0x11f   :  { %v934_v11 = vadd.f32 %v1766_v4, %v913_v5  ;;  %v914_v12 = vmul.f32 %v1761_v1, %v810_v6  ;;  %v1264_v13 = vadd.f32 %v1263_v9, %v1262_v7  ;;  %v1265_v14 = vpop.f32.mrb[18].mxu1  ;;  %v817_v15 = vpop.f32.mrb[22].mxu0 }
 0x120   :  { %v1266_v17 = vpop.f32.mrb[19].mxu1  ;;  %v1336_v18 = vpop.f32.mrb[23].mxu0 }
 0x121   :  { %v935_v19 = vadd.f32 %v1766_v4, %v914_v12  ;;  %v726_v20 = vadd.f32 %v1264_v13, %v1206_v28  ;;  %v1267_v21 = vadd.f32 %v1266_v17, %v1265_v14  ;;  %v948_v23 = vmax.f32 %v934_v11, 0.0 }
 0x123   :  { %v949_v24 = vmax.f32 %v935_v19, 0.0  ;;  %v815_v25 = vadd.f32 %v814_v8, %v726_v20  ;;  %v729_v26 = vadd.f32 %v1267_v21, %v1209_v34 }
 0x125   :  { %v1144_v27 = vpack.c.bf16 %v949_v24, %v948_v23  ;;  %v915_v29 = vmul.f32 %v1761_v1, %v815_v25  ;;  %v818_v31 = vadd.f32 %v817_v15, %v729_v26  ;;  %v1268_v32 = vpop.f32.mrb[20].mxu1  ;;  %v822_v33 = vpop.f32.mrb[24].mxu0 }
 0x126   :  { %v1269_v36 = vpop.f32.mrb[21].mxu1  ;;  %v1339_v37 = vpop.f32.mrb[25].mxu0 }
 0x127   :  { %1145 = vst [vmem:[%s1831_s4] sm:$0xff] %v1144_v27   ;;  %v936_v38 = vadd.f32 %v1766_v4, %v915_v29  ;;  %v916_v28 = vmul.f32 %v1761_v1, %v818_v31  ;;  %v1270_v39 = vadd.f32 %v1269_v36, %v1268_v32  ;;  %v1271_v41 = vpop.f32.mrb[22].mxu1  ;;  %v825_v43 = vpop.f32.mrb[26].mxu0 }
 0x128   :  { %v1272_v34 = vpop.f32.mrb[23].mxu1  ;;  %v1340_v44 = vpop.f32.mrb[27].mxu0 }
 0x129   :  { %v937_v45 = vadd.f32 %v1766_v4, %v916_v28  ;;  %v734_v48 = vadd.f32 %v1270_v39, %v1746_v40  ;;  %v1273_v49 = vadd.f32 %v1272_v34, %v1271_v41  ;;  %v950_v51 = vmax.f32 %v936_v38, 0.0 }
 0x12b   :  { %v951_v52 = vmax.f32 %v937_v45, 0.0  ;;  %v823_v54 = vadd.f32 %v822_v33, %v734_v48  ;;  %v737_v55 = vadd.f32 %v1273_v49, %v1750_v46 }
 0x12d   :  { %v1149_v56 = vpack.c.bf16 %v951_v52, %v950_v51  ;;  %v917_v57 = vmul.f32 %v1761_v1, %v823_v54  ;;  %v826_v58 = vadd.f32 %v825_v43, %v737_v55  ;;  %v1274_v59 = vpop.f32.mrb[24].mxu1  ;;  %v830_v60 = vpop.f32.mrb[28].mxu0 }
 0x12e   :  { %v1275_v61 = vpop.f32.mrb[25].mxu1  ;;  %v1343_v62 = vpop.f32.mrb[29].mxu0 }
 0x12f   :  { %1176 = vst [vmem:[%s1831_s4 + $0x8] sm:$0xff] %v1149_v56   ;;  %v938_v40 = vadd.f32 %v1766_v4, %v917_v57  ;;  %v918_v63 = vmul.f32 %v1761_v1, %v826_v58  ;;  %v1276_v0 = vadd.f32 %v1275_v61, %v1274_v59  ;;  %v1277_v2 = vpop.f32.mrb[26].mxu1  ;;  %v833_v3 = vpop.f32.mrb[30].mxu0 }
 0x130   :  { %v1278_v46 = vpop.f32.mrb[27].mxu1  ;;  %v1344_v5 = vpop.f32.mrb[31].mxu0 }
 0x131   :  { %v939_v6 = vadd.f32 %v1766_v4, %v918_v63  ;;  %v742_v7 = vadd.f32 %v1276_v0, %v1754_v50  ;;  %v1279_v8 = vadd.f32 %v1278_v46, %v1277_v2  ;;  %v952_v9 = vmax.f32 %v938_v40, 0.0 }
 0x133   :  { %v953_v10 = vmax.f32 %v939_v6, 0.0  ;;  %v831_v11 = vadd.f32 %v830_v60, %v742_v7  ;;  %v745_v12 = vadd.f32 %v1279_v8, %v1756_v53 }
 0x135   :  { %v1154_v13 = vpack.c.bf16 %v953_v10, %v952_v9  ;;  %v919_v14 = vmul.f32 %v1761_v1, %v831_v11  ;;  %v834_v15 = vadd.f32 %v833_v3, %v745_v12  ;;  %v1280_v17 = vpop.f32.mrb[28].mxu1  ;;  %v838_v18 = vpop.f32.mrb[32].mxu0 }
 0x136   :  { %v1281_v19 = vpop.f32.mrb[29].mxu1  ;;  %v1347_v20 = vpop.f32.mrb[33].mxu0 }
 0x137   :  { %1177 = vst [vmem:[%s1831_s4 + $0x10] sm:$0xff] %v1154_v13   ;;  %v940_v50 = vadd.f32 %v1766_v4, %v919_v14  ;;  %v920_v21 = vmul.f32 %v1761_v1, %v834_v15  ;;  %v1282_v23 = vadd.f32 %v1281_v19, %v1280_v17  ;;  %v1283_v24 = vpop.f32.mrb[30].mxu1  ;;  %v841_v25 = vpop.f32.mrb[34].mxu0 }
 0x138   :  { %v1284_v53 = vpop.f32.mrb[31].mxu1  ;;  %v1348_v26 = vpop.f32.mrb[35].mxu0 }
 0x139   :  { %v941_v27 = vadd.f32 %v1766_v4, %v920_v21  ;;  %v750_v29 = vadd.f32 %v1282_v23, %v1738_v16  ;;  %v1285_v31 = vadd.f32 %v1284_v53, %v1283_v24  ;;  %v954_v32 = vmax.f32 %v940_v50, 0.0 }
 0x13b   :  { %v955_v33 = vmax.f32 %v941_v27, 0.0  ;;  %v839_v36 = vadd.f32 %v838_v18, %v750_v29  ;;  %v753_v37 = vadd.f32 %v1285_v31, %v1740_v22 }
 0x13d   :  { %v1159_v38 = vpack.c.bf16 %v955_v33, %v954_v32  ;;  %v921_v28 = vmul.f32 %v1761_v1, %v839_v36  ;;  %v842_v39 = vadd.f32 %v841_v25, %v753_v37  ;;  %v1286_v41 = vpop.f32.mrb[32].mxu1  ;;  %v846_v43 = vpop.f32.mrb[36].mxu0 }
 0x13e   :  { %v1287_v34 = vpop.f32.mrb[33].mxu1  ;;  %v1351_v44 = vpop.f32.mrb[37].mxu0 }
 0x13f   :  { %1178 = vst [vmem:[%s1831_s4 + $0x18] sm:$0xff] %v1159_v38   ;;  %v942_v16 = vadd.f32 %v1766_v4, %v921_v28  ;;  %v922_v45 = vmul.f32 %v1761_v1, %v842_v39  ;;  %v1288_v48 = vadd.f32 %v1287_v34, %v1286_v41  ;;  %v1289_v49 = vpop.f32.mrb[34].mxu1  ;;  %v849_v51 = vpop.f32.mrb[38].mxu0 }
 0x140   :  { %v1290_v22 = vpop.f32.mrb[35].mxu1  ;;  %v1352_v52 = vpop.f32.mrb[39].mxu0 }
 0x141   :  { %v943_v54 = vadd.f32 %v1766_v4, %v922_v45  ;;  %v758_v55 = vadd.f32 %v1288_v48, %v1742_v30  ;;  %v1291_v56 = vadd.f32 %v1290_v22, %v1289_v49  ;;  %v956_v57 = vmax.f32 %v942_v16, 0.0 }
 0x143   :  { %v957_v58 = vmax.f32 %v943_v54, 0.0  ;;  %v847_v59 = vadd.f32 %v846_v43, %v758_v55  ;;  %v761_v60 = vadd.f32 %v1291_v56, %v1744_v35 }
 0x145   :  { %v1164_v61 = vpack.c.bf16 %v957_v58, %v956_v57  ;;  %v923_v62 = vmul.f32 %v1761_v1, %v847_v59  ;;  %v850_v40 = vadd.f32 %v849_v51, %v761_v60  ;;  %v1292_v63 = vpop.f32.mrb[36].mxu1  ;;  %v854_v0 = vpop.f32.mrb[40].mxu0 }
 0x146   :  { %v1293_v2 = vpop.f32.mrb[37].mxu1  ;;  %v1355_v3 = vpop.f32.mrb[41].mxu0 }
 0x147   :  { %1179 = vst [vmem:[%s1831_s4 + $0x20] sm:$0xff] %v1164_v61   ;;  %v944_v30 = vadd.f32 %v1766_v4, %v923_v62  ;;  %v924_v46 = vmul.f32 %v1761_v1, %v850_v40  ;;  %v1294_v5 = vadd.f32 %v1293_v2, %v1292_v63  ;;  %v1295_v6 = vpop.f32.mrb[38].mxu1  ;;  %v857_v7 = vpop.f32.mrb[42].mxu0 }
 0x148   :  { %v1296_v35 = vpop.f32.mrb[39].mxu1  ;;  %v1356_v8 = vpop.f32.mrb[43].mxu0 }
 0x149   :  { %v945_v9 = vadd.f32 %v1766_v4, %v924_v46  ;;  %v766_v10 = vadd.f32 %v1294_v5, %v1748_v42  ;;  %v1297_v11 = vadd.f32 %v1296_v35, %v1295_v6  ;;  %v958_v12 = vmax.f32 %v944_v30, 0.0 }
 0x14b   :  { %v959_v13 = vmax.f32 %v945_v9, 0.0  ;;  %v855_v14 = vadd.f32 %v854_v0, %v766_v10  ;;  %v769_v15 = vadd.f32 %v1297_v11, %v1752_v47 }
 0x14d   :  { %v1169_v17 = vpack.c.bf16 %v959_v13, %v958_v12  ;;  %v925_v18 = vmul.f32 %v1761_v1, %v855_v14  ;;  %v858_v19 = vadd.f32 %v857_v7, %v769_v15 }
 0x14f   :  { %1180 = vst [vmem:[%s1831_s4 + $0x28] sm:$0xff] %v1169_v17   ;;  %v946_v20 = vadd.f32 %v1766_v4, %v925_v18  ;;  %v926_v50 = vmul.f32 %v1761_v1, %v858_v19 }
 0x151   :  { %v947_v42 = vadd.f32 %v1766_v4, %v926_v50  ;;  %v960_v21 = vmax.f32 %v946_v20, 0.0 }
 0x153   :  { %v961_v23 = vmax.f32 %v947_v42, 0.0 }
 0x155   :  { %v1174_v24 = vpack.c.bf16 %v961_v23, %v960_v21 }
 0x157   :  { %1181 = vst [vmem:[%s1831_s4 + $0x30] sm:$0xff] %v1174_v24  }

// kernel: enhanced_cnn_forward.7
= control target key start
LH: loop header
LB: loop body
LE: loop exit
PB: predicated region body
PF: predicated region fallthrough
CT: control target
= control target key end

     0   :  { %vm1985_vm0 = vmmov 0   ;;  %s2572_s1 = inlined_call_operand.vmem [shape: bf16[1152,256], index: 1, kind: input, shape index: {}]   ;;  %s2573_s0 = inlined_call_operand.vmem [shape: bf16[16,1152], index: 0, kind: input, shape index: {}]   ;;  %s2574_s3 = inlined_call_operand.vmem [shape: bf16[256,128], index: 3, kind: input, shape index: {}]   ;;  %s2575_s5 = inlined_call_operand.vmem [shape: bf16[128,128], index: 5, kind: input, shape index: {}]   ;;  %s2576_s2 = inlined_call_operand.vmem [shape: f32[1,256], index: 2, kind: input, shape index: {}]   ;;  %s2577_s4 = inlined_call_operand.vmem [shape: f32[1,128], index: 4, kind: input, shape index: {}]   ;;  %s2578_s6 = inlined_call_operand.vmem [shape: f32[1,128], index: 6, kind: input, shape index: {}]   ;;  %s2579_s7 = inlined_call_operand.vmem [shape: f32[16,128], index: 7, kind: output, shape index: {}]  }
   0x1   :  { %v1730_v0 = vld [vmem:[%s2572_s1 + $0x4] ss:$8 sps:$4 sm:$0xff]   ;;  %v1734_v2 = vld [vmem:[%s2572_s1] ss:$8 sps:$4 sm:$0xff]   ;;  %v1736_v4 = vld [vmem:[%s2572_s1 + $0x14] ss:$8 sps:$4 sm:$0xff]  }
   0x2   :  { %v1732_v1 = vld [vmem:[%s2572_s1 + $0x204] ss:$8 sps:$4 sm:$0xff]   ;;  %959 = vmatprep.subr.bf16.mxu1 %v1730_v0  ;;  %v1735_v3 = vld [vmem:[%s2572_s1 + $0x200] ss:$8 sps:$4 sm:$0xff]   ;;  %v1738_v5 = vld [vmem:[%s2572_s1 + $0x214] ss:$8 sps:$4 sm:$0xff]  }
   0x3   :  { %1045 = vmatprep.subr.bf16.mxu0 %v1732_v1  ;;  %960 = vmatpush1.bf16.msra.mxu1 %v1734_v2  ;;  %v1740_v6 = vld [vmem:[%s2572_s1 + $0x10] ss:$8 sps:$4 sm:$0xff]   ;;  %v1742_v8 = vld [vmem:[%s2572_s1 + $0x24] ss:$8 sps:$4 sm:$0xff]   ;;  %v1746_v10 = vld [vmem:[%s2572_s1 + $0x20] ss:$8 sps:$4 sm:$0xff]  }
   0x4   :  { %1046 = vmatpush1.bf16.msra.mxu0 %v1735_v3  ;;  %961 = vmatprep.subr.bf16.mxu1 %v1736_v4  ;;  %v1741_v7 = vld [vmem:[%s2572_s1 + $0x210] ss:$8 sps:$4 sm:$0xff]   ;;  %v1744_v9 = vld [vmem:[%s2572_s1 + $0x224] ss:$8 sps:$4 sm:$0xff]   ;;  %v1747_v11 = vld [vmem:[%s2572_s1 + $0x220] ss:$8 sps:$4 sm:$0xff]  }
   0x5   :  { %1047 = vmatprep.subr.bf16.mxu0 %v1738_v5  ;;  %v1748_v12 = vld [vmem:[%s2572_s1 + $0x34] ss:$8 sps:$4 sm:$0xff]   ;;  %v1752_v14 = vld [vmem:[%s2572_s1 + $0x30] ss:$8 sps:$4 sm:$0xff]   ;;  %v1754_v16 = vld [vmem:[%s2572_s1 + $0x44] ss:$8 sps:$4 sm:$0xff]  }
   0x6   :  { %v1750_v13 = vld [vmem:[%s2572_s1 + $0x234] ss:$8 sps:$4 sm:$0xff]   ;;  %v1753_v15 = vld [vmem:[%s2572_s1 + $0x230] ss:$8 sps:$4 sm:$0xff]   ;;  %v1756_v17 = vld [vmem:[%s2572_s1 + $0x244] ss:$8 sps:$4 sm:$0xff]  }
   0x7   :  { %962 = vmatpush1.bf16.msra.mxu1 %v1740_v6  ;;  %v1758_v18 = vld [vmem:[%s2572_s1 + $0x40] ss:$8 sps:$4 sm:$0xff]   ;;  %v1760_v20 = vld [vmem:[%s2572_s1 + $0x54] ss:$8 sps:$4 sm:$0xff]   ;;  %v1764_v22 = vld [vmem:[%s2572_s1 + $0x50] ss:$8 sps:$4 sm:$0xff]  }
   0x8   :  { %1048 = vmatpush1.bf16.msra.mxu0 %v1741_v7  ;;  %963 = vmatprep.subr.bf16.mxu1 %v1742_v8  ;;  %v1759_v19 = vld [vmem:[%s2572_s1 + $0x240] ss:$8 sps:$4 sm:$0xff]   ;;  %v1762_v21 = vld [vmem:[%s2572_s1 + $0x254] ss:$8 sps:$4 sm:$0xff]   ;;  %v1765_v23 = vld [vmem:[%s2572_s1 + $0x250] ss:$8 sps:$4 sm:$0xff]  }
   0x9   :  { %1049 = vmatprep.subr.bf16.mxu0 %v1744_v9  ;;  %v1766_v24 = vld [vmem:[%s2572_s1 + $0x64] ss:$8 sps:$4 sm:$0xff]   ;;  %v1770_v26 = vld [vmem:[%s2572_s1 + $0x60] ss:$8 sps:$4 sm:$0xff]   ;;  %v1772_v28 = vld [vmem:[%s2572_s1 + $0x74] ss:$8 sps:$4 sm:$0xff]  }
   0xa   :  { %v1768_v25 = vld [vmem:[%s2572_s1 + $0x264] ss:$8 sps:$4 sm:$0xff]   ;;  %v1771_v27 = vld [vmem:[%s2572_s1 + $0x260] ss:$8 sps:$4 sm:$0xff]   ;;  %v1774_v29 = vld [vmem:[%s2572_s1 + $0x274] ss:$8 sps:$4 sm:$0xff]  }
   0xb   :  { %964 = vmatpush1.bf16.msra.mxu1 %v1746_v10  ;;  %v1776_v30 = vld [vmem:[%s2572_s1 + $0x70] ss:$8 sps:$4 sm:$0xff]   ;;  %v1778_v32 = vld [vmem:[%s2572_s1 + $0x84] ss:$8 sps:$4 sm:$0xff]   ;;  %v1782_v34 = vld [vmem:[%s2572_s1 + $0x80] ss:$8 sps:$4 sm:$0xff]  }
   0xc   :  { %1050 = vmatpush1.bf16.msra.mxu0 %v1747_v11  ;;  %965 = vmatprep.subr.bf16.mxu1 %v1748_v12  ;;  %v1777_v31 = vld [vmem:[%s2572_s1 + $0x270] ss:$8 sps:$4 sm:$0xff]   ;;  %v1780_v33 = vld [vmem:[%s2572_s1 + $0x284] ss:$8 sps:$4 sm:$0xff]   ;;  %v1783_v35 = vld [vmem:[%s2572_s1 + $0x280] ss:$8 sps:$4 sm:$0xff]  }
   0xd   :  { %1051 = vmatprep.subr.bf16.mxu0 %v1750_v13  ;;  %v1784_v36 = vld [vmem:[%s2572_s1 + $0x94] ss:$8 sps:$4 sm:$0xff]   ;;  %v1788_v38 = vld [vmem:[%s2572_s1 + $0x90] ss:$8 sps:$4 sm:$0xff]   ;;  %v1790_v40 = vld [vmem:[%s2572_s1 + $0xa4] ss:$8 sps:$4 sm:$0xff]  }
   0xe   :  { %v1786_v37 = vld [vmem:[%s2572_s1 + $0x294] ss:$8 sps:$4 sm:$0xff]   ;;  %v1789_v39 = vld [vmem:[%s2572_s1 + $0x290] ss:$8 sps:$4 sm:$0xff]   ;;  %v1792_v41 = vld [vmem:[%s2572_s1 + $0x2a4] ss:$8 sps:$4 sm:$0xff]  }
   0xf   :  { %966 = vmatpush1.bf16.msra.mxu1 %v1752_v14  ;;  %v1794_v42 = vld [vmem:[%s2572_s1 + $0xa0] ss:$8 sps:$4 sm:$0xff]   ;;  %v1796_v44 = vld [vmem:[%s2572_s1 + $0xb4] ss:$8 sps:$4 sm:$0xff]   ;;  %v1800_v46 = vld [vmem:[%s2572_s1 + $0xb0] ss:$8 sps:$4 sm:$0xff]  }
  0x10   :  { %1052 = vmatpush1.bf16.msra.mxu0 %v1753_v15  ;;  %967 = vmatprep.subr.bf16.mxu1 %v1754_v16  ;;  %v1795_v43 = vld [vmem:[%s2572_s1 + $0x2a0] ss:$8 sps:$4 sm:$0xff]   ;;  %v1798_v45 = vld [vmem:[%s2572_s1 + $0x2b4] ss:$8 sps:$4 sm:$0xff]   ;;  %v1801_v47 = vld [vmem:[%s2572_s1 + $0x2b0] ss:$8 sps:$4 sm:$0xff]  }
  0x11   :  { %1053 = vmatprep.subr.bf16.mxu0 %v1756_v17  ;;  %v1828_v48 = vld [vmem:[%s2573_s0 + $0x4] ss:$36 sps:$4 sm:$0xff]   ;;  %v1834_v51 = vld [vmem:[%s2573_s0 + $0x14] ss:$36 sps:$4 sm:$0xff]  }
  0x12   :  { %v1802_v49 = vld [vmem:[%s2572_s1 + $0xc4] ss:$8 sps:$4 sm:$0xff]   ;;  %991 = vmatprep.mubr.bf16.mxu1 %v1828_v48  ;;  %v1806_v52 = vld [vmem:[%s2572_s1 + $0xc0] ss:$8 sps:$4 sm:$0xff]   ;;  %v1808_v54 = vld [vmem:[%s2572_s1 + $0xd4] ss:$8 sps:$4 sm:$0xff]   ;;  %1077 = vmatprep.mubr.bf16.mxu0 %v1834_v51 }
  0x13   :  { %968 = vmatpush1.bf16.msra.mxu1 %v1758_v18  ;;  %v1804_v50 = vld [vmem:[%s2572_s1 + $0x2c4] ss:$8 sps:$4 sm:$0xff]   ;;  %v1807_v53 = vld [vmem:[%s2572_s1 + $0x2c0] ss:$8 sps:$4 sm:$0xff]   ;;  %v1810_v55 = vld [vmem:[%s2572_s1 + $0x2d4] ss:$8 sps:$4 sm:$0xff]  }
  0x14   :  { %1054 = vmatpush1.bf16.msra.mxu0 %v1759_v19  ;;  %969 = vmatprep.subr.bf16.mxu1 %v1760_v20  ;;  %v1812_v56 = vld [vmem:[%s2572_s1 + $0xd0] ss:$8 sps:$4 sm:$0xff]   ;;  %v1814_v58 = vld [vmem:[%s2572_s1 + $0xe4] ss:$8 sps:$4 sm:$0xff]   ;;  %v1818_v60 = vld [vmem:[%s2572_s1 + $0xe0] ss:$8 sps:$4 sm:$0xff]  }
  0x15   :  { %1055 = vmatprep.subr.bf16.mxu0 %v1762_v21  ;;  %v1813_v57 = vld [vmem:[%s2572_s1 + $0x2d0] ss:$8 sps:$4 sm:$0xff]   ;;  %v1816_v59 = vld [vmem:[%s2572_s1 + $0x2e4] ss:$8 sps:$4 sm:$0xff]   ;;  %v1819_v61 = vld [vmem:[%s2572_s1 + $0x2e0] ss:$8 sps:$4 sm:$0xff]  }
  0x16   :  { %v1820_v62 = vld [vmem:[%s2572_s1 + $0xf4] ss:$8 sps:$4 sm:$0xff]   ;;  %v1824_v0 = vld [vmem:[%s2572_s1 + $0xf0] ss:$8 sps:$4 sm:$0xff]   ;;  %v1831_v2 = vld [vmem:[%s2572_s1 + $0x104] ss:$8 sps:$4 sm:$0xff]  }
  0x17   :  { %970 = vmatpush1.bf16.msra.mxu1 %v1764_v22  ;;  %v1822_v63 = vld [vmem:[%s2572_s1 + $0x2f4] ss:$8 sps:$4 sm:$0xff]   ;;  %v1825_v1 = vld [vmem:[%s2572_s1 + $0x2f0] ss:$8 sps:$4 sm:$0xff]   ;;  %v1837_v3 = vld [vmem:[%s2572_s1 + $0x304] ss:$8 sps:$4 sm:$0xff]  }
  0x18   :  { %1056 = vmatpush1.bf16.msra.mxu0 %v1765_v23  ;;  %971 = vmatprep.subr.bf16.mxu1 %v1766_v24  ;;  %v1826_v4 = vld [vmem:[%s2573_s0] ss:$36 sps:$4 sm:$0xff]   ;;  %v1832_v6 = vld [vmem:[%s2573_s0 + $0x10] ss:$36 sps:$4 sm:$0xff]  }
  0x19   :  { %1057 = vmatprep.subr.bf16.mxu0 %v1768_v25  ;;  %v1829_v5 = vld [vmem:[%s2572_s1 + $0x100] ss:$8 sps:$4 sm:$0xff]   ;;  %v1840_v8 = vld [vmem:[%s2572_s1 + $0x114] ss:$8 sps:$4 sm:$0xff]   ;;  %v1838_v10 = vld [vmem:[%s2572_s1 + $0x110] ss:$8 sps:$4 sm:$0xff]  }
  0x1a   :  { %v1835_v7 = vld [vmem:[%s2572_s1 + $0x300] ss:$8 sps:$4 sm:$0xff]   ;;  %v1843_v9 = vld [vmem:[%s2572_s1 + $0x314] ss:$8 sps:$4 sm:$0xff]   ;;  %v1841_v11 = vld [vmem:[%s2572_s1 + $0x310] ss:$8 sps:$4 sm:$0xff]  }
  0x1b   :  { %972 = vmatpush1.bf16.msra.mxu1 %v1770_v26  ;;  %v1846_v12 = vld [vmem:[%s2572_s1 + $0x124] ss:$8 sps:$4 sm:$0xff]   ;;  %v1844_v14 = vld [vmem:[%s2572_s1 + $0x120] ss:$8 sps:$4 sm:$0xff]   ;;  %v1852_v16 = vld [vmem:[%s2572_s1 + $0x134] ss:$8 sps:$4 sm:$0xff]  }
  0x1c   :  { %1058 = vmatpush1.bf16.msra.mxu0 %v1771_v27  ;;  %973 = vmatprep.subr.bf16.mxu1 %v1772_v28  ;;  %v1849_v13 = vld [vmem:[%s2572_s1 + $0x324] ss:$8 sps:$4 sm:$0xff]   ;;  %v1847_v15 = vld [vmem:[%s2572_s1 + $0x320] ss:$8 sps:$4 sm:$0xff]   ;;  %v1855_v17 = vld [vmem:[%s2572_s1 + $0x334] ss:$8 sps:$4 sm:$0xff]  }
  0x1d   :  { %1059 = vmatprep.subr.bf16.mxu0 %v1774_v29  ;;  %v1850_v18 = vld [vmem:[%s2572_s1 + $0x130] ss:$8 sps:$4 sm:$0xff]   ;;  %v1858_v20 = vld [vmem:[%s2572_s1 + $0x144] ss:$8 sps:$4 sm:$0xff]   ;;  %v1856_v22 = vld [vmem:[%s2572_s1 + $0x140] ss:$8 sps:$4 sm:$0xff]  }
  0x1e   :  { %v1853_v19 = vld [vmem:[%s2572_s1 + $0x330] ss:$8 sps:$4 sm:$0xff]   ;;  %v1861_v21 = vld [vmem:[%s2572_s1 + $0x344] ss:$8 sps:$4 sm:$0xff]   ;;  %v1859_v23 = vld [vmem:[%s2572_s1 + $0x340] ss:$8 sps:$4 sm:$0xff]  }
  0x1f   :  { %974 = vmatpush1.bf16.msra.mxu1 %v1776_v30  ;;  %v1864_v24 = vld [vmem:[%s2572_s1 + $0x154] ss:$8 sps:$4 sm:$0xff]   ;;  %v1862_v26 = vld [vmem:[%s2572_s1 + $0x150] ss:$8 sps:$4 sm:$0xff]   ;;  %v1870_v28 = vld [vmem:[%s2572_s1 + $0x164] ss:$8 sps:$4 sm:$0xff]  }
  0x20   :  { %1060 = vmatpush1.bf16.msra.mxu0 %v1777_v31  ;;  %975 = vmatprep.subr.bf16.mxu1 %v1778_v32  ;;  %v1867_v25 = vld [vmem:[%s2572_s1 + $0x354] ss:$8 sps:$4 sm:$0xff]   ;;  %v1865_v27 = vld [vmem:[%s2572_s1 + $0x350] ss:$8 sps:$4 sm:$0xff]   ;;  %v1873_v29 = vld [vmem:[%s2572_s1 + $0x364] ss:$8 sps:$4 sm:$0xff]  }
  0x21   :  { %1061 = vmatprep.subr.bf16.mxu0 %v1780_v33  ;;  %v1868_v30 = vld [vmem:[%s2572_s1 + $0x160] ss:$8 sps:$4 sm:$0xff]   ;;  %v1876_v32 = vld [vmem:[%s2572_s1 + $0x174] ss:$8 sps:$4 sm:$0xff]  }
  0x22   :  { %v1871_v31 = vld [vmem:[%s2572_s1 + $0x360] ss:$8 sps:$4 sm:$0xff]   ;;  %v1879_v33 = vld [vmem:[%s2572_s1 + $0x374] ss:$8 sps:$4 sm:$0xff]  }
  0x23   :  { %976 = vmatpush1.bf16.msra.mxu1 %v1782_v34  ;;  %v1930_v34 = vld [vmem:[%s2573_s0 + $0xc] ss:$36 sps:$4 sm:$0xff]   ;;  %v1892_v48 = vld [vmem:[%s2572_s1 + $0x1a0] ss:$8 sps:$4 sm:$0xff]   ;;  %v1903_v51 = vld [vmem:[%s2572_s1 + $0x3b4] ss:$8 sps:$4 sm:$0xff]  }
  0x24   :  { %1062 = vmatpush1.bf16.msra.mxu0 %v1783_v35  ;;  %977 = vmatprep.subr.bf16.mxu1 %v1784_v36  ;;  %v1933_v35 = vld [vmem:[%s2573_s0 + $0x1c] ss:$36 sps:$4 sm:$0xff]   ;;  %v1874_v36 = vld [vmem:[%s2572_s1 + $0x170] ss:$8 sps:$4 sm:$0xff]  }
  0x25   :  { %1063 = vmatprep.subr.bf16.mxu0 %v1786_v37  ;;  %v1877_v37 = vld [vmem:[%s2572_s1 + $0x370] ss:$8 sps:$4 sm:$0xff]  }
  0x27   :  { %978 = vmatpush1.bf16.msra.mxu1 %v1788_v38  ;;  %v1882_v38 = vld [vmem:[%s2572_s1 + $0x184] ss:$8 sps:$4 sm:$0xff]  }
  0x28   :  { %1064 = vmatpush1.bf16.msra.mxu0 %v1789_v39  ;;  %979 = vmatprep.subr.bf16.mxu1 %v1790_v40  ;;  %v1885_v39 = vld [vmem:[%s2572_s1 + $0x384] ss:$8 sps:$4 sm:$0xff]   ;;  %v1880_v40 = vld [vmem:[%s2572_s1 + $0x180] ss:$8 sps:$4 sm:$0xff]  }
  0x29   :  { %1065 = vmatprep.subr.bf16.mxu0 %v1792_v41  ;;  %v1883_v41 = vld [vmem:[%s2572_s1 + $0x380] ss:$8 sps:$4 sm:$0xff]  }
  0x2b   :  { %980 = vmatpush1.bf16.msra.mxu1 %v1794_v42  ;;  %v1888_v42 = vld [vmem:[%s2572_s1 + $0x194] ss:$8 sps:$4 sm:$0xff]  }
  0x2c   :  { %1066 = vmatpush1.bf16.msra.mxu0 %v1795_v43  ;;  %981 = vmatprep.subr.bf16.mxu1 %v1796_v44  ;;  %v1891_v43 = vld [vmem:[%s2572_s1 + $0x394] ss:$8 sps:$4 sm:$0xff]   ;;  %v1886_v44 = vld [vmem:[%s2572_s1 + $0x190] ss:$8 sps:$4 sm:$0xff]  }
  0x2d   :  { %1067 = vmatprep.subr.bf16.mxu0 %v1798_v45  ;;  %v1889_v45 = vld [vmem:[%s2572_s1 + $0x390] ss:$8 sps:$4 sm:$0xff]  }
  0x2f   :  { %982 = vmatpush1.bf16.msra.mxu1 %v1800_v46  ;;  %v1894_v46 = vld [vmem:[%s2572_s1 + $0x1a4] ss:$8 sps:$4 sm:$0xff]  }
  0x30   :  { %1068 = vmatpush1.bf16.msra.mxu0 %v1801_v47  ;;  %983 = vmatprep.subr.bf16.mxu1 %v1802_v49  ;;  %v1897_v47 = vld [vmem:[%s2572_s1 + $0x3a4] ss:$8 sps:$4 sm:$0xff]   ;;  %v1895_v49 = vld [vmem:[%s2572_s1 + $0x3a0] ss:$8 sps:$4 sm:$0xff]  }
  0x31   :  { %1069 = vmatprep.subr.bf16.mxu0 %v1804_v50  ;;  %v1900_v50 = vld [vmem:[%s2572_s1 + $0x1b4] ss:$8 sps:$4 sm:$0xff]  }
  0x33   :  { %984 = vmatpush1.bf16.msra.mxu1 %v1806_v52  ;;  %v1898_v52 = vld [vmem:[%s2572_s1 + $0x1b0] ss:$8 sps:$4 sm:$0xff]  }
  0x34   :  { %1070 = vmatpush1.bf16.msra.mxu0 %v1807_v53  ;;  %985 = vmatprep.subr.bf16.mxu1 %v1808_v54  ;;  %v1901_v53 = vld [vmem:[%s2572_s1 + $0x3b0] ss:$8 sps:$4 sm:$0xff]   ;;  %v1906_v54 = vld [vmem:[%s2572_s1 + $0x1c4] ss:$8 sps:$4 sm:$0xff]  }
  0x35   :  { %1071 = vmatprep.subr.bf16.mxu0 %v1810_v55  ;;  %v1909_v55 = vld [vmem:[%s2572_s1 + $0x3c4] ss:$8 sps:$4 sm:$0xff]  }
  0x37   :  { %986 = vmatpush1.bf16.msra.mxu1 %v1812_v56  ;;  %v1904_v56 = vld [vmem:[%s2572_s1 + $0x1c0] ss:$8 sps:$4 sm:$0xff]  }
  0x38   :  { %1072 = vmatpush1.bf16.msra.mxu0 %v1813_v57  ;;  %987 = vmatprep.subr.bf16.mxu1 %v1814_v58  ;;  %v1907_v57 = vld [vmem:[%s2572_s1 + $0x3c0] ss:$8 sps:$4 sm:$0xff]   ;;  %v1912_v58 = vld [vmem:[%s2572_s1 + $0x1d4] ss:$8 sps:$4 sm:$0xff]  }
  0x39   :  { %1073 = vmatprep.subr.bf16.mxu0 %v1816_v59  ;;  %v1915_v59 = vld [vmem:[%s2572_s1 + $0x3d4] ss:$8 sps:$4 sm:$0xff]  }
  0x3b   :  { %988 = vmatpush1.bf16.msra.mxu1 %v1818_v60  ;;  %v1910_v60 = vld [vmem:[%s2572_s1 + $0x1d0] ss:$8 sps:$4 sm:$0xff]  }
  0x3c   :  { %1074 = vmatpush1.bf16.msra.mxu0 %v1819_v61  ;;  %989 = vmatprep.subr.bf16.mxu1 %v1820_v62  ;;  %v1913_v61 = vld [vmem:[%s2572_s1 + $0x3d0] ss:$8 sps:$4 sm:$0xff]   ;;  %v1918_v62 = vld [vmem:[%s2572_s1 + $0x1e4] ss:$8 sps:$4 sm:$0xff]  }
  0x3d   :  { %1075 = vmatprep.subr.bf16.mxu0 %v1822_v63  ;;  %v1921_v63 = vld [vmem:[%s2572_s1 + $0x3e4] ss:$8 sps:$4 sm:$0xff]  }
  0x3f   :  { %990 = vmatpush1.bf16.msra.mxu1 %v1824_v0  ;;  %v1916_v0 = vld [vmem:[%s2572_s1 + $0x1e0] ss:$8 sps:$4 sm:$0xff]  }
  0x40   :  { %1076 = vmatpush1.bf16.msra.mxu0 %v1825_v1  ;;  %1002 = vmatprep.subr.bf16.mxu1 %v1831_v2  ;;  %v1919_v1 = vld [vmem:[%s2572_s1 + $0x3e0] ss:$8 sps:$4 sm:$0xff]   ;;  %v1924_v2 = vld [vmem:[%s2572_s1 + $0x1f4] ss:$8 sps:$4 sm:$0xff]  }
  0x41   :  { %1088 = vmatprep.subr.bf16.mxu0 %v1837_v3  ;;  %v1927_v3 = vld [vmem:[%s2572_s1 + $0x3f4] ss:$8 sps:$4 sm:$0xff]  }
  0x42   :  { %992 = vmatmul.mubr.bf16.vlgmr.msra.gmra.mrb[0].mxu1 %v1826_v4  ;;  %v1922_v4 = vld [vmem:[%s2572_s1 + $0x1f0] ss:$8 sps:$4 sm:$0xff]  }
  0x43   :  { %1078 = vmatmul.mubr.bf16.vlgmr.msra.gmra.mrb[0].mxu0 %v1832_v6  ;;  %1003 = vmatpush1.bf16.msra.mxu1 %v1829_v5  ;;  %v1925_v5 = vld [vmem:[%s2572_s1 + $0x3f0] ss:$8 sps:$4 sm:$0xff]   ;;  %v1936_v6 = vld [vmem:[%s2572_s1 + $0x404] ss:$8 sps:$4 sm:$0xff]  }
  0x44   :  { %1089 = vmatpush1.bf16.msra.mxu0 %v1835_v7  ;;  %1004 = vmatprep.subr.bf16.mxu1 %v1840_v8  ;;  %v1928_v7 = vld [vmem:[%s2573_s0 + $0x8] ss:$36 sps:$4 sm:$0xff]   ;;  %v1931_v8 = vld [vmem:[%s2573_s0 + $0x18] ss:$36 sps:$4 sm:$0xff]  }
  0x45   :  { %1090 = vmatprep.subr.bf16.mxu0 %v1843_v9  ;;  %1034 = vmatprep.mubr.bf16.mxu1 %v1930_v34  ;;  %v1934_v9 = vld [vmem:[%s2572_s1 + $0x400] ss:$8 sps:$4 sm:$0xff]  }
  0x46   :  { %1120 = vmatprep.mubr.bf16.mxu0 %v1933_v35  ;;  %v1967_v34 = vld [vmem:[%s2574_s3 + $0x60] sm:$0xff]  }
  0x47   :  { %1005 = vmatpush1.bf16.msra.mxu1 %v1838_v10  ;;  %v1939_v10 = vld [vmem:[%s2572_s1 + $0x414] ss:$8 sps:$4 sm:$0xff]   ;;  %v1968_v35 = vld [vmem:[%s2574_s3 + $0x20] sm:$0xff]  }
  0x48   :  { %1091 = vmatpush1.bf16.msra.mxu0 %v1841_v11  ;;  %1006 = vmatprep.subr.bf16.mxu1 %v1846_v12  ;;  %v1937_v11 = vld [vmem:[%s2572_s1 + $0x410] ss:$8 sps:$4 sm:$0xff]   ;;  %v1983_v12 = vmov 0  }
  0x49   :  { %1092 = vmatprep.subr.bf16.mxu0 %v1849_v13  ;;  %v1942_v13 = vld [vmem:[%s2572_s1 + $0x424] ss:$8 sps:$4 sm:$0xff]  }
  0x4b   :  { %1007 = vmatpush1.bf16.msra.mxu1 %v1844_v14  ;;  %v1940_v14 = vld [vmem:[%s2572_s1 + $0x420] ss:$8 sps:$4 sm:$0xff]  }
  0x4c   :  { %1093 = vmatpush1.bf16.msra.mxu0 %v1847_v15  ;;  %1008 = vmatprep.subr.bf16.mxu1 %v1852_v16  ;;  %v1945_v15 = vld [vmem:[%s2572_s1 + $0x434] ss:$8 sps:$4 sm:$0xff]   ;;  %v1943_v16 = vld [vmem:[%s2572_s1 + $0x430] ss:$8 sps:$4 sm:$0xff]  }
  0x4d   :  { %1094 = vmatprep.subr.bf16.mxu0 %v1855_v17  ;;  %v1948_v17 = vld [vmem:[%s2572_s1 + $0x444] ss:$8 sps:$4 sm:$0xff]  }
  0x4f   :  { %1009 = vmatpush1.bf16.msra.mxu1 %v1850_v18  ;;  %v1946_v18 = vld [vmem:[%s2572_s1 + $0x440] ss:$8 sps:$4 sm:$0xff]  }
  0x50   :  { %1095 = vmatpush1.bf16.msra.mxu0 %v1853_v19  ;;  %1010 = vmatprep.subr.bf16.mxu1 %v1858_v20  ;;  %v1951_v19 = vld [vmem:[%s2572_s1 + $0x454] ss:$8 sps:$4 sm:$0xff]   ;;  %v1949_v20 = vld [vmem:[%s2572_s1 + $0x450] ss:$8 sps:$4 sm:$0xff]  }
  0x51   :  { %1096 = vmatprep.subr.bf16.mxu0 %v1861_v21  ;;  %v1954_v21 = vld [vmem:[%s2572_s1 + $0x464] ss:$8 sps:$4 sm:$0xff]  }
  0x53   :  { %1011 = vmatpush1.bf16.msra.mxu1 %v1856_v22  ;;  %v1952_v22 = vld [vmem:[%s2572_s1 + $0x460] ss:$8 sps:$4 sm:$0xff]  }
  0x54   :  { %1097 = vmatpush1.bf16.msra.mxu0 %v1859_v23  ;;  %1012 = vmatprep.subr.bf16.mxu1 %v1864_v24  ;;  %v1957_v23 = vld [vmem:[%s2572_s1 + $0x474] ss:$8 sps:$4 sm:$0xff]   ;;  %v1955_v24 = vld [vmem:[%s2572_s1 + $0x470] ss:$8 sps:$4 sm:$0xff]  }
  0x55   :  { %1098 = vmatprep.subr.bf16.mxu0 %v1867_v25  ;;  %v1958_v25 = vld [vmem:[%s2573_s0 + $0x20] ss:$36 sps:$4 sm:$0xff]  }
  0x57   :  { %1013 = vmatpush1.bf16.msra.mxu1 %v1862_v26  ;;  %v1959_v26 = vld [vmem:[%s2574_s3 + $0x40] sm:$0xff]  }
  0x58   :  { %1099 = vmatpush1.bf16.msra.mxu0 %v1865_v27  ;;  %1014 = vmatprep.subr.bf16.mxu1 %v1870_v28  ;;  %v1960_v27 = vld [vmem:[%s2574_s3] sm:$0xff]   ;;  %v1961_v28 = vld [vmem:[%s2574_s3 + $0x48] sm:$0xff]  }
  0x59   :  { %1100 = vmatprep.subr.bf16.mxu0 %v1873_v29  ;;  %v1962_v29 = vld [vmem:[%s2574_s3 + $0x8] sm:$0xff]  }
  0x5b   :  { %1015 = vmatpush1.bf16.msra.mxu1 %v1868_v30  ;;  %v1963_v30 = vld [vmem:[%s2574_s3 + $0x50] sm:$0xff]  }
  0x5c   :  { %1101 = vmatpush1.bf16.msra.mxu0 %v1871_v31  ;;  %1016 = vmatprep.subr.bf16.mxu1 %v1876_v32  ;;  %v1964_v31 = vld [vmem:[%s2574_s3 + $0x10] sm:$0xff]   ;;  %v1965_v32 = vld [vmem:[%s2574_s3 + $0x58] sm:$0xff]  }
  0x5d   :  { %1102 = vmatprep.subr.bf16.mxu0 %v1879_v33  ;;  %v1966_v33 = vld [vmem:[%s2574_s3 + $0x18] sm:$0xff]  }
  0x5f   :  { %1017 = vmatpush1.bf16.msra.mxu1 %v1874_v36  ;;  %v1969_v36 = vld [vmem:[%s2574_s3 + $0x68] sm:$0xff]  }
  0x60   :  { %1103 = vmatpush1.bf16.msra.mxu0 %v1877_v37  ;;  %1018 = vmatprep.subr.bf16.mxu1 %v1882_v38  ;;  %v1970_v37 = vld [vmem:[%s2574_s3 + $0x28] sm:$0xff]   ;;  %v1971_v38 = vld [vmem:[%s2574_s3 + $0x70] sm:$0xff]  }
  0x61   :  { %1104 = vmatprep.subr.bf16.mxu0 %v1885_v39  ;;  %v1972_v39 = vld [vmem:[%s2574_s3 + $0x30] sm:$0xff]  }
  0x63   :  { %1019 = vmatpush1.bf16.msra.mxu1 %v1880_v40  ;;  %v1973_v40 = vld [vmem:[%s2574_s3 + $0x78] sm:$0xff]  }
  0x64   :  { %1105 = vmatpush1.bf16.msra.mxu0 %v1883_v41  ;;  %1020 = vmatprep.subr.bf16.mxu1 %v1888_v42  ;;  %v1974_v41 = vld [vmem:[%s2574_s3 + $0x38] sm:$0xff]   ;;  %v1984_v42 = vmov 0.0  }
  0x65   :  { %1106 = vmatprep.subr.bf16.mxu0 %v1891_v43 }
  0x67   :  { %1021 = vmatpush1.bf16.msra.mxu1 %v1886_v44 }
  0x68   :  { %1107 = vmatpush1.bf16.msra.mxu0 %v1889_v45  ;;  %1022 = vmatprep.subr.bf16.mxu1 %v1894_v46 }
  0x69   :  { %1108 = vmatprep.subr.bf16.mxu0 %v1897_v47  ;;  %v183_v47 = vlaneseq }
  0x6b   :  { %1023 = vmatpush1.bf16.msra.mxu1 %v1892_v48  ;;  %v184_v48 = vshrl.u32 %v183_v47, 7 }
  0x6c   :  { %1109 = vmatpush1.bf16.msra.mxu0 %v1895_v49  ;;  %1024 = vmatprep.subr.bf16.mxu1 %v1900_v50  ;;  %v181_v50 = vld [vmem:[%s2576_s2] sm:$0x3] }
  0x6d   :  { %1110 = vmatprep.subr.bf16.mxu0 %v1903_v51  ;;  %v185_v49 = vsub.s32 0, %v184_v48  ;;  %v189_v51 = vsub.s32 1, %v184_v48 }
  0x6f   :  { %1025 = vmatpush1.bf16.msra.mxu1 %v1898_v52  ;;  %v186_v52 = vrot.slane %v181_v50, %v185_v49 }
  0x70   :  { %1111 = vmatpush1.bf16.msra.mxu0 %v1901_v53  ;;  %1026 = vmatprep.subr.bf16.mxu1 %v1906_v54  ;;  %v190_v53 = vrot.slane %v181_v50, %v189_v51 }
  0x71   :  { %1112 = vmatprep.subr.bf16.mxu0 %v1909_v55 }
  0x73   :  { %1027 = vmatpush1.bf16.msra.mxu1 %v1904_v56 }
  0x74   :  { %1113 = vmatpush1.bf16.msra.mxu0 %v1907_v57  ;;  %1028 = vmatprep.subr.bf16.mxu1 %v1912_v58 }
  0x75   :  { %1114 = vmatprep.subr.bf16.mxu0 %v1915_v59 }
  0x77   :  { %1029 = vmatpush1.bf16.msra.mxu1 %v1910_v60 }
  0x78   :  { %1115 = vmatpush1.bf16.msra.mxu0 %v1913_v61  ;;  %1030 = vmatprep.subr.bf16.mxu1 %v1918_v62 }
  0x79   :  { %1116 = vmatprep.subr.bf16.mxu0 %v1921_v63 }
  0x7b   :  { %1031 = vmatpush1.bf16.msra.mxu1 %v1916_v0 }
  0x7c   :  { %1117 = vmatpush1.bf16.msra.mxu0 %v1919_v1  ;;  %1032 = vmatprep.subr.bf16.mxu1 %v1924_v2 }
  0x7d   :  { %1118 = vmatprep.subr.bf16.mxu0 %v1927_v3 }
  0x7f   :  { %1033 = vmatpush1.bf16.msra.mxu1 %v1922_v4 }
  0x80   :  { %1119 = vmatpush1.bf16.msra.mxu0 %v1925_v5  ;;  %1656 = vmatprep.subr.bf16.mxu1 %v1959_v26 }
  0x81   :  { %1131 = vmatprep.subr.bf16.mxu0 %v1936_v6 }
  0x82   :  { %1035 = vmatmul.mubr.bf16.vlgmr.msra.gmra.mrb[0].mxu1 %v1928_v7 }
  0x83   :  { %1121 = vmatmul.mubr.bf16.vlgmr.msra.gmra.mrb[0].mxu0 %v1931_v8  ;;  %1657 = vmatpush3.bf16.msra.mxu1 %v1960_v27  ;;  %v1975_v8 = vld [vmem:[%s2575_s5] sm:$0xff]  }
  0x84   :  { %1132 = vmatpush1.bf16.msra.mxu0 %v1934_v9  ;;  %1163 = vmatprep.mubr.bf16.mxu0 %v1983_v12  ;;  %v1976_v9 = vld [vmem:[%s2575_s5 + $0x8] sm:$0xff]   ;;  %v1979_v12 = vld [vmem:[%s2575_s5 + $0x20] sm:$0xff]  }
  0x85   :  { %1133 = vmatprep.subr.bf16.mxu0 %v1939_v10  ;;  %1658 = vmatprep.subr.bf16.mxu1 %v1961_v28  ;;  %v1977_v10 = vld [vmem:[%s2575_s5 + $0x10] sm:$0xff]   ;;  %v1647_v28 = vld [vmem:[%s2578_s6] ss:$0 sm:$0xff] }
  0x87   :  { %1659 = vmatpush3.bf16.msra.mxu1 %v1962_v29 }
  0x88   :  { %1134 = vmatpush1.bf16.msra.mxu0 %v1937_v11  ;;  %1660 = vmatprep.subr.bf16.mxu1 %v1963_v30  ;;  %v1978_v11 = vld [vmem:[%s2575_s5 + $0x18] sm:$0xff]  }
  0x89   :  { %1135 = vmatprep.subr.bf16.mxu0 %v1942_v13  ;;  %v1980_v13 = vld [vmem:[%s2575_s5 + $0x28] sm:$0xff]  }
  0x8b   :  { %1661 = vmatpush3.bf16.msra.mxu1 %v1964_v31 }
  0x8c   :  { %1136 = vmatpush1.bf16.msra.mxu0 %v1940_v14  ;;  %1662 = vmatprep.subr.bf16.mxu1 %v1965_v32  ;;  %v1981_v14 = vld [vmem:[%s2575_s5 + $0x30] sm:$0xff]  }
  0x8d   :  { %1137 = vmatprep.subr.bf16.mxu0 %v1945_v15  ;;  %v1982_v15 = vld [vmem:[%s2575_s5 + $0x38] sm:$0xff]  }
  0x8f   :  { %1663 = vmatpush3.bf16.msra.mxu1 %v1966_v33 }
  0x90   :  { %1138 = vmatpush1.bf16.msra.mxu0 %v1943_v16  ;;  %1664 = vmatprep.subr.bf16.mxu1 %v1967_v34 }
  0x91   :  { %1139 = vmatprep.subr.bf16.mxu0 %v1948_v17  ;;  %v1630_v17 = vld [vmem:[%s2577_s4] ss:$0 sm:$0xff] }
  0x93   :  { %1665 = vmatpush3.bf16.msra.mxu1 %v1968_v35 }
  0x94   :  { %1140 = vmatpush1.bf16.msra.mxu0 %v1946_v18  ;;  %1666 = vmatprep.subr.bf16.mxu1 %v1969_v36 }
  0x95   :  { %1141 = vmatprep.subr.bf16.mxu0 %v1951_v19 }
  0x97   :  { %1667 = vmatpush3.bf16.msra.mxu1 %v1970_v37 }
  0x98   :  { %1142 = vmatpush1.bf16.msra.mxu0 %v1949_v20  ;;  %1668 = vmatprep.subr.bf16.mxu1 %v1971_v38 }
  0x99   :  { %1143 = vmatprep.subr.bf16.mxu0 %v1954_v21 }
  0x9b   :  { %1669 = vmatpush3.bf16.msra.mxu1 %v1972_v39 }
  0x9c   :  { %1144 = vmatpush1.bf16.msra.mxu0 %v1952_v22  ;;  %1670 = vmatprep.subr.bf16.mxu1 %v1973_v40 }
  0x9d   :  { %1145 = vmatprep.subr.bf16.mxu0 %v1957_v23 }
  0x9f   :  { %1671 = vmatpush3.bf16.msra.mxu1 %v1974_v41 }
  0xa0   :  { %1146 = vmatpush1.bf16.msra.mxu0 %v1955_v24  ;;  %1687 = vmatprep.subr.bf16.mxu1 %v1984_v42 }
  0xa3   :  { %1164 = vmatmul.mubr.bf16.vlgmr.msra.gmra.mrb[0].mxu0 %v1958_v25 }
 0x155   :  { %v1036_v43 = vpop.f32.mrb[0].mxu1 }
 0x156   :  { %v1038_v44 = vpop.f32.mrb[1].mxu1  ;;  %v1707_v54 = vadd.f32 %v1036_v43, %v186_v52 }
 0x157   :  { %v1040_v45 = vpop.f32.mrb[2].mxu1  ;;  %v1709_v55 = vadd.f32 %v1038_v44, %v190_v53 }
 0x158   :  { %v1042_v46 = vpop.f32.mrb[3].mxu1  ;;  %v1711_v57 = vadd.f32 %v1040_v45, %v186_v52 }
 0x159   :  { %v1713_v60 = vadd.f32 %v1042_v46, %v190_v53 }
 0x176   :  { %v1165_v56 = vpop.f32.mrb[0].mxu0 }
 0x177   :  { %v1708_v58 = vadd.f32 %v1707_v54, %v1165_v56  ;;  %v1167_v59 = vpop.f32.mrb[1].mxu0 }
 0x178   :  { %v1710_v61 = vadd.f32 %v1709_v55, %v1167_v59  ;;  %v1169_v62 = vpop.f32.mrb[2].mxu0 }
 0x179   :  { %v1712_v63 = vadd.f32 %v1711_v57, %v1169_v62  ;;  %v1171_v0 = vpop.f32.mrb[3].mxu0  ;;  %v1174_v2 = vmax.f32 %v1708_v58, 0.0 }
 0x17a   :  { %v1714_v1 = vadd.f32 %v1713_v60, %v1171_v0  ;;  %v1175_v4 = vmax.f32 %v1710_v61, 0.0 }
 0x17b   :  { %v1176_v3 = vmax.f32 %v1712_v63, 0.0 }
 0x17c   :  { %v1177_v5 = vmax.f32 %v1714_v1, 0.0 }
 0x17d   :  { %v1178_v6 = vpack.c.bf16 %v1176_v3, %v1174_v2 }
 0x17e   :  { %v1179_v7 = vpack.c.bf16 %v1177_v5, %v1175_v4 }
 0x180   :  { %1347 = vmatprep.mubr.bf16.mxu1 %v1179_v7 }
 0x181   :  { %1348 = vmatmul.mubr.bf16.vlgmr.msra.gmra.mrb[4].mxu1 %v1178_v6 }
 0x182   :  { %1688 = vmatpush3.bf16.msra.mxu1 %v1975_v8  ;;  %1703 = vmatprep.mubr.msk.bf16.mxu1 %vm1985_vm0, %v1984_v42 }
 0x183   :  { %1689 = vmatprep.subr.bf16.mxu1 %v1984_v42 }
 0x186   :  { %1690 = vmatpush3.bf16.msra.mxu1 %v1976_v9 }
 0x187   :  { %1691 = vmatprep.subr.bf16.mxu1 %v1984_v42 }
 0x18a   :  { %1692 = vmatpush3.bf16.msra.mxu1 %v1977_v10 }
 0x18b   :  { %1693 = vmatprep.subr.bf16.mxu1 %v1984_v42 }
 0x18e   :  { %1694 = vmatpush3.bf16.msra.mxu1 %v1978_v11 }
 0x18f   :  { %1695 = vmatprep.subr.bf16.mxu1 %v1984_v42 }
 0x192   :  { %1696 = vmatpush3.bf16.msra.mxu1 %v1979_v12 }
 0x193   :  { %1697 = vmatprep.subr.bf16.mxu1 %v1984_v42 }
 0x196   :  { %1698 = vmatpush3.bf16.msra.mxu1 %v1980_v13 }
 0x197   :  { %1699 = vmatprep.subr.bf16.mxu1 %v1984_v42 }
 0x19a   :  { %1700 = vmatpush3.bf16.msra.mxu1 %v1981_v14 }
 0x19b   :  { %1701 = vmatprep.subr.bf16.mxu1 %v1984_v42 }
 0x19e   :  { %1702 = vmatpush3.bf16.msra.mxu1 %v1982_v15 }
 0x254   :  { %v1672_v16 = vpop.f32.mrb[4].mxu1 }
 0x255   :  { %v1673_v18 = vpop.f32.mrb[5].mxu1 }
 0x256   :  { %v1674_v19 = vadd.f32 %v1673_v18, %v1672_v16  ;;  %v1675_v20 = vpop.f32.mrb[6].mxu1 }
 0x257   :  { %v1676_v21 = vpop.f32.mrb[7].mxu1 }
 0x258   :  { %v1350_v22 = vadd.f32 %v1674_v19, %v1630_v17  ;;  %v1677_v23 = vadd.f32 %v1676_v21, %v1675_v20 }
 0x25a   :  { %v1353_v24 = vadd.f32 %v1677_v23, %v1630_v17  ;;  %v1356_v25 = vmax.f32 %v1350_v22, 0.0 }
 0x25c   :  { %v1357_v26 = vmax.f32 %v1353_v24, 0.0 }
 0x25e   :  { %v1358_v27 = vpack.c.bf16 %v1357_v26, %v1356_v25 }
 0x260   :  { %1704 = vmatmul.mubr.bf16.vlgmr.msra.gmra.mrb[8].mxu1 %v1358_v27 }
 0x333   :  { %v1464_v29 = vpop.f32.mrb[8].mxu1 }
 0x334   :  { %v1465_v30 = vadd.f32 %v1647_v28, %v1464_v29  ;;  %v1705_v31 = vpop.f32.mrb[9].mxu1 }
 0x335   :  { %v1467_v32 = vpop.f32.mrb[10].mxu1 }
 0x336   :  { %1471 = vst [vmem:[%s2579_s7] sm:$0xff] %v1465_v30  ;;  %v1468_v33 = vadd.f32 %v1647_v28, %v1467_v32  ;;  %v1706_v34 = vpop.f32.mrb[11].mxu1 }
 0x338   :  { %1472 = vst [vmem:[%s2579_s7 + $0x8] sm:$0xff] %v1468_v33 }

</bundles_post_ra>
